<compile_context>
chip_gen: v7x
topology: tpu7x:2x2x1
jax: 0.10.0
libtpu: 0.0.40
codegen_flags: <defaults>
</compile_context>

<pallas_src>
import math

import jax
import jax.numpy as jnp
from jax.experimental import pallas as pl
from jax.experimental.pallas import tpu as pltpu

NEG = -1e30  # additive-mask stand-in for -inf (exp underflows to exactly 0)

# ----------------------------- configuration -----------------------------
VOCAB = 50
D_MODEL = 32
N_HEADS = 4
D_Q = 8          # d_queries == d_keys
D_V = 8
D_INNER = 64
N_LAYERS = 2
MAX_LEN = 32
VPAD = 128       # lane-padded width of the final vocab projection
HK = N_HEADS * D_Q          # 32
HV = N_HEADS * D_V          # 32


# ------------------------------ kernel helpers ----------------------------

def _layernorm(x, g, b):
    mean = jnp.mean(x, axis=-1, keepdims=True)
    var = jnp.mean(jnp.square(x - mean), axis=-1, keepdims=True)
    return (x - mean) * jax.lax.rsqrt(var + 1e-5) * g + b   # PyTorch eps


# ------------------------------- fused kernel ------------------------------

def _decoder_kernel(x_ref, enc_ref, sbias_ref, cbias_ref,
                    sa_ln_g, sa_ln_b, sa_wqkv, sa_bqkv, sa_wo, sa_bo,
                    ca_ln_g, ca_ln_b, ca_wq, ca_bq, ca_wkv, ca_bkv, ca_wo, ca_bo,
                    ff_ln_g, ff_ln_b, ff_w1, ff_b1, ff_w2, ff_b2,
                    fin_ln_g, fin_ln_b, fc_w, fc_b,
                    logits_ref):
    """One grid step = one batch element; all layers statically unrolled."""
    scale = 1.0 / math.sqrt(D_Q)

    x = x_ref[...]          # (L, D)      embedded + positional input
    enc = enc_ref[...]      # (Lenc, D)   encoder output (NOT layer-normed for kv)
    sbias = sbias_ref[...]  # (L, L)      causal + dec-padding additive bias
    cbias = cbias_ref[...]  # (L, Lenc)   enc-padding additive bias

    def attend(q_all, kv_all, bias, wo, bo):
        """q_all: (Lq, H*D_Q); kv_all: (Lk, H*(D_Q+D_V)) already projected.
        Heads are sliced out only for the tiny score/context matmuls; the output
        projection is a single matmul on the lane-concatenated head contexts."""
        ctxs = []
        for h in range(N_HEADS):
            q = q_all[:, h * D_Q:(h + 1) * D_Q]
            k = kv_all[:, h * D_Q:(h + 1) * D_Q]
            v = kv_all[:, HK + h * D_V: HK + (h + 1) * D_V]
            s = jax.lax.dot_general(q, k, (((1,), (1,)), ((), ())),
                                    preferred_element_type=jnp.float32)
            s = s * scale + bias
            p = jnp.exp(s - jnp.max(s, axis=-1, keepdims=True))
            p = p * pl.reciprocal(jnp.sum(p, axis=-1, keepdims=True), approx=True)
            ctxs.append(jnp.dot(p, v, preferred_element_type=jnp.float32))
        ctx = jnp.concatenate(ctxs, axis=-1)                       # (Lq, H*D_V)
        return jnp.dot(ctx, wo, preferred_element_type=jnp.float32) + bo

    # TODO(synk): nn.Dropout treated as identity everywhere (eval-mode forward).
    for l in range(N_LAYERS):
        # --- self-attention: fused QKV projection (one (L,32)x(32,96) matmul) ---
        xn = _layernorm(x, sa_ln_g[l], sa_ln_b[l])
        qkv = jnp.dot(xn, sa_wqkv[l], preferred_element_type=jnp.float32) + sa_bqkv[l]
        x = x + attend(qkv[:, :HK], qkv[:, HK:], sbias, sa_wo[l], sa_bo[l])

        # --- cross-attention: Q from LN(x), K/V from raw encoder output ---------
        xn = _layernorm(x, ca_ln_g[l], ca_ln_b[l])
        q_all = jnp.dot(xn, ca_wq[l], preferred_element_type=jnp.float32) + ca_bq[l]
        kv_all = jnp.dot(enc, ca_wkv[l], preferred_element_type=jnp.float32) + ca_bkv[l]
        x = x + attend(q_all, kv_all, cbias, ca_wo[l], ca_bo[l])

        # --- position-wise feed-forward (LN -> fc1 -> ReLU -> fc2 -> +residual) -
        xn = _layernorm(x, ff_ln_g[l], ff_ln_b[l])
        h1 = jnp.maximum(
            jnp.dot(xn, ff_w1[l], preferred_element_type=jnp.float32) + ff_b1[l], 0.0)
        x = x + jnp.dot(h1, ff_w2[l], preferred_element_type=jnp.float32) + ff_b2[l]

    # --- final LayerNorm + vocab projection (lane-padded to 128) ---------------
    xf = _layernorm(x, fin_ln_g[...], fin_ln_b[...])
    logits_ref[...] = (jnp.dot(xf, fc_w[...], preferred_element_type=jnp.float32)
                       + fc_b[...])


# --------------------------------- wrapper ----------------------------------

def decoder_forward(params, dec_ids, dec_lens, enc_seq, enc_lens):
    N, L = dec_ids.shape
    Lenc = enc_seq.shape[1]
    D = D_MODEL

    # embedding lookup (glue) + scale + positional encoding (dropout == identity)
    x_emb = (params["embedding"][dec_ids] * math.sqrt(D)
             + params["pos_enc"][:, :L, :]).astype(jnp.float32)       # (N, L, D)
    enc = enc_seq.astype(jnp.float32)                                  # (N, Lenc, D)

    # ---- additive attention biases, hoisted out of the kernel entirely --------
    q_idx = jnp.arange(L, dtype=jnp.int32)
    kd_idx = jnp.arange(L, dtype=jnp.int32)
    ke_idx = jnp.arange(Lenc, dtype=jnp.int32)
    pad_d = kd_idx[None, None, :] < dec_lens.astype(jnp.int32)[:, None, None]  # (N,1,L)
    causal = (kd_idx[None, :] <= q_idx[:, None])[None]                          # (1,L,L)
    sbias = jnp.where(jnp.logical_and(pad_d, causal), 0.0, NEG).astype(jnp.float32)
    pad_e = ke_idx[None, None, :] < enc_lens.astype(jnp.int32)[:, None, None]   # (N,1,Le)
    cbias = jnp.where(jnp.broadcast_to(pad_e, (N, L, Lenc)), 0.0, NEG).astype(jnp.float32)

    # ---- stack per-layer weights on a leading layer axis (original layouts) ---
    def stack(fn):
        return jnp.stack([fn(layer) for layer in params["layers"]], axis=0)

    sa_stacks = [
        stack(lambda l: l["self_attn"]["ln_g"].reshape(1, D)),
        stack(lambda l: l["self_attn"]["ln_b"].reshape(1, D)),
        stack(lambda l: jnp.concatenate(                         # fused QKV (32, 96)
            [l["self_attn"]["wq"], l["self_attn"]["wkv"]], axis=1)),
        stack(lambda l: jnp.concatenate(
            [l["self_attn"]["bq"], l["self_attn"]["bkv"]]).reshape(1, -1)),
        stack(lambda l: l["self_attn"]["wo"]),                   # (32, 32)
        stack(lambda l: l["self_attn"]["bo"].reshape(1, D)),
    ]
    ca_stacks = [
        stack(lambda l: l["cross_attn"]["ln_g"].reshape(1, D)),
        stack(lambda l: l["cross_attn"]["ln_b"].reshape(1, D)),
        stack(lambda l: l["cross_attn"]["wq"]),                  # (32, 32)
        stack(lambda l: l["cross_attn"]["bq"].reshape(1, HK)),
        stack(lambda l: l["cross_attn"]["wkv"]),                 # (32, 64)
        stack(lambda l: l["cross_attn"]["bkv"].reshape(1, -1)),
        stack(lambda l: l["cross_attn"]["wo"]),
        stack(lambda l: l["cross_attn"]["bo"].reshape(1, D)),
    ]
    ffn_stacks = [
        stack(lambda l: l["ffn"]["ln_g"].reshape(1, D)),
        stack(lambda l: l["ffn"]["ln_b"].reshape(1, D)),
        stack(lambda l: l["ffn"]["w1"]),
        stack(lambda l: l["ffn"]["b1"].reshape(1, D_INNER)),
        stack(lambda l: l["ffn"]["w2"]),
        stack(lambda l: l["ffn"]["b2"].reshape(1, D)),
    ]
    final_ws = [
        params["ln_g"].reshape(1, D), params["ln_b"].reshape(1, D),
        jnp.pad(params["fc_w"], ((0, 0), (0, VPAD - VOCAB))),    # lane-dense output
        jnp.pad(params["fc_b"], (0, VPAD - VOCAB)).reshape(1, VPAD),
    ]

    weight_arrays = sa_stacks + ca_stacks + ffn_stacks + final_ws
    batched_arrays = [x_emb, enc, sbias, cbias]
    in_arrays = batched_arrays + weight_arrays

    def batch_spec(a):
        tail = tuple(a.shape[1:])
        nz = len(tail)
        return pl.BlockSpec((None,) + tail, lambda b, _n=nz: (b,) + (0,) * _n)

    def const_spec(a):
        zeros = (0,) * a.ndim
        return pl.BlockSpec(a.shape, lambda b, _z=zeros: _z)

    in_specs = ([batch_spec(a) for a in batched_arrays]
                + [const_spec(a) for a in weight_arrays])

    logits_pad = pl.pallas_call(
        _decoder_kernel,
        out_shape=jax.ShapeDtypeStruct((N, L, VPAD), jnp.float32),
        grid=(N,),
        in_specs=in_specs,
        out_specs=pl.BlockSpec((None, L, VPAD), lambda b: (b, 0, 0)),
        compiler_params=pltpu.CompilerParams(
            dimension_semantics=("parallel",)),       # batch elems independent -> 2nd TC on v7x
    )(*in_arrays)

    return logits_pad[:, :, :VOCAB]


# ------------------------------ parameter init -----------------------------

def sinusoidal_pe(max_len, d_model):
    pos = jnp.arange(max_len, dtype=jnp.float32)[:, None]
    i = jnp.arange(0, d_model, 2, dtype=jnp.float32)
    ang = pos / jnp.power(10000.0, i / d_model)
    pe = jnp.zeros((max_len, d_model), jnp.float32)
    pe = pe.at[:, 0::2].set(jnp.sin(ang))
    pe = pe.at[:, 1::2].set(jnp.cos(ang))
    return pe[None]                                           # (1, max_len, d_model)


def init_params(key):
    keys = iter(jax.random.split(key, 64))

    def dense(d_in, d_out):
        bound = 1.0 / math.sqrt(d_in)
        w = jax.random.uniform(next(keys), (d_in, d_out), jnp.float32, -bound, bound)
        b = jax.random.uniform(next(keys), (d_out,), jnp.float32, -bound, bound)
        return w, b

    def mha_params():
        wq, bq = dense(D_MODEL, N_HEADS * D_Q)
        wkv, bkv = dense(D_MODEL, N_HEADS * (D_Q + D_V))
        wo, bo = dense(N_HEADS * D_V, D_MODEL)
        return dict(ln_g=jnp.ones(D_MODEL), ln_b=jnp.zeros(D_MODEL),
                    wq=wq, bq=bq, wkv=wkv, bkv=bkv, wo=wo, bo=bo)

    def ffn_params():
        w1, b1 = dense(D_MODEL, D_INNER)
        w2, b2 = dense(D_INNER, D_MODEL)
        return dict(ln_g=jnp.ones(D_MODEL), ln_b=jnp.zeros(D_MODEL),
                    w1=w1, b1=b1, w2=w2, b2=b2)

    layers = [dict(self_attn=mha_params(), cross_attn=mha_params(), ffn=ffn_params())
              for _ in range(N_LAYERS)]
    emb = jax.random.normal(next(keys), (VOCAB, D_MODEL), jnp.float32)
    fc_w, fc_b = dense(D_MODEL, VOCAB)
    return dict(embedding=emb, pos_enc=sinusoidal_pe(MAX_LEN, D_MODEL),
                layers=layers, ln_g=jnp.ones(D_MODEL), ln_b=jnp.zeros(D_MODEL),
                fc_w=fc_w, fc_b=fc_b)


# ----------------------------------- main -----------------------------------

if __name__ == "__main__":
    root = jax.random.PRNGKey(0)
    pkey, k_ids, k_enc = jax.random.split(root, 3)
    params = init_params(pkey)

    N, L_DEC, L_ENC = 2, 8, 12
    dec_ids = jax.random.randint(k_ids, (N, L_DEC), 0, VOCAB, dtype=jnp.int32)
    dec_lens = jnp.array([L_DEC, 5], dtype=jnp.int32)
    enc_seq = jax.random.normal(k_enc, (N, L_ENC, D_MODEL), jnp.float32)
    enc_lens = jnp.array([L_ENC, 7], dtype=jnp.int32)

    fwd = jax.jit(decoder_forward)
    logits = fwd(params, dec_ids, dec_lens, enc_seq, enc_lens)
    jax.block_until_ready(logits)

    assert logits.shape == (N, L_DEC, VOCAB), logits.shape
    assert bool(jnp.all(jnp.isfinite(logits)))
    print("KERNEL_OK")
</pallas_src>

<mosaic_0001>
module attributes {stable_mosaic.version = 11 : i64} {
  func.func @_decoder_kernel(%arg0: i32, %arg1: memref<1x8x32xf32, #tpu.memory_space<vmem>>, %arg2: memref<1x12x32xf32, #tpu.memory_space<vmem>>, %arg3: memref<1x8x8xf32, #tpu.memory_space<vmem>>, %arg4: memref<1x8x12xf32, #tpu.memory_space<vmem>>, %arg5: memref<2x1x32xf32, #tpu.memory_space<vmem>>, %arg6: memref<2x1x32xf32, #tpu.memory_space<vmem>>, %arg7: memref<2x32x96xf32, #tpu.memory_space<vmem>>, %arg8: memref<2x1x96xf32, #tpu.memory_space<vmem>>, %arg9: memref<2x32x32xf32, #tpu.memory_space<vmem>>, %arg10: memref<2x1x32xf32, #tpu.memory_space<vmem>>, %arg11: memref<2x1x32xf32, #tpu.memory_space<vmem>>, %arg12: memref<2x1x32xf32, #tpu.memory_space<vmem>>, %arg13: memref<2x32x32xf32, #tpu.memory_space<vmem>>, %arg14: memref<2x1x32xf32, #tpu.memory_space<vmem>>, %arg15: memref<2x32x64xf32, #tpu.memory_space<vmem>>, %arg16: memref<2x1x64xf32, #tpu.memory_space<vmem>>, %arg17: memref<2x32x32xf32, #tpu.memory_space<vmem>>, %arg18: memref<2x1x32xf32, #tpu.memory_space<vmem>>, %arg19: memref<2x1x32xf32, #tpu.memory_space<vmem>>, %arg20: memref<2x1x32xf32, #tpu.memory_space<vmem>>, %arg21: memref<2x32x64xf32, #tpu.memory_space<vmem>>, %arg22: memref<2x1x64xf32, #tpu.memory_space<vmem>>, %arg23: memref<2x64x32xf32, #tpu.memory_space<vmem>>, %arg24: memref<2x1x32xf32, #tpu.memory_space<vmem>>, %arg25: memref<1x32xf32, #tpu.memory_space<vmem>>, %arg26: memref<1x32xf32, #tpu.memory_space<vmem>>, %arg27: memref<32x128xf32, #tpu.memory_space<vmem>>, %arg28: memref<1x128xf32, #tpu.memory_space<vmem>>, %arg29: memref<1x8x128xf32, #tpu.memory_space<vmem>>) attributes {dimension_semantics = [#tpu.dimension_semantics<parallel>], iteration_bounds = array<i64: 2>, scalar_prefetch = 0 : i64, scratch_operands = 0 : i64, tpu.core_type = #tpu.core_type<tc>, window_params = [{transform_indices = @transform_0, window_bounds = array<i64: 1, 8, 32>}, {transform_indices = @transform_1, window_bounds = array<i64: 1, 12, 32>}, {transform_indices = @transform_2, window_bounds = array<i64: 1, 8, 8>}, {transform_indices = @transform_3, window_bounds = array<i64: 1, 8, 12>}, {pipeline_mode = #tpu.pipeline_mode<synchronous>, transform_indices = @transform_4, window_bounds = array<i64: 2, 1, 32>}, {pipeline_mode = #tpu.pipeline_mode<synchronous>, transform_indices = @transform_5, window_bounds = array<i64: 2, 1, 32>}, {pipeline_mode = #tpu.pipeline_mode<synchronous>, transform_indices = @transform_6, window_bounds = array<i64: 2, 32, 96>}, {pipeline_mode = #tpu.pipeline_mode<synchronous>, transform_indices = @transform_7, window_bounds = array<i64: 2, 1, 96>}, {pipeline_mode = #tpu.pipeline_mode<synchronous>, transform_indices = @transform_8, window_bounds = array<i64: 2, 32, 32>}, {pipeline_mode = #tpu.pipeline_mode<synchronous>, transform_indices = @transform_9, window_bounds = array<i64: 2, 1, 32>}, {pipeline_mode = #tpu.pipeline_mode<synchronous>, transform_indices = @transform_10, window_bounds = array<i64: 2, 1, 32>}, {pipeline_mode = #tpu.pipeline_mode<synchronous>, transform_indices = @transform_11, window_bounds = array<i64: 2, 1, 32>}, {pipeline_mode = #tpu.pipeline_mode<synchronous>, transform_indices = @transform_12, window_bounds = array<i64: 2, 32, 32>}, {pipeline_mode = #tpu.pipeline_mode<synchronous>, transform_indices = @transform_13, window_bounds = array<i64: 2, 1, 32>}, {pipeline_mode = #tpu.pipeline_mode<synchronous>, transform_indices = @transform_14, window_bounds = array<i64: 2, 32, 64>}, {pipeline_mode = #tpu.pipeline_mode<synchronous>, transform_indices = @transform_15, window_bounds = array<i64: 2, 1, 64>}, {pipeline_mode = #tpu.pipeline_mode<synchronous>, transform_indices = @transform_16, window_bounds = array<i64: 2, 32, 32>}, {pipeline_mode = #tpu.pipeline_mode<synchronous>, transform_indices = @transform_17, window_bounds = array<i64: 2, 1, 32>}, {pipeline_mode = #tpu.pipeline_mode<synchronous>, transform_indices = @transform_18, window_bounds = array<i64: 2, 1, 32>}, {pipeline_mode = #tpu.pipeline_mode<synchronous>, transform_indices = @transform_19, window_bounds = array<i64: 2, 1, 32>}, {pipeline_mode = #tpu.pipeline_mode<synchronous>, transform_indices = @transform_20, window_bounds = array<i64: 2, 32, 64>}, {pipeline_mode = #tpu.pipeline_mode<synchronous>, transform_indices = @transform_21, window_bounds = array<i64: 2, 1, 64>}, {pipeline_mode = #tpu.pipeline_mode<synchronous>, transform_indices = @transform_22, window_bounds = array<i64: 2, 64, 32>}, {pipeline_mode = #tpu.pipeline_mode<synchronous>, transform_indices = @transform_23, window_bounds = array<i64: 2, 1, 32>}, {pipeline_mode = #tpu.pipeline_mode<synchronous>, transform_indices = @transform_24, window_bounds = array<i64: 1, 32>}, {pipeline_mode = #tpu.pipeline_mode<synchronous>, transform_indices = @transform_25, window_bounds = array<i64: 1, 32>}, {pipeline_mode = #tpu.pipeline_mode<synchronous>, transform_indices = @transform_26, window_bounds = array<i64: 32, 128>}, {pipeline_mode = #tpu.pipeline_mode<synchronous>, transform_indices = @transform_27, window_bounds = array<i64: 1, 128>}, {transform_indices = @transform_28, window_bounds = array<i64: 1, 8, 128>}]} {
    %c0 = arith.constant 0 : index
    %c0_0 = arith.constant 0 : index
    %c0_1 = arith.constant 0 : index
    %0 = vector.load %arg1[%c0, %c0_0, %c0_1] : memref<1x8x32xf32, #tpu.memory_space<vmem>>, vector<1x8x32xf32>
    %1 = vector.shape_cast %0 : vector<1x8x32xf32> to vector<8x32xf32>
    %c0_2 = arith.constant 0 : index
    %c0_3 = arith.constant 0 : index
    %c0_4 = arith.constant 0 : index
    %2 = vector.load %arg2[%c0_2, %c0_3, %c0_4] : memref<1x12x32xf32, #tpu.memory_space<vmem>>, vector<1x12x32xf32>
    %3 = vector.shape_cast %2 : vector<1x12x32xf32> to vector<12x32xf32>
    %c0_5 = arith.constant 0 : index
    %c0_6 = arith.constant 0 : index
    %c0_7 = arith.constant 0 : index
    %4 = vector.load %arg3[%c0_5, %c0_6, %c0_7] : memref<1x8x8xf32, #tpu.memory_space<vmem>>, vector<1x8x8xf32>
    %5 = vector.shape_cast %4 : vector<1x8x8xf32> to vector<8x8xf32>
    %c0_8 = arith.constant 0 : index
    %c0_9 = arith.constant 0 : index
    %c0_10 = arith.constant 0 : index
    %6 = vector.load %arg4[%c0_8, %c0_9, %c0_10] : memref<1x8x12xf32, #tpu.memory_space<vmem>>, vector<1x8x12xf32>
    %7 = vector.shape_cast %6 : vector<1x8x12xf32> to vector<8x12xf32>
    %c0_11 = arith.constant 0 : index
    %c0_12 = arith.constant 0 : index
    %c0_13 = arith.constant 0 : index
    %8 = vector.load %arg5[%c0_11, %c0_12, %c0_13] : memref<2x1x32xf32, #tpu.memory_space<vmem>>, vector<1x1x32xf32>
    %9 = vector.shape_cast %8 : vector<1x1x32xf32> to vector<1x32xf32>
    %c0_14 = arith.constant 0 : index
    %c0_15 = arith.constant 0 : index
    %c0_16 = arith.constant 0 : index
    %10 = vector.load %arg6[%c0_14, %c0_15, %c0_16] : memref<2x1x32xf32, #tpu.memory_space<vmem>>, vector<1x1x32xf32>
    %11 = vector.shape_cast %10 : vector<1x1x32xf32> to vector<1x32xf32>
    %cst = arith.constant dense<0.000000e+00> : vector<8xf32>
    %12 = vector.multi_reduction <add>, %1, %cst [1] : vector<8x32xf32> to vector<8xf32>
    %13 = vector.shape_cast %12 : vector<8xf32> to vector<8x1xf32>
    %cst_17 = arith.constant 3.200000e+01 : f32
    %14 = vector.broadcast %cst_17 : f32 to vector<8x1xf32>
    %15 = arith.divf %13, %14 : vector<8x1xf32>
    %16 = vector.broadcast %15 : vector<8x1xf32> to vector<8x32xf32>
    %17 = arith.subf %1, %16 : vector<8x32xf32>
    %18 = arith.mulf %17, %17 : vector<8x32xf32>
    %cst_18 = arith.constant dense<0.000000e+00> : vector<8xf32>
    %19 = vector.multi_reduction <add>, %18, %cst_18 [1] : vector<8x32xf32> to vector<8xf32>
    %20 = vector.shape_cast %19 : vector<8xf32> to vector<8x1xf32>
    %cst_19 = arith.constant 3.200000e+01 : f32
    %21 = vector.broadcast %cst_19 : f32 to vector<8x1xf32>
    %22 = arith.divf %20, %21 : vector<8x1xf32>
    %23 = vector.broadcast %15 : vector<8x1xf32> to vector<8x32xf32>
    %24 = arith.subf %1, %23 : vector<8x32xf32>
    %cst_20 = arith.constant 9.99999974E-6 : f32
    %25 = vector.broadcast %cst_20 : f32 to vector<8x1xf32>
    %26 = arith.addf %22, %25 : vector<8x1xf32>
    %27 = math.rsqrt %26 : vector<8x1xf32>
    %28 = vector.broadcast %27 : vector<8x1xf32> to vector<8x32xf32>
    %29 = arith.mulf %24, %28 : vector<8x32xf32>
    %30 = vector.broadcast %9 : vector<1x32xf32> to vector<8x32xf32>
    %31 = arith.mulf %29, %30 : vector<8x32xf32>
    %32 = vector.broadcast %11 : vector<1x32xf32> to vector<8x32xf32>
    %33 = arith.addf %31, %32 : vector<8x32xf32>
    %c0_21 = arith.constant 0 : index
    %c0_22 = arith.constant 0 : index
    %c0_23 = arith.constant 0 : index
    %34 = vector.load %arg7[%c0_21, %c0_22, %c0_23] : memref<2x32x96xf32, #tpu.memory_space<vmem>>, vector<1x32x96xf32>
    %35 = vector.shape_cast %34 : vector<1x32x96xf32> to vector<32x96xf32>
    %cst_24 = arith.constant dense<0.000000e+00> : vector<8x96xf32>
    %36 = tpu.matmul %33, %35, %cst_24 {dimension_numbers = #tpu.dot_dimension_numbers<[1], [0], [0], [1], [0, 0, 1, 1], [], []>} : vector<8x32xf32>, vector<32x96xf32>, vector<8x96xf32> -> vector<8x96xf32>
    %c0_25 = arith.constant 0 : index
    %c0_26 = arith.constant 0 : index
    %c0_27 = arith.constant 0 : index
    %37 = vector.load %arg8[%c0_25, %c0_26, %c0_27] : memref<2x1x96xf32, #tpu.memory_space<vmem>>, vector<1x1x96xf32>
    %38 = vector.shape_cast %37 : vector<1x1x96xf32> to vector<1x96xf32>
    %39 = vector.broadcast %38 : vector<1x96xf32> to vector<8x96xf32>
    %40 = arith.addf %36, %39 : vector<8x96xf32>
    %41 = vector.extract_strided_slice %40 {offsets = [0, 0], sizes = [8, 32], strides = [1, 1]} : vector<8x96xf32> to vector<8x32xf32>
    %42 = vector.extract_strided_slice %40 {offsets = [0, 32], sizes = [8, 64], strides = [1, 1]} : vector<8x96xf32> to vector<8x64xf32>
    %c0_28 = arith.constant 0 : index
    %c0_29 = arith.constant 0 : index
    %c0_30 = arith.constant 0 : index
    %43 = vector.load %arg9[%c0_28, %c0_29, %c0_30] : memref<2x32x32xf32, #tpu.memory_space<vmem>>, vector<1x32x32xf32>
    %44 = vector.shape_cast %43 : vector<1x32x32xf32> to vector<32x32xf32>
    %c0_31 = arith.constant 0 : index
    %c0_32 = arith.constant 0 : index
    %c0_33 = arith.constant 0 : index
    %45 = vector.load %arg10[%c0_31, %c0_32, %c0_33] : memref<2x1x32xf32, #tpu.memory_space<vmem>>, vector<1x1x32xf32>
    %46 = vector.shape_cast %45 : vector<1x1x32xf32> to vector<1x32xf32>
    %47 = vector.extract_strided_slice %41 {offsets = [0, 0], sizes = [8, 8], strides = [1, 1]} : vector<8x32xf32> to vector<8x8xf32>
    %48 = vector.extract_strided_slice %42 {offsets = [0, 0], sizes = [8, 8], strides = [1, 1]} : vector<8x64xf32> to vector<8x8xf32>
    %49 = vector.extract_strided_slice %42 {offsets = [0, 32], sizes = [8, 8], strides = [1, 1]} : vector<8x64xf32> to vector<8x8xf32>
    %cst_34 = arith.constant dense<0.000000e+00> : vector<8x8xf32>
    %50 = tpu.matmul %47, %48, %cst_34 {dimension_numbers = #tpu.dot_dimension_numbers<[1], [1], [0], [0], [0, 0, 1, 0], [], []>} : vector<8x8xf32>, vector<8x8xf32>, vector<8x8xf32> -> vector<8x8xf32>
    %cst_35 = arith.constant 0.353553385 : f32
    %51 = vector.broadcast %cst_35 : f32 to vector<8x8xf32>
    %52 = arith.mulf %50, %51 : vector<8x8xf32>
    %53 = arith.addf %52, %5 : vector<8x8xf32>
    %cst_36 = arith.constant dense<0xFF800000> : vector<8xf32>
    %54 = vector.multi_reduction <maximumf>, %53, %cst_36 [1] : vector<8x8xf32> to vector<8xf32>
    %55 = vector.shape_cast %54 : vector<8xf32> to vector<8x1xf32>
    %56 = vector.broadcast %55 : vector<8x1xf32> to vector<8x8xf32>
    %57 = arith.subf %53, %56 : vector<8x8xf32>
    %58 = math.exp %57 : vector<8x8xf32>
    %cst_37 = arith.constant dense<0.000000e+00> : vector<8xf32>
    %59 = vector.multi_reduction <add>, %58, %cst_37 [1] : vector<8x8xf32> to vector<8xf32>
    %60 = vector.shape_cast %59 : vector<8xf32> to vector<8x1xf32>
    %61 = tpu.reciprocal %60 {approx = true} : vector<8x1xf32> -> vector<8x1xf32>
    %62 = vector.broadcast %61 : vector<8x1xf32> to vector<8x8xf32>
    %63 = arith.mulf %58, %62 : vector<8x8xf32>
    %cst_38 = arith.constant dense<0.000000e+00> : vector<8x8xf32>
    %64 = tpu.matmul %63, %49, %cst_38 {dimension_numbers = #tpu.dot_dimension_numbers<[1], [0], [0], [1], [0, 0, 1, 1], [], []>} : vector<8x8xf32>, vector<8x8xf32>, vector<8x8xf32> -> vector<8x8xf32>
    %65 = vector.extract_strided_slice %41 {offsets = [0, 8], sizes = [8, 8], strides = [1, 1]} : vector<8x32xf32> to vector<8x8xf32>
    %66 = vector.extract_strided_slice %42 {offsets = [0, 8], sizes = [8, 8], strides = [1, 1]} : vector<8x64xf32> to vector<8x8xf32>
    %67 = vector.extract_strided_slice %42 {offsets = [0, 40], sizes = [8, 8], strides = [1, 1]} : vector<8x64xf32> to vector<8x8xf32>
    %cst_39 = arith.constant dense<0.000000e+00> : vector<8x8xf32>
    %68 = tpu.matmul %65, %66, %cst_39 {dimension_numbers = #tpu.dot_dimension_numbers<[1], [1], [0], [0], [0, 0, 1, 0], [], []>} : vector<8x8xf32>, vector<8x8xf32>, vector<8x8xf32> -> vector<8x8xf32>
    %cst_40 = arith.constant 0.353553385 : f32
    %69 = vector.broadcast %cst_40 : f32 to vector<8x8xf32>
    %70 = arith.mulf %68, %69 : vector<8x8xf32>
    %71 = arith.addf %70, %5 : vector<8x8xf32>
    %cst_41 = arith.constant dense<0xFF800000> : vector<8xf32>
    %72 = vector.multi_reduction <maximumf>, %71, %cst_41 [1] : vector<8x8xf32> to vector<8xf32>
    %73 = vector.shape_cast %72 : vector<8xf32> to vector<8x1xf32>
    %74 = vector.broadcast %73 : vector<8x1xf32> to vector<8x8xf32>
    %75 = arith.subf %71, %74 : vector<8x8xf32>
    %76 = math.exp %75 : vector<8x8xf32>
    %cst_42 = arith.constant dense<0.000000e+00> : vector<8xf32>
    %77 = vector.multi_reduction <add>, %76, %cst_42 [1] : vector<8x8xf32> to vector<8xf32>
    %78 = vector.shape_cast %77 : vector<8xf32> to vector<8x1xf32>
    %79 = tpu.reciprocal %78 {approx = true} : vector<8x1xf32> -> vector<8x1xf32>
    %80 = vector.broadcast %79 : vector<8x1xf32> to vector<8x8xf32>
    %81 = arith.mulf %76, %80 : vector<8x8xf32>
    %cst_43 = arith.constant dense<0.000000e+00> : vector<8x8xf32>
    %82 = tpu.matmul %81, %67, %cst_43 {dimension_numbers = #tpu.dot_dimension_numbers<[1], [0], [0], [1], [0, 0, 1, 1], [], []>} : vector<8x8xf32>, vector<8x8xf32>, vector<8x8xf32> -> vector<8x8xf32>
    %83 = vector.extract_strided_slice %41 {offsets = [0, 16], sizes = [8, 8], strides = [1, 1]} : vector<8x32xf32> to vector<8x8xf32>
    %84 = vector.extract_strided_slice %42 {offsets = [0, 16], sizes = [8, 8], strides = [1, 1]} : vector<8x64xf32> to vector<8x8xf32>
    %85 = vector.extract_strided_slice %42 {offsets = [0, 48], sizes = [8, 8], strides = [1, 1]} : vector<8x64xf32> to vector<8x8xf32>
    %cst_44 = arith.constant dense<0.000000e+00> : vector<8x8xf32>
    %86 = tpu.matmul %83, %84, %cst_44 {dimension_numbers = #tpu.dot_dimension_numbers<[1], [1], [0], [0], [0, 0, 1, 0], [], []>} : vector<8x8xf32>, vector<8x8xf32>, vector<8x8xf32> -> vector<8x8xf32>
    %cst_45 = arith.constant 0.353553385 : f32
    %87 = vector.broadcast %cst_45 : f32 to vector<8x8xf32>
    %88 = arith.mulf %86, %87 : vector<8x8xf32>
    %89 = arith.addf %88, %5 : vector<8x8xf32>
    %cst_46 = arith.constant dense<0xFF800000> : vector<8xf32>
    %90 = vector.multi_reduction <maximumf>, %89, %cst_46 [1] : vector<8x8xf32> to vector<8xf32>
    %91 = vector.shape_cast %90 : vector<8xf32> to vector<8x1xf32>
    %92 = vector.broadcast %91 : vector<8x1xf32> to vector<8x8xf32>
    %93 = arith.subf %89, %92 : vector<8x8xf32>
    %94 = math.exp %93 : vector<8x8xf32>
    %cst_47 = arith.constant dense<0.000000e+00> : vector<8xf32>
    %95 = vector.multi_reduction <add>, %94, %cst_47 [1] : vector<8x8xf32> to vector<8xf32>
    %96 = vector.shape_cast %95 : vector<8xf32> to vector<8x1xf32>
    %97 = tpu.reciprocal %96 {approx = true} : vector<8x1xf32> -> vector<8x1xf32>
    %98 = vector.broadcast %97 : vector<8x1xf32> to vector<8x8xf32>
    %99 = arith.mulf %94, %98 : vector<8x8xf32>
    %cst_48 = arith.constant dense<0.000000e+00> : vector<8x8xf32>
    %100 = tpu.matmul %99, %85, %cst_48 {dimension_numbers = #tpu.dot_dimension_numbers<[1], [0], [0], [1], [0, 0, 1, 1], [], []>} : vector<8x8xf32>, vector<8x8xf32>, vector<8x8xf32> -> vector<8x8xf32>
    %101 = vector.extract_strided_slice %41 {offsets = [0, 24], sizes = [8, 8], strides = [1, 1]} : vector<8x32xf32> to vector<8x8xf32>
    %102 = vector.extract_strided_slice %42 {offsets = [0, 24], sizes = [8, 8], strides = [1, 1]} : vector<8x64xf32> to vector<8x8xf32>
    %103 = vector.extract_strided_slice %42 {offsets = [0, 56], sizes = [8, 8], strides = [1, 1]} : vector<8x64xf32> to vector<8x8xf32>
    %cst_49 = arith.constant dense<0.000000e+00> : vector<8x8xf32>
    %104 = tpu.matmul %101, %102, %cst_49 {dimension_numbers = #tpu.dot_dimension_numbers<[1], [1], [0], [0], [0, 0, 1, 0], [], []>} : vector<8x8xf32>, vector<8x8xf32>, vector<8x8xf32> -> vector<8x8xf32>
    %cst_50 = arith.constant 0.353553385 : f32
    %105 = vector.broadcast %cst_50 : f32 to vector<8x8xf32>
    %106 = arith.mulf %104, %105 : vector<8x8xf32>
    %107 = arith.addf %106, %5 : vector<8x8xf32>
    %cst_51 = arith.constant dense<0xFF800000> : vector<8xf32>
    %108 = vector.multi_reduction <maximumf>, %107, %cst_51 [1] : vector<8x8xf32> to vector<8xf32>
    %109 = vector.shape_cast %108 : vector<8xf32> to vector<8x1xf32>
    %110 = vector.broadcast %109 : vector<8x1xf32> to vector<8x8xf32>
    %111 = arith.subf %107, %110 : vector<8x8xf32>
    %112 = math.exp %111 : vector<8x8xf32>
    %cst_52 = arith.constant dense<0.000000e+00> : vector<8xf32>
    %113 = vector.multi_reduction <add>, %112, %cst_52 [1] : vector<8x8xf32> to vector<8xf32>
    %114 = vector.shape_cast %113 : vector<8xf32> to vector<8x1xf32>
    %115 = tpu.reciprocal %114 {approx = true} : vector<8x1xf32> -> vector<8x1xf32>
    %116 = vector.broadcast %115 : vector<8x1xf32> to vector<8x8xf32>
    %117 = arith.mulf %112, %116 : vector<8x8xf32>
    %cst_53 = arith.constant dense<0.000000e+00> : vector<8x8xf32>
    %118 = tpu.matmul %117, %103, %cst_53 {dimension_numbers = #tpu.dot_dimension_numbers<[1], [0], [0], [1], [0, 0, 1, 1], [], []>} : vector<8x8xf32>, vector<8x8xf32>, vector<8x8xf32> -> vector<8x8xf32>
    %119 = tpu.concatenate %64, %82, %100, %118 in 1 : vector<8x8xf32>, vector<8x8xf32>, vector<8x8xf32>, vector<8x8xf32> -> vector<8x32xf32>
    %cst_54 = arith.constant dense<0.000000e+00> : vector<8x32xf32>
    %120 = tpu.matmul %119, %44, %cst_54 {dimension_numbers = #tpu.dot_dimension_numbers<[1], [0], [0], [1], [0, 0, 1, 1], [], []>} : vector<8x32xf32>, vector<32x32xf32>, vector<8x32xf32> -> vector<8x32xf32>
    %121 = vector.broadcast %46 : vector<1x32xf32> to vector<8x32xf32>
    %122 = arith.addf %120, %121 : vector<8x32xf32>
    %123 = arith.addf %1, %122 : vector<8x32xf32>
    %c0_55 = arith.constant 0 : index
    %c0_56 = arith.constant 0 : index
    %c0_57 = arith.constant 0 : index
    %124 = vector.load %arg11[%c0_55, %c0_56, %c0_57] : memref<2x1x32xf32, #tpu.memory_space<vmem>>, vector<1x1x32xf32>
    %125 = vector.shape_cast %124 : vector<1x1x32xf32> to vector<1x32xf32>
    %c0_58 = arith.constant 0 : index
    %c0_59 = arith.constant 0 : index
    %c0_60 = arith.constant 0 : index
    %126 = vector.load %arg12[%c0_58, %c0_59, %c0_60] : memref<2x1x32xf32, #tpu.memory_space<vmem>>, vector<1x1x32xf32>
    %127 = vector.shape_cast %126 : vector<1x1x32xf32> to vector<1x32xf32>
    %cst_61 = arith.constant dense<0.000000e+00> : vector<8xf32>
    %128 = vector.multi_reduction <add>, %123, %cst_61 [1] : vector<8x32xf32> to vector<8xf32>
    %129 = vector.shape_cast %128 : vector<8xf32> to vector<8x1xf32>
    %cst_62 = arith.constant 3.200000e+01 : f32
    %130 = vector.broadcast %cst_62 : f32 to vector<8x1xf32>
    %131 = arith.divf %129, %130 : vector<8x1xf32>
    %132 = vector.broadcast %131 : vector<8x1xf32> to vector<8x32xf32>
    %133 = arith.subf %123, %132 : vector<8x32xf32>
    %134 = arith.mulf %133, %133 : vector<8x32xf32>
    %cst_63 = arith.constant dense<0.000000e+00> : vector<8xf32>
    %135 = vector.multi_reduction <add>, %134, %cst_63 [1] : vector<8x32xf32> to vector<8xf32>
    %136 = vector.shape_cast %135 : vector<8xf32> to vector<8x1xf32>
    %cst_64 = arith.constant 3.200000e+01 : f32
    %137 = vector.broadcast %cst_64 : f32 to vector<8x1xf32>
    %138 = arith.divf %136, %137 : vector<8x1xf32>
    %139 = vector.broadcast %131 : vector<8x1xf32> to vector<8x32xf32>
    %140 = arith.subf %123, %139 : vector<8x32xf32>
    %cst_65 = arith.constant 9.99999974E-6 : f32
    %141 = vector.broadcast %cst_65 : f32 to vector<8x1xf32>
    %142 = arith.addf %138, %141 : vector<8x1xf32>
    %143 = math.rsqrt %142 : vector<8x1xf32>
    %144 = vector.broadcast %143 : vector<8x1xf32> to vector<8x32xf32>
    %145 = arith.mulf %140, %144 : vector<8x32xf32>
    %146 = vector.broadcast %125 : vector<1x32xf32> to vector<8x32xf32>
    %147 = arith.mulf %145, %146 : vector<8x32xf32>
    %148 = vector.broadcast %127 : vector<1x32xf32> to vector<8x32xf32>
    %149 = arith.addf %147, %148 : vector<8x32xf32>
    %c0_66 = arith.constant 0 : index
    %c0_67 = arith.constant 0 : index
    %c0_68 = arith.constant 0 : index
    %150 = vector.load %arg13[%c0_66, %c0_67, %c0_68] : memref<2x32x32xf32, #tpu.memory_space<vmem>>, vector<1x32x32xf32>
    %151 = vector.shape_cast %150 : vector<1x32x32xf32> to vector<32x32xf32>
    %cst_69 = arith.constant dense<0.000000e+00> : vector<8x32xf32>
    %152 = tpu.matmul %149, %151, %cst_69 {dimension_numbers = #tpu.dot_dimension_numbers<[1], [0], [0], [1], [0, 0, 1, 1], [], []>} : vector<8x32xf32>, vector<32x32xf32>, vector<8x32xf32> -> vector<8x32xf32>
    %c0_70 = arith.constant 0 : index
    %c0_71 = arith.constant 0 : index
    %c0_72 = arith.constant 0 : index
    %153 = vector.load %arg14[%c0_70, %c0_71, %c0_72] : memref<2x1x32xf32, #tpu.memory_space<vmem>>, vector<1x1x32xf32>
    %154 = vector.shape_cast %153 : vector<1x1x32xf32> to vector<1x32xf32>
    %155 = vector.broadcast %154 : vector<1x32xf32> to vector<8x32xf32>
    %156 = arith.addf %152, %155 : vector<8x32xf32>
    %c0_73 = arith.constant 0 : index
    %c0_74 = arith.constant 0 : index
    %c0_75 = arith.constant 0 : index
    %157 = vector.load %arg15[%c0_73, %c0_74, %c0_75] : memref<2x32x64xf32, #tpu.memory_space<vmem>>, vector<1x32x64xf32>
    %158 = vector.shape_cast %157 : vector<1x32x64xf32> to vector<32x64xf32>
    %cst_76 = arith.constant dense<0.000000e+00> : vector<12x64xf32>
    %159 = tpu.matmul %3, %158, %cst_76 {dimension_numbers = #tpu.dot_dimension_numbers<[1], [0], [0], [1], [0, 0, 1, 1], [], []>} : vector<12x32xf32>, vector<32x64xf32>, vector<12x64xf32> -> vector<12x64xf32>
    %c0_77 = arith.constant 0 : index
    %c0_78 = arith.constant 0 : index
    %c0_79 = arith.constant 0 : index
    %160 = vector.load %arg16[%c0_77, %c0_78, %c0_79] : memref<2x1x64xf32, #tpu.memory_space<vmem>>, vector<1x1x64xf32>
    %161 = vector.shape_cast %160 : vector<1x1x64xf32> to vector<1x64xf32>
    %162 = vector.broadcast %161 : vector<1x64xf32> to vector<12x64xf32>
    %163 = arith.addf %159, %162 : vector<12x64xf32>
    %c0_80 = arith.constant 0 : index
    %c0_81 = arith.constant 0 : index
    %c0_82 = arith.constant 0 : index
    %164 = vector.load %arg17[%c0_80, %c0_81, %c0_82] : memref<2x32x32xf32, #tpu.memory_space<vmem>>, vector<1x32x32xf32>
    %165 = vector.shape_cast %164 : vector<1x32x32xf32> to vector<32x32xf32>
    %c0_83 = arith.constant 0 : index
    %c0_84 = arith.constant 0 : index
    %c0_85 = arith.constant 0 : index
    %166 = vector.load %arg18[%c0_83, %c0_84, %c0_85] : memref<2x1x32xf32, #tpu.memory_space<vmem>>, vector<1x1x32xf32>
    %167 = vector.shape_cast %166 : vector<1x1x32xf32> to vector<1x32xf32>
    %168 = vector.extract_strided_slice %156 {offsets = [0, 0], sizes = [8, 8], strides = [1, 1]} : vector<8x32xf32> to vector<8x8xf32>
    %169 = vector.extract_strided_slice %163 {offsets = [0, 0], sizes = [12, 8], strides = [1, 1]} : vector<12x64xf32> to vector<12x8xf32>
    %170 = vector.extract_strided_slice %163 {offsets = [0, 32], sizes = [12, 8], strides = [1, 1]} : vector<12x64xf32> to vector<12x8xf32>
    %cst_86 = arith.constant dense<0.000000e+00> : vector<8x12xf32>
    %171 = tpu.matmul %168, %169, %cst_86 {dimension_numbers = #tpu.dot_dimension_numbers<[1], [1], [0], [0], [0, 0, 1, 0], [], []>} : vector<8x8xf32>, vector<12x8xf32>, vector<8x12xf32> -> vector<8x12xf32>
    %cst_87 = arith.constant 0.353553385 : f32
    %172 = vector.broadcast %cst_87 : f32 to vector<8x12xf32>
    %173 = arith.mulf %171, %172 : vector<8x12xf32>
    %174 = arith.addf %173, %7 : vector<8x12xf32>
    %cst_88 = arith.constant dense<0xFF800000> : vector<8xf32>
    %175 = vector.multi_reduction <maximumf>, %174, %cst_88 [1] : vector<8x12xf32> to vector<8xf32>
    %176 = vector.shape_cast %175 : vector<8xf32> to vector<8x1xf32>
    %177 = vector.broadcast %176 : vector<8x1xf32> to vector<8x12xf32>
    %178 = arith.subf %174, %177 : vector<8x12xf32>
    %179 = math.exp %178 : vector<8x12xf32>
    %cst_89 = arith.constant dense<0.000000e+00> : vector<8xf32>
    %180 = vector.multi_reduction <add>, %179, %cst_89 [1] : vector<8x12xf32> to vector<8xf32>
    %181 = vector.shape_cast %180 : vector<8xf32> to vector<8x1xf32>
    %182 = tpu.reciprocal %181 {approx = true} : vector<8x1xf32> -> vector<8x1xf32>
    %183 = vector.broadcast %182 : vector<8x1xf32> to vector<8x12xf32>
    %184 = arith.mulf %179, %183 : vector<8x12xf32>
    %cst_90 = arith.constant dense<0.000000e+00> : vector<8x8xf32>
    %185 = tpu.matmul %184, %170, %cst_90 {dimension_numbers = #tpu.dot_dimension_numbers<[1], [0], [0], [1], [0, 0, 1, 1], [], []>} : vector<8x12xf32>, vector<12x8xf32>, vector<8x8xf32> -> vector<8x8xf32>
    %186 = vector.extract_strided_slice %156 {offsets = [0, 8], sizes = [8, 8], strides = [1, 1]} : vector<8x32xf32> to vector<8x8xf32>
    %187 = vector.extract_strided_slice %163 {offsets = [0, 8], sizes = [12, 8], strides = [1, 1]} : vector<12x64xf32> to vector<12x8xf32>
    %188 = vector.extract_strided_slice %163 {offsets = [0, 40], sizes = [12, 8], strides = [1, 1]} : vector<12x64xf32> to vector<12x8xf32>
    %cst_91 = arith.constant dense<0.000000e+00> : vector<8x12xf32>
    %189 = tpu.matmul %186, %187, %cst_91 {dimension_numbers = #tpu.dot_dimension_numbers<[1], [1], [0], [0], [0, 0, 1, 0], [], []>} : vector<8x8xf32>, vector<12x8xf32>, vector<8x12xf32> -> vector<8x12xf32>
    %cst_92 = arith.constant 0.353553385 : f32
    %190 = vector.broadcast %cst_92 : f32 to vector<8x12xf32>
    %191 = arith.mulf %189, %190 : vector<8x12xf32>
    %192 = arith.addf %191, %7 : vector<8x12xf32>
    %cst_93 = arith.constant dense<0xFF800000> : vector<8xf32>
    %193 = vector.multi_reduction <maximumf>, %192, %cst_93 [1] : vector<8x12xf32> to vector<8xf32>
    %194 = vector.shape_cast %193 : vector<8xf32> to vector<8x1xf32>
    %195 = vector.broadcast %194 : vector<8x1xf32> to vector<8x12xf32>
    %196 = arith.subf %192, %195 : vector<8x12xf32>
    %197 = math.exp %196 : vector<8x12xf32>
    %cst_94 = arith.constant dense<0.000000e+00> : vector<8xf32>
    %198 = vector.multi_reduction <add>, %197, %cst_94 [1] : vector<8x12xf32> to vector<8xf32>
    %199 = vector.shape_cast %198 : vector<8xf32> to vector<8x1xf32>
    %200 = tpu.reciprocal %199 {approx = true} : vector<8x1xf32> -> vector<8x1xf32>
    %201 = vector.broadcast %200 : vector<8x1xf32> to vector<8x12xf32>
    %202 = arith.mulf %197, %201 : vector<8x12xf32>
    %cst_95 = arith.constant dense<0.000000e+00> : vector<8x8xf32>
    %203 = tpu.matmul %202, %188, %cst_95 {dimension_numbers = #tpu.dot_dimension_numbers<[1], [0], [0], [1], [0, 0, 1, 1], [], []>} : vector<8x12xf32>, vector<12x8xf32>, vector<8x8xf32> -> vector<8x8xf32>
    %204 = vector.extract_strided_slice %156 {offsets = [0, 16], sizes = [8, 8], strides = [1, 1]} : vector<8x32xf32> to vector<8x8xf32>
    %205 = vector.extract_strided_slice %163 {offsets = [0, 16], sizes = [12, 8], strides = [1, 1]} : vector<12x64xf32> to vector<12x8xf32>
    %206 = vector.extract_strided_slice %163 {offsets = [0, 48], sizes = [12, 8], strides = [1, 1]} : vector<12x64xf32> to vector<12x8xf32>
    %cst_96 = arith.constant dense<0.000000e+00> : vector<8x12xf32>
    %207 = tpu.matmul %204, %205, %cst_96 {dimension_numbers = #tpu.dot_dimension_numbers<[1], [1], [0], [0], [0, 0, 1, 0], [], []>} : vector<8x8xf32>, vector<12x8xf32>, vector<8x12xf32> -> vector<8x12xf32>
    %cst_97 = arith.constant 0.353553385 : f32
    %208 = vector.broadcast %cst_97 : f32 to vector<8x12xf32>
    %209 = arith.mulf %207, %208 : vector<8x12xf32>
    %210 = arith.addf %209, %7 : vector<8x12xf32>
    %cst_98 = arith.constant dense<0xFF800000> : vector<8xf32>
    %211 = vector.multi_reduction <maximumf>, %210, %cst_98 [1] : vector<8x12xf32> to vector<8xf32>
    %212 = vector.shape_cast %211 : vector<8xf32> to vector<8x1xf32>
    %213 = vector.broadcast %212 : vector<8x1xf32> to vector<8x12xf32>
    %214 = arith.subf %210, %213 : vector<8x12xf32>
    %215 = math.exp %214 : vector<8x12xf32>
    %cst_99 = arith.constant dense<0.000000e+00> : vector<8xf32>
    %216 = vector.multi_reduction <add>, %215, %cst_99 [1] : vector<8x12xf32> to vector<8xf32>
    %217 = vector.shape_cast %216 : vector<8xf32> to vector<8x1xf32>
    %218 = tpu.reciprocal %217 {approx = true} : vector<8x1xf32> -> vector<8x1xf32>
    %219 = vector.broadcast %218 : vector<8x1xf32> to vector<8x12xf32>
    %220 = arith.mulf %215, %219 : vector<8x12xf32>
    %cst_100 = arith.constant dense<0.000000e+00> : vector<8x8xf32>
    %221 = tpu.matmul %220, %206, %cst_100 {dimension_numbers = #tpu.dot_dimension_numbers<[1], [0], [0], [1], [0, 0, 1, 1], [], []>} : vector<8x12xf32>, vector<12x8xf32>, vector<8x8xf32> -> vector<8x8xf32>
    %222 = vector.extract_strided_slice %156 {offsets = [0, 24], sizes = [8, 8], strides = [1, 1]} : vector<8x32xf32> to vector<8x8xf32>
    %223 = vector.extract_strided_slice %163 {offsets = [0, 24], sizes = [12, 8], strides = [1, 1]} : vector<12x64xf32> to vector<12x8xf32>
    %224 = vector.extract_strided_slice %163 {offsets = [0, 56], sizes = [12, 8], strides = [1, 1]} : vector<12x64xf32> to vector<12x8xf32>
    %cst_101 = arith.constant dense<0.000000e+00> : vector<8x12xf32>
    %225 = tpu.matmul %222, %223, %cst_101 {dimension_numbers = #tpu.dot_dimension_numbers<[1], [1], [0], [0], [0, 0, 1, 0], [], []>} : vector<8x8xf32>, vector<12x8xf32>, vector<8x12xf32> -> vector<8x12xf32>
    %cst_102 = arith.constant 0.353553385 : f32
    %226 = vector.broadcast %cst_102 : f32 to vector<8x12xf32>
    %227 = arith.mulf %225, %226 : vector<8x12xf32>
    %228 = arith.addf %227, %7 : vector<8x12xf32>
    %cst_103 = arith.constant dense<0xFF800000> : vector<8xf32>
    %229 = vector.multi_reduction <maximumf>, %228, %cst_103 [1] : vector<8x12xf32> to vector<8xf32>
    %230 = vector.shape_cast %229 : vector<8xf32> to vector<8x1xf32>
    %231 = vector.broadcast %230 : vector<8x1xf32> to vector<8x12xf32>
    %232 = arith.subf %228, %231 : vector<8x12xf32>
    %233 = math.exp %232 : vector<8x12xf32>
    %cst_104 = arith.constant dense<0.000000e+00> : vector<8xf32>
    %234 = vector.multi_reduction <add>, %233, %cst_104 [1] : vector<8x12xf32> to vector<8xf32>
    %235 = vector.shape_cast %234 : vector<8xf32> to vector<8x1xf32>
    %236 = tpu.reciprocal %235 {approx = true} : vector<8x1xf32> -> vector<8x1xf32>
    %237 = vector.broadcast %236 : vector<8x1xf32> to vector<8x12xf32>
    %238 = arith.mulf %233, %237 : vector<8x12xf32>
    %cst_105 = arith.constant dense<0.000000e+00> : vector<8x8xf32>
    %239 = tpu.matmul %238, %224, %cst_105 {dimension_numbers = #tpu.dot_dimension_numbers<[1], [0], [0], [1], [0, 0, 1, 1], [], []>} : vector<8x12xf32>, vector<12x8xf32>, vector<8x8xf32> -> vector<8x8xf32>
    %240 = tpu.concatenate %185, %203, %221, %239 in 1 : vector<8x8xf32>, vector<8x8xf32>, vector<8x8xf32>, vector<8x8xf32> -> vector<8x32xf32>
    %cst_106 = arith.constant dense<0.000000e+00> : vector<8x32xf32>
    %241 = tpu.matmul %240, %165, %cst_106 {dimension_numbers = #tpu.dot_dimension_numbers<[1], [0], [0], [1], [0, 0, 1, 1], [], []>} : vector<8x32xf32>, vector<32x32xf32>, vector<8x32xf32> -> vector<8x32xf32>
    %242 = vector.broadcast %167 : vector<1x32xf32> to vector<8x32xf32>
    %243 = arith.addf %241, %242 : vector<8x32xf32>
    %244 = arith.addf %123, %243 : vector<8x32xf32>
    %c0_107 = arith.constant 0 : index
    %c0_108 = arith.constant 0 : index
    %c0_109 = arith.constant 0 : index
    %245 = vector.load %arg19[%c0_107, %c0_108, %c0_109] : memref<2x1x32xf32, #tpu.memory_space<vmem>>, vector<1x1x32xf32>
    %246 = vector.shape_cast %245 : vector<1x1x32xf32> to vector<1x32xf32>
    %c0_110 = arith.constant 0 : index
    %c0_111 = arith.constant 0 : index
    %c0_112 = arith.constant 0 : index
    %247 = vector.load %arg20[%c0_110, %c0_111, %c0_112] : memref<2x1x32xf32, #tpu.memory_space<vmem>>, vector<1x1x32xf32>
    %248 = vector.shape_cast %247 : vector<1x1x32xf32> to vector<1x32xf32>
    %cst_113 = arith.constant dense<0.000000e+00> : vector<8xf32>
    %249 = vector.multi_reduction <add>, %244, %cst_113 [1] : vector<8x32xf32> to vector<8xf32>
    %250 = vector.shape_cast %249 : vector<8xf32> to vector<8x1xf32>
    %cst_114 = arith.constant 3.200000e+01 : f32
    %251 = vector.broadcast %cst_114 : f32 to vector<8x1xf32>
    %252 = arith.divf %250, %251 : vector<8x1xf32>
    %253 = vector.broadcast %252 : vector<8x1xf32> to vector<8x32xf32>
    %254 = arith.subf %244, %253 : vector<8x32xf32>
    %255 = arith.mulf %254, %254 : vector<8x32xf32>
    %cst_115 = arith.constant dense<0.000000e+00> : vector<8xf32>
    %256 = vector.multi_reduction <add>, %255, %cst_115 [1] : vector<8x32xf32> to vector<8xf32>
    %257 = vector.shape_cast %256 : vector<8xf32> to vector<8x1xf32>
    %cst_116 = arith.constant 3.200000e+01 : f32
    %258 = vector.broadcast %cst_116 : f32 to vector<8x1xf32>
    %259 = arith.divf %257, %258 : vector<8x1xf32>
    %260 = vector.broadcast %252 : vector<8x1xf32> to vector<8x32xf32>
    %261 = arith.subf %244, %260 : vector<8x32xf32>
    %cst_117 = arith.constant 9.99999974E-6 : f32
    %262 = vector.broadcast %cst_117 : f32 to vector<8x1xf32>
    %263 = arith.addf %259, %262 : vector<8x1xf32>
    %264 = math.rsqrt %263 : vector<8x1xf32>
    %265 = vector.broadcast %264 : vector<8x1xf32> to vector<8x32xf32>
    %266 = arith.mulf %261, %265 : vector<8x32xf32>
    %267 = vector.broadcast %246 : vector<1x32xf32> to vector<8x32xf32>
    %268 = arith.mulf %266, %267 : vector<8x32xf32>
    %269 = vector.broadcast %248 : vector<1x32xf32> to vector<8x32xf32>
    %270 = arith.addf %268, %269 : vector<8x32xf32>
    %c0_118 = arith.constant 0 : index
    %c0_119 = arith.constant 0 : index
    %c0_120 = arith.constant 0 : index
    %271 = vector.load %arg21[%c0_118, %c0_119, %c0_120] : memref<2x32x64xf32, #tpu.memory_space<vmem>>, vector<1x32x64xf32>
    %272 = vector.shape_cast %271 : vector<1x32x64xf32> to vector<32x64xf32>
    %cst_121 = arith.constant dense<0.000000e+00> : vector<8x64xf32>
    %273 = tpu.matmul %270, %272, %cst_121 {dimension_numbers = #tpu.dot_dimension_numbers<[1], [0], [0], [1], [0, 0, 1, 1], [], []>} : vector<8x32xf32>, vector<32x64xf32>, vector<8x64xf32> -> vector<8x64xf32>
    %c0_122 = arith.constant 0 : index
    %c0_123 = arith.constant 0 : index
    %c0_124 = arith.constant 0 : index
    %274 = vector.load %arg22[%c0_122, %c0_123, %c0_124] : memref<2x1x64xf32, #tpu.memory_space<vmem>>, vector<1x1x64xf32>
    %275 = vector.shape_cast %274 : vector<1x1x64xf32> to vector<1x64xf32>
    %276 = vector.broadcast %275 : vector<1x64xf32> to vector<8x64xf32>
    %277 = arith.addf %273, %276 : vector<8x64xf32>
    %cst_125 = arith.constant 0.000000e+00 : f32
    %278 = vector.broadcast %cst_125 : f32 to vector<8x64xf32>
    %279 = arith.maximumf %277, %278 : vector<8x64xf32>
    %c0_126 = arith.constant 0 : index
    %c0_127 = arith.constant 0 : index
    %c0_128 = arith.constant 0 : index
    %280 = vector.load %arg23[%c0_126, %c0_127, %c0_128] : memref<2x64x32xf32, #tpu.memory_space<vmem>>, vector<1x64x32xf32>
    %281 = vector.shape_cast %280 : vector<1x64x32xf32> to vector<64x32xf32>
    %cst_129 = arith.constant dense<0.000000e+00> : vector<8x32xf32>
    %282 = tpu.matmul %279, %281, %cst_129 {dimension_numbers = #tpu.dot_dimension_numbers<[1], [0], [0], [1], [0, 0, 1, 1], [], []>} : vector<8x64xf32>, vector<64x32xf32>, vector<8x32xf32> -> vector<8x32xf32>
    %283 = arith.addf %244, %282 : vector<8x32xf32>
    %c0_130 = arith.constant 0 : index
    %c0_131 = arith.constant 0 : index
    %c0_132 = arith.constant 0 : index
    %284 = vector.load %arg24[%c0_130, %c0_131, %c0_132] : memref<2x1x32xf32, #tpu.memory_space<vmem>>, vector<1x1x32xf32>
    %285 = vector.shape_cast %284 : vector<1x1x32xf32> to vector<1x32xf32>
    %286 = vector.broadcast %285 : vector<1x32xf32> to vector<8x32xf32>
    %287 = arith.addf %283, %286 : vector<8x32xf32>
    %c1 = arith.constant 1 : index
    %c0_133 = arith.constant 0 : index
    %c0_134 = arith.constant 0 : index
    %288 = vector.load %arg5[%c1, %c0_133, %c0_134] : memref<2x1x32xf32, #tpu.memory_space<vmem>>, vector<1x1x32xf32>
    %289 = vector.shape_cast %288 : vector<1x1x32xf32> to vector<1x32xf32>
    %c1_135 = arith.constant 1 : index
    %c0_136 = arith.constant 0 : index
    %c0_137 = arith.constant 0 : index
    %290 = vector.load %arg6[%c1_135, %c0_136, %c0_137] : memref<2x1x32xf32, #tpu.memory_space<vmem>>, vector<1x1x32xf32>
    %291 = vector.shape_cast %290 : vector<1x1x32xf32> to vector<1x32xf32>
    %cst_138 = arith.constant dense<0.000000e+00> : vector<8xf32>
    %292 = vector.multi_reduction <add>, %287, %cst_138 [1] : vector<8x32xf32> to vector<8xf32>
    %293 = vector.shape_cast %292 : vector<8xf32> to vector<8x1xf32>
    %cst_139 = arith.constant 3.200000e+01 : f32
    %294 = vector.broadcast %cst_139 : f32 to vector<8x1xf32>
    %295 = arith.divf %293, %294 : vector<8x1xf32>
    %296 = vector.broadcast %295 : vector<8x1xf32> to vector<8x32xf32>
    %297 = arith.subf %287, %296 : vector<8x32xf32>
    %298 = arith.mulf %297, %297 : vector<8x32xf32>
    %cst_140 = arith.constant dense<0.000000e+00> : vector<8xf32>
    %299 = vector.multi_reduction <add>, %298, %cst_140 [1] : vector<8x32xf32> to vector<8xf32>
    %300 = vector.shape_cast %299 : vector<8xf32> to vector<8x1xf32>
    %cst_141 = arith.constant 3.200000e+01 : f32
    %301 = vector.broadcast %cst_141 : f32 to vector<8x1xf32>
    %302 = arith.divf %300, %301 : vector<8x1xf32>
    %303 = vector.broadcast %295 : vector<8x1xf32> to vector<8x32xf32>
    %304 = arith.subf %287, %303 : vector<8x32xf32>
    %cst_142 = arith.constant 9.99999974E-6 : f32
    %305 = vector.broadcast %cst_142 : f32 to vector<8x1xf32>
    %306 = arith.addf %302, %305 : vector<8x1xf32>
    %307 = math.rsqrt %306 : vector<8x1xf32>
    %308 = vector.broadcast %307 : vector<8x1xf32> to vector<8x32xf32>
    %309 = arith.mulf %304, %308 : vector<8x32xf32>
    %310 = vector.broadcast %289 : vector<1x32xf32> to vector<8x32xf32>
    %311 = arith.mulf %309, %310 : vector<8x32xf32>
    %312 = vector.broadcast %291 : vector<1x32xf32> to vector<8x32xf32>
    %313 = arith.addf %311, %312 : vector<8x32xf32>
    %c1_143 = arith.constant 1 : index
    %c0_144 = arith.constant 0 : index
    %c0_145 = arith.constant 0 : index
    %314 = vector.load %arg7[%c1_143, %c0_144, %c0_145] : memref<2x32x96xf32, #tpu.memory_space<vmem>>, vector<1x32x96xf32>
    %315 = vector.shape_cast %314 : vector<1x32x96xf32> to vector<32x96xf32>
    %cst_146 = arith.constant dense<0.000000e+00> : vector<8x96xf32>
    %316 = tpu.matmul %313, %315, %cst_146 {dimension_numbers = #tpu.dot_dimension_numbers<[1], [0], [0], [1], [0, 0, 1, 1], [], []>} : vector<8x32xf32>, vector<32x96xf32>, vector<8x96xf32> -> vector<8x96xf32>
    %c1_147 = arith.constant 1 : index
    %c0_148 = arith.constant 0 : index
    %c0_149 = arith.constant 0 : index
    %317 = vector.load %arg8[%c1_147, %c0_148, %c0_149] : memref<2x1x96xf32, #tpu.memory_space<vmem>>, vector<1x1x96xf32>
    %318 = vector.shape_cast %317 : vector<1x1x96xf32> to vector<1x96xf32>
    %319 = vector.broadcast %318 : vector<1x96xf32> to vector<8x96xf32>
    %320 = arith.addf %316, %319 : vector<8x96xf32>
    %321 = vector.extract_strided_slice %320 {offsets = [0, 0], sizes = [8, 32], strides = [1, 1]} : vector<8x96xf32> to vector<8x32xf32>
    %322 = vector.extract_strided_slice %320 {offsets = [0, 32], sizes = [8, 64], strides = [1, 1]} : vector<8x96xf32> to vector<8x64xf32>
    %c1_150 = arith.constant 1 : index
    %c0_151 = arith.constant 0 : index
    %c0_152 = arith.constant 0 : index
    %323 = vector.load %arg9[%c1_150, %c0_151, %c0_152] : memref<2x32x32xf32, #tpu.memory_space<vmem>>, vector<1x32x32xf32>
    %324 = vector.shape_cast %323 : vector<1x32x32xf32> to vector<32x32xf32>
    %c1_153 = arith.constant 1 : index
    %c0_154 = arith.constant 0 : index
    %c0_155 = arith.constant 0 : index
    %325 = vector.load %arg10[%c1_153, %c0_154, %c0_155] : memref<2x1x32xf32, #tpu.memory_space<vmem>>, vector<1x1x32xf32>
    %326 = vector.shape_cast %325 : vector<1x1x32xf32> to vector<1x32xf32>
    %327 = vector.extract_strided_slice %321 {offsets = [0, 0], sizes = [8, 8], strides = [1, 1]} : vector<8x32xf32> to vector<8x8xf32>
    %328 = vector.extract_strided_slice %322 {offsets = [0, 0], sizes = [8, 8], strides = [1, 1]} : vector<8x64xf32> to vector<8x8xf32>
    %329 = vector.extract_strided_slice %322 {offsets = [0, 32], sizes = [8, 8], strides = [1, 1]} : vector<8x64xf32> to vector<8x8xf32>
    %cst_156 = arith.constant dense<0.000000e+00> : vector<8x8xf32>
    %330 = tpu.matmul %327, %328, %cst_156 {dimension_numbers = #tpu.dot_dimension_numbers<[1], [1], [0], [0], [0, 0, 1, 0], [], []>} : vector<8x8xf32>, vector<8x8xf32>, vector<8x8xf32> -> vector<8x8xf32>
    %cst_157 = arith.constant 0.353553385 : f32
    %331 = vector.broadcast %cst_157 : f32 to vector<8x8xf32>
    %332 = arith.mulf %330, %331 : vector<8x8xf32>
    %333 = arith.addf %332, %5 : vector<8x8xf32>
    %cst_158 = arith.constant dense<0xFF800000> : vector<8xf32>
    %334 = vector.multi_reduction <maximumf>, %333, %cst_158 [1] : vector<8x8xf32> to vector<8xf32>
    %335 = vector.shape_cast %334 : vector<8xf32> to vector<8x1xf32>
    %336 = vector.broadcast %335 : vector<8x1xf32> to vector<8x8xf32>
    %337 = arith.subf %333, %336 : vector<8x8xf32>
    %338 = math.exp %337 : vector<8x8xf32>
    %cst_159 = arith.constant dense<0.000000e+00> : vector<8xf32>
    %339 = vector.multi_reduction <add>, %338, %cst_159 [1] : vector<8x8xf32> to vector<8xf32>
    %340 = vector.shape_cast %339 : vector<8xf32> to vector<8x1xf32>
    %341 = tpu.reciprocal %340 {approx = true} : vector<8x1xf32> -> vector<8x1xf32>
    %342 = vector.broadcast %341 : vector<8x1xf32> to vector<8x8xf32>
    %343 = arith.mulf %338, %342 : vector<8x8xf32>
    %cst_160 = arith.constant dense<0.000000e+00> : vector<8x8xf32>
    %344 = tpu.matmul %343, %329, %cst_160 {dimension_numbers = #tpu.dot_dimension_numbers<[1], [0], [0], [1], [0, 0, 1, 1], [], []>} : vector<8x8xf32>, vector<8x8xf32>, vector<8x8xf32> -> vector<8x8xf32>
    %345 = vector.extract_strided_slice %321 {offsets = [0, 8], sizes = [8, 8], strides = [1, 1]} : vector<8x32xf32> to vector<8x8xf32>
    %346 = vector.extract_strided_slice %322 {offsets = [0, 8], sizes = [8, 8], strides = [1, 1]} : vector<8x64xf32> to vector<8x8xf32>
    %347 = vector.extract_strided_slice %322 {offsets = [0, 40], sizes = [8, 8], strides = [1, 1]} : vector<8x64xf32> to vector<8x8xf32>
    %cst_161 = arith.constant dense<0.000000e+00> : vector<8x8xf32>
    %348 = tpu.matmul %345, %346, %cst_161 {dimension_numbers = #tpu.dot_dimension_numbers<[1], [1], [0], [0], [0, 0, 1, 0], [], []>} : vector<8x8xf32>, vector<8x8xf32>, vector<8x8xf32> -> vector<8x8xf32>
    %cst_162 = arith.constant 0.353553385 : f32
    %349 = vector.broadcast %cst_162 : f32 to vector<8x8xf32>
    %350 = arith.mulf %348, %349 : vector<8x8xf32>
    %351 = arith.addf %350, %5 : vector<8x8xf32>
    %cst_163 = arith.constant dense<0xFF800000> : vector<8xf32>
    %352 = vector.multi_reduction <maximumf>, %351, %cst_163 [1] : vector<8x8xf32> to vector<8xf32>
    %353 = vector.shape_cast %352 : vector<8xf32> to vector<8x1xf32>
    %354 = vector.broadcast %353 : vector<8x1xf32> to vector<8x8xf32>
    %355 = arith.subf %351, %354 : vector<8x8xf32>
    %356 = math.exp %355 : vector<8x8xf32>
    %cst_164 = arith.constant dense<0.000000e+00> : vector<8xf32>
    %357 = vector.multi_reduction <add>, %356, %cst_164 [1] : vector<8x8xf32> to vector<8xf32>
    %358 = vector.shape_cast %357 : vector<8xf32> to vector<8x1xf32>
    %359 = tpu.reciprocal %358 {approx = true} : vector<8x1xf32> -> vector<8x1xf32>
    %360 = vector.broadcast %359 : vector<8x1xf32> to vector<8x8xf32>
    %361 = arith.mulf %356, %360 : vector<8x8xf32>
    %cst_165 = arith.constant dense<0.000000e+00> : vector<8x8xf32>
    %362 = tpu.matmul %361, %347, %cst_165 {dimension_numbers = #tpu.dot_dimension_numbers<[1], [0], [0], [1], [0, 0, 1, 1], [], []>} : vector<8x8xf32>, vector<8x8xf32>, vector<8x8xf32> -> vector<8x8xf32>
    %363 = vector.extract_strided_slice %321 {offsets = [0, 16], sizes = [8, 8], strides = [1, 1]} : vector<8x32xf32> to vector<8x8xf32>
    %364 = vector.extract_strided_slice %322 {offsets = [0, 16], sizes = [8, 8], strides = [1, 1]} : vector<8x64xf32> to vector<8x8xf32>
    %365 = vector.extract_strided_slice %322 {offsets = [0, 48], sizes = [8, 8], strides = [1, 1]} : vector<8x64xf32> to vector<8x8xf32>
    %cst_166 = arith.constant dense<0.000000e+00> : vector<8x8xf32>
    %366 = tpu.matmul %363, %364, %cst_166 {dimension_numbers = #tpu.dot_dimension_numbers<[1], [1], [0], [0], [0, 0, 1, 0], [], []>} : vector<8x8xf32>, vector<8x8xf32>, vector<8x8xf32> -> vector<8x8xf32>
    %cst_167 = arith.constant 0.353553385 : f32
    %367 = vector.broadcast %cst_167 : f32 to vector<8x8xf32>
    %368 = arith.mulf %366, %367 : vector<8x8xf32>
    %369 = arith.addf %368, %5 : vector<8x8xf32>
    %cst_168 = arith.constant dense<0xFF800000> : vector<8xf32>
    %370 = vector.multi_reduction <maximumf>, %369, %cst_168 [1] : vector<8x8xf32> to vector<8xf32>
    %371 = vector.shape_cast %370 : vector<8xf32> to vector<8x1xf32>
    %372 = vector.broadcast %371 : vector<8x1xf32> to vector<8x8xf32>
    %373 = arith.subf %369, %372 : vector<8x8xf32>
    %374 = math.exp %373 : vector<8x8xf32>
    %cst_169 = arith.constant dense<0.000000e+00> : vector<8xf32>
    %375 = vector.multi_reduction <add>, %374, %cst_169 [1] : vector<8x8xf32> to vector<8xf32>
    %376 = vector.shape_cast %375 : vector<8xf32> to vector<8x1xf32>
    %377 = tpu.reciprocal %376 {approx = true} : vector<8x1xf32> -> vector<8x1xf32>
    %378 = vector.broadcast %377 : vector<8x1xf32> to vector<8x8xf32>
    %379 = arith.mulf %374, %378 : vector<8x8xf32>
    %cst_170 = arith.constant dense<0.000000e+00> : vector<8x8xf32>
    %380 = tpu.matmul %379, %365, %cst_170 {dimension_numbers = #tpu.dot_dimension_numbers<[1], [0], [0], [1], [0, 0, 1, 1], [], []>} : vector<8x8xf32>, vector<8x8xf32>, vector<8x8xf32> -> vector<8x8xf32>
    %381 = vector.extract_strided_slice %321 {offsets = [0, 24], sizes = [8, 8], strides = [1, 1]} : vector<8x32xf32> to vector<8x8xf32>
    %382 = vector.extract_strided_slice %322 {offsets = [0, 24], sizes = [8, 8], strides = [1, 1]} : vector<8x64xf32> to vector<8x8xf32>
    %383 = vector.extract_strided_slice %322 {offsets = [0, 56], sizes = [8, 8], strides = [1, 1]} : vector<8x64xf32> to vector<8x8xf32>
    %cst_171 = arith.constant dense<0.000000e+00> : vector<8x8xf32>
    %384 = tpu.matmul %381, %382, %cst_171 {dimension_numbers = #tpu.dot_dimension_numbers<[1], [1], [0], [0], [0, 0, 1, 0], [], []>} : vector<8x8xf32>, vector<8x8xf32>, vector<8x8xf32> -> vector<8x8xf32>
    %cst_172 = arith.constant 0.353553385 : f32
    %385 = vector.broadcast %cst_172 : f32 to vector<8x8xf32>
    %386 = arith.mulf %384, %385 : vector<8x8xf32>
    %387 = arith.addf %386, %5 : vector<8x8xf32>
    %cst_173 = arith.constant dense<0xFF800000> : vector<8xf32>
    %388 = vector.multi_reduction <maximumf>, %387, %cst_173 [1] : vector<8x8xf32> to vector<8xf32>
    %389 = vector.shape_cast %388 : vector<8xf32> to vector<8x1xf32>
    %390 = vector.broadcast %389 : vector<8x1xf32> to vector<8x8xf32>
    %391 = arith.subf %387, %390 : vector<8x8xf32>
    %392 = math.exp %391 : vector<8x8xf32>
    %cst_174 = arith.constant dense<0.000000e+00> : vector<8xf32>
    %393 = vector.multi_reduction <add>, %392, %cst_174 [1] : vector<8x8xf32> to vector<8xf32>
    %394 = vector.shape_cast %393 : vector<8xf32> to vector<8x1xf32>
    %395 = tpu.reciprocal %394 {approx = true} : vector<8x1xf32> -> vector<8x1xf32>
    %396 = vector.broadcast %395 : vector<8x1xf32> to vector<8x8xf32>
    %397 = arith.mulf %392, %396 : vector<8x8xf32>
    %cst_175 = arith.constant dense<0.000000e+00> : vector<8x8xf32>
    %398 = tpu.matmul %397, %383, %cst_175 {dimension_numbers = #tpu.dot_dimension_numbers<[1], [0], [0], [1], [0, 0, 1, 1], [], []>} : vector<8x8xf32>, vector<8x8xf32>, vector<8x8xf32> -> vector<8x8xf32>
    %399 = tpu.concatenate %344, %362, %380, %398 in 1 : vector<8x8xf32>, vector<8x8xf32>, vector<8x8xf32>, vector<8x8xf32> -> vector<8x32xf32>
    %cst_176 = arith.constant dense<0.000000e+00> : vector<8x32xf32>
    %400 = tpu.matmul %399, %324, %cst_176 {dimension_numbers = #tpu.dot_dimension_numbers<[1], [0], [0], [1], [0, 0, 1, 1], [], []>} : vector<8x32xf32>, vector<32x32xf32>, vector<8x32xf32> -> vector<8x32xf32>
    %401 = vector.broadcast %326 : vector<1x32xf32> to vector<8x32xf32>
    %402 = arith.addf %400, %401 : vector<8x32xf32>
    %403 = arith.addf %287, %402 : vector<8x32xf32>
    %c1_177 = arith.constant 1 : index
    %c0_178 = arith.constant 0 : index
    %c0_179 = arith.constant 0 : index
    %404 = vector.load %arg11[%c1_177, %c0_178, %c0_179] : memref<2x1x32xf32, #tpu.memory_space<vmem>>, vector<1x1x32xf32>
    %405 = vector.shape_cast %404 : vector<1x1x32xf32> to vector<1x32xf32>
    %c1_180 = arith.constant 1 : index
    %c0_181 = arith.constant 0 : index
    %c0_182 = arith.constant 0 : index
    %406 = vector.load %arg12[%c1_180, %c0_181, %c0_182] : memref<2x1x32xf32, #tpu.memory_space<vmem>>, vector<1x1x32xf32>
    %407 = vector.shape_cast %406 : vector<1x1x32xf32> to vector<1x32xf32>
    %cst_183 = arith.constant dense<0.000000e+00> : vector<8xf32>
    %408 = vector.multi_reduction <add>, %403, %cst_183 [1] : vector<8x32xf32> to vector<8xf32>
    %409 = vector.shape_cast %408 : vector<8xf32> to vector<8x1xf32>
    %cst_184 = arith.constant 3.200000e+01 : f32
    %410 = vector.broadcast %cst_184 : f32 to vector<8x1xf32>
    %411 = arith.divf %409, %410 : vector<8x1xf32>
    %412 = vector.broadcast %411 : vector<8x1xf32> to vector<8x32xf32>
    %413 = arith.subf %403, %412 : vector<8x32xf32>
    %414 = arith.mulf %413, %413 : vector<8x32xf32>
    %cst_185 = arith.constant dense<0.000000e+00> : vector<8xf32>
    %415 = vector.multi_reduction <add>, %414, %cst_185 [1] : vector<8x32xf32> to vector<8xf32>
    %416 = vector.shape_cast %415 : vector<8xf32> to vector<8x1xf32>
    %cst_186 = arith.constant 3.200000e+01 : f32
    %417 = vector.broadcast %cst_186 : f32 to vector<8x1xf32>
    %418 = arith.divf %416, %417 : vector<8x1xf32>
    %419 = vector.broadcast %411 : vector<8x1xf32> to vector<8x32xf32>
    %420 = arith.subf %403, %419 : vector<8x32xf32>
    %cst_187 = arith.constant 9.99999974E-6 : f32
    %421 = vector.broadcast %cst_187 : f32 to vector<8x1xf32>
    %422 = arith.addf %418, %421 : vector<8x1xf32>
    %423 = math.rsqrt %422 : vector<8x1xf32>
    %424 = vector.broadcast %423 : vector<8x1xf32> to vector<8x32xf32>
    %425 = arith.mulf %420, %424 : vector<8x32xf32>
    %426 = vector.broadcast %405 : vector<1x32xf32> to vector<8x32xf32>
    %427 = arith.mulf %425, %426 : vector<8x32xf32>
    %428 = vector.broadcast %407 : vector<1x32xf32> to vector<8x32xf32>
    %429 = arith.addf %427, %428 : vector<8x32xf32>
    %c1_188 = arith.constant 1 : index
    %c0_189 = arith.constant 0 : index
    %c0_190 = arith.constant 0 : index
    %430 = vector.load %arg13[%c1_188, %c0_189, %c0_190] : memref<2x32x32xf32, #tpu.memory_space<vmem>>, vector<1x32x32xf32>
    %431 = vector.shape_cast %430 : vector<1x32x32xf32> to vector<32x32xf32>
    %cst_191 = arith.constant dense<0.000000e+00> : vector<8x32xf32>
    %432 = tpu.matmul %429, %431, %cst_191 {dimension_numbers = #tpu.dot_dimension_numbers<[1], [0], [0], [1], [0, 0, 1, 1], [], []>} : vector<8x32xf32>, vector<32x32xf32>, vector<8x32xf32> -> vector<8x32xf32>
    %c1_192 = arith.constant 1 : index
    %c0_193 = arith.constant 0 : index
    %c0_194 = arith.constant 0 : index
    %433 = vector.load %arg14[%c1_192, %c0_193, %c0_194] : memref<2x1x32xf32, #tpu.memory_space<vmem>>, vector<1x1x32xf32>
    %434 = vector.shape_cast %433 : vector<1x1x32xf32> to vector<1x32xf32>
    %435 = vector.broadcast %434 : vector<1x32xf32> to vector<8x32xf32>
    %436 = arith.addf %432, %435 : vector<8x32xf32>
    %c1_195 = arith.constant 1 : index
    %c0_196 = arith.constant 0 : index
    %c0_197 = arith.constant 0 : index
    %437 = vector.load %arg15[%c1_195, %c0_196, %c0_197] : memref<2x32x64xf32, #tpu.memory_space<vmem>>, vector<1x32x64xf32>
    %438 = vector.shape_cast %437 : vector<1x32x64xf32> to vector<32x64xf32>
    %cst_198 = arith.constant dense<0.000000e+00> : vector<12x64xf32>
    %439 = tpu.matmul %3, %438, %cst_198 {dimension_numbers = #tpu.dot_dimension_numbers<[1], [0], [0], [1], [0, 0, 1, 1], [], []>} : vector<12x32xf32>, vector<32x64xf32>, vector<12x64xf32> -> vector<12x64xf32>
    %c1_199 = arith.constant 1 : index
    %c0_200 = arith.constant 0 : index
    %c0_201 = arith.constant 0 : index
    %440 = vector.load %arg16[%c1_199, %c0_200, %c0_201] : memref<2x1x64xf32, #tpu.memory_space<vmem>>, vector<1x1x64xf32>
    %441 = vector.shape_cast %440 : vector<1x1x64xf32> to vector<1x64xf32>
    %442 = vector.broadcast %441 : vector<1x64xf32> to vector<12x64xf32>
    %443 = arith.addf %439, %442 : vector<12x64xf32>
    %c1_202 = arith.constant 1 : index
    %c0_203 = arith.constant 0 : index
    %c0_204 = arith.constant 0 : index
    %444 = vector.load %arg17[%c1_202, %c0_203, %c0_204] : memref<2x32x32xf32, #tpu.memory_space<vmem>>, vector<1x32x32xf32>
    %445 = vector.shape_cast %444 : vector<1x32x32xf32> to vector<32x32xf32>
    %c1_205 = arith.constant 1 : index
    %c0_206 = arith.constant 0 : index
    %c0_207 = arith.constant 0 : index
    %446 = vector.load %arg18[%c1_205, %c0_206, %c0_207] : memref<2x1x32xf32, #tpu.memory_space<vmem>>, vector<1x1x32xf32>
    %447 = vector.shape_cast %446 : vector<1x1x32xf32> to vector<1x32xf32>
    %448 = vector.extract_strided_slice %436 {offsets = [0, 0], sizes = [8, 8], strides = [1, 1]} : vector<8x32xf32> to vector<8x8xf32>
    %449 = vector.extract_strided_slice %443 {offsets = [0, 0], sizes = [12, 8], strides = [1, 1]} : vector<12x64xf32> to vector<12x8xf32>
    %450 = vector.extract_strided_slice %443 {offsets = [0, 32], sizes = [12, 8], strides = [1, 1]} : vector<12x64xf32> to vector<12x8xf32>
    %cst_208 = arith.constant dense<0.000000e+00> : vector<8x12xf32>
    %451 = tpu.matmul %448, %449, %cst_208 {dimension_numbers = #tpu.dot_dimension_numbers<[1], [1], [0], [0], [0, 0, 1, 0], [], []>} : vector<8x8xf32>, vector<12x8xf32>, vector<8x12xf32> -> vector<8x12xf32>
    %cst_209 = arith.constant 0.353553385 : f32
    %452 = vector.broadcast %cst_209 : f32 to vector<8x12xf32>
    %453 = arith.mulf %451, %452 : vector<8x12xf32>
    %454 = arith.addf %453, %7 : vector<8x12xf32>
    %cst_210 = arith.constant dense<0xFF800000> : vector<8xf32>
    %455 = vector.multi_reduction <maximumf>, %454, %cst_210 [1] : vector<8x12xf32> to vector<8xf32>
    %456 = vector.shape_cast %455 : vector<8xf32> to vector<8x1xf32>
    %457 = vector.broadcast %456 : vector<8x1xf32> to vector<8x12xf32>
    %458 = arith.subf %454, %457 : vector<8x12xf32>
    %459 = math.exp %458 : vector<8x12xf32>
    %cst_211 = arith.constant dense<0.000000e+00> : vector<8xf32>
    %460 = vector.multi_reduction <add>, %459, %cst_211 [1] : vector<8x12xf32> to vector<8xf32>
    %461 = vector.shape_cast %460 : vector<8xf32> to vector<8x1xf32>
    %462 = tpu.reciprocal %461 {approx = true} : vector<8x1xf32> -> vector<8x1xf32>
    %463 = vector.broadcast %462 : vector<8x1xf32> to vector<8x12xf32>
    %464 = arith.mulf %459, %463 : vector<8x12xf32>
    %cst_212 = arith.constant dense<0.000000e+00> : vector<8x8xf32>
    %465 = tpu.matmul %464, %450, %cst_212 {dimension_numbers = #tpu.dot_dimension_numbers<[1], [0], [0], [1], [0, 0, 1, 1], [], []>} : vector<8x12xf32>, vector<12x8xf32>, vector<8x8xf32> -> vector<8x8xf32>
    %466 = vector.extract_strided_slice %436 {offsets = [0, 8], sizes = [8, 8], strides = [1, 1]} : vector<8x32xf32> to vector<8x8xf32>
    %467 = vector.extract_strided_slice %443 {offsets = [0, 8], sizes = [12, 8], strides = [1, 1]} : vector<12x64xf32> to vector<12x8xf32>
    %468 = vector.extract_strided_slice %443 {offsets = [0, 40], sizes = [12, 8], strides = [1, 1]} : vector<12x64xf32> to vector<12x8xf32>
    %cst_213 = arith.constant dense<0.000000e+00> : vector<8x12xf32>
    %469 = tpu.matmul %466, %467, %cst_213 {dimension_numbers = #tpu.dot_dimension_numbers<[1], [1], [0], [0], [0, 0, 1, 0], [], []>} : vector<8x8xf32>, vector<12x8xf32>, vector<8x12xf32> -> vector<8x12xf32>
    %cst_214 = arith.constant 0.353553385 : f32
    %470 = vector.broadcast %cst_214 : f32 to vector<8x12xf32>
    %471 = arith.mulf %469, %470 : vector<8x12xf32>
    %472 = arith.addf %471, %7 : vector<8x12xf32>
    %cst_215 = arith.constant dense<0xFF800000> : vector<8xf32>
    %473 = vector.multi_reduction <maximumf>, %472, %cst_215 [1] : vector<8x12xf32> to vector<8xf32>
    %474 = vector.shape_cast %473 : vector<8xf32> to vector<8x1xf32>
    %475 = vector.broadcast %474 : vector<8x1xf32> to vector<8x12xf32>
    %476 = arith.subf %472, %475 : vector<8x12xf32>
    %477 = math.exp %476 : vector<8x12xf32>
    %cst_216 = arith.constant dense<0.000000e+00> : vector<8xf32>
    %478 = vector.multi_reduction <add>, %477, %cst_216 [1] : vector<8x12xf32> to vector<8xf32>
    %479 = vector.shape_cast %478 : vector<8xf32> to vector<8x1xf32>
    %480 = tpu.reciprocal %479 {approx = true} : vector<8x1xf32> -> vector<8x1xf32>
    %481 = vector.broadcast %480 : vector<8x1xf32> to vector<8x12xf32>
    %482 = arith.mulf %477, %481 : vector<8x12xf32>
    %cst_217 = arith.constant dense<0.000000e+00> : vector<8x8xf32>
    %483 = tpu.matmul %482, %468, %cst_217 {dimension_numbers = #tpu.dot_dimension_numbers<[1], [0], [0], [1], [0, 0, 1, 1], [], []>} : vector<8x12xf32>, vector<12x8xf32>, vector<8x8xf32> -> vector<8x8xf32>
    %484 = vector.extract_strided_slice %436 {offsets = [0, 16], sizes = [8, 8], strides = [1, 1]} : vector<8x32xf32> to vector<8x8xf32>
    %485 = vector.extract_strided_slice %443 {offsets = [0, 16], sizes = [12, 8], strides = [1, 1]} : vector<12x64xf32> to vector<12x8xf32>
    %486 = vector.extract_strided_slice %443 {offsets = [0, 48], sizes = [12, 8], strides = [1, 1]} : vector<12x64xf32> to vector<12x8xf32>
    %cst_218 = arith.constant dense<0.000000e+00> : vector<8x12xf32>
    %487 = tpu.matmul %484, %485, %cst_218 {dimension_numbers = #tpu.dot_dimension_numbers<[1], [1], [0], [0], [0, 0, 1, 0], [], []>} : vector<8x8xf32>, vector<12x8xf32>, vector<8x12xf32> -> vector<8x12xf32>
    %cst_219 = arith.constant 0.353553385 : f32
    %488 = vector.broadcast %cst_219 : f32 to vector<8x12xf32>
    %489 = arith.mulf %487, %488 : vector<8x12xf32>
    %490 = arith.addf %489, %7 : vector<8x12xf32>
    %cst_220 = arith.constant dense<0xFF800000> : vector<8xf32>
    %491 = vector.multi_reduction <maximumf>, %490, %cst_220 [1] : vector<8x12xf32> to vector<8xf32>
    %492 = vector.shape_cast %491 : vector<8xf32> to vector<8x1xf32>
    %493 = vector.broadcast %492 : vector<8x1xf32> to vector<8x12xf32>
    %494 = arith.subf %490, %493 : vector<8x12xf32>
    %495 = math.exp %494 : vector<8x12xf32>
    %cst_221 = arith.constant dense<0.000000e+00> : vector<8xf32>
    %496 = vector.multi_reduction <add>, %495, %cst_221 [1] : vector<8x12xf32> to vector<8xf32>
    %497 = vector.shape_cast %496 : vector<8xf32> to vector<8x1xf32>
    %498 = tpu.reciprocal %497 {approx = true} : vector<8x1xf32> -> vector<8x1xf32>
    %499 = vector.broadcast %498 : vector<8x1xf32> to vector<8x12xf32>
    %500 = arith.mulf %495, %499 : vector<8x12xf32>
    %cst_222 = arith.constant dense<0.000000e+00> : vector<8x8xf32>
    %501 = tpu.matmul %500, %486, %cst_222 {dimension_numbers = #tpu.dot_dimension_numbers<[1], [0], [0], [1], [0, 0, 1, 1], [], []>} : vector<8x12xf32>, vector<12x8xf32>, vector<8x8xf32> -> vector<8x8xf32>
    %502 = vector.extract_strided_slice %436 {offsets = [0, 24], sizes = [8, 8], strides = [1, 1]} : vector<8x32xf32> to vector<8x8xf32>
    %503 = vector.extract_strided_slice %443 {offsets = [0, 24], sizes = [12, 8], strides = [1, 1]} : vector<12x64xf32> to vector<12x8xf32>
    %504 = vector.extract_strided_slice %443 {offsets = [0, 56], sizes = [12, 8], strides = [1, 1]} : vector<12x64xf32> to vector<12x8xf32>
    %cst_223 = arith.constant dense<0.000000e+00> : vector<8x12xf32>
    %505 = tpu.matmul %502, %503, %cst_223 {dimension_numbers = #tpu.dot_dimension_numbers<[1], [1], [0], [0], [0, 0, 1, 0], [], []>} : vector<8x8xf32>, vector<12x8xf32>, vector<8x12xf32> -> vector<8x12xf32>
    %cst_224 = arith.constant 0.353553385 : f32
    %506 = vector.broadcast %cst_224 : f32 to vector<8x12xf32>
    %507 = arith.mulf %505, %506 : vector<8x12xf32>
    %508 = arith.addf %507, %7 : vector<8x12xf32>
    %cst_225 = arith.constant dense<0xFF800000> : vector<8xf32>
    %509 = vector.multi_reduction <maximumf>, %508, %cst_225 [1] : vector<8x12xf32> to vector<8xf32>
    %510 = vector.shape_cast %509 : vector<8xf32> to vector<8x1xf32>
    %511 = vector.broadcast %510 : vector<8x1xf32> to vector<8x12xf32>
    %512 = arith.subf %508, %511 : vector<8x12xf32>
    %513 = math.exp %512 : vector<8x12xf32>
    %cst_226 = arith.constant dense<0.000000e+00> : vector<8xf32>
    %514 = vector.multi_reduction <add>, %513, %cst_226 [1] : vector<8x12xf32> to vector<8xf32>
    %515 = vector.shape_cast %514 : vector<8xf32> to vector<8x1xf32>
    %516 = tpu.reciprocal %515 {approx = true} : vector<8x1xf32> -> vector<8x1xf32>
    %517 = vector.broadcast %516 : vector<8x1xf32> to vector<8x12xf32>
    %518 = arith.mulf %513, %517 : vector<8x12xf32>
    %cst_227 = arith.constant dense<0.000000e+00> : vector<8x8xf32>
    %519 = tpu.matmul %518, %504, %cst_227 {dimension_numbers = #tpu.dot_dimension_numbers<[1], [0], [0], [1], [0, 0, 1, 1], [], []>} : vector<8x12xf32>, vector<12x8xf32>, vector<8x8xf32> -> vector<8x8xf32>
    %520 = tpu.concatenate %465, %483, %501, %519 in 1 : vector<8x8xf32>, vector<8x8xf32>, vector<8x8xf32>, vector<8x8xf32> -> vector<8x32xf32>
    %cst_228 = arith.constant dense<0.000000e+00> : vector<8x32xf32>
    %521 = tpu.matmul %520, %445, %cst_228 {dimension_numbers = #tpu.dot_dimension_numbers<[1], [0], [0], [1], [0, 0, 1, 1], [], []>} : vector<8x32xf32>, vector<32x32xf32>, vector<8x32xf32> -> vector<8x32xf32>
    %522 = vector.broadcast %447 : vector<1x32xf32> to vector<8x32xf32>
    %523 = arith.addf %521, %522 : vector<8x32xf32>
    %524 = arith.addf %403, %523 : vector<8x32xf32>
    %c1_229 = arith.constant 1 : index
    %c0_230 = arith.constant 0 : index
    %c0_231 = arith.constant 0 : index
    %525 = vector.load %arg19[%c1_229, %c0_230, %c0_231] : memref<2x1x32xf32, #tpu.memory_space<vmem>>, vector<1x1x32xf32>
    %526 = vector.shape_cast %525 : vector<1x1x32xf32> to vector<1x32xf32>
    %c1_232 = arith.constant 1 : index
    %c0_233 = arith.constant 0 : index
    %c0_234 = arith.constant 0 : index
    %527 = vector.load %arg20[%c1_232, %c0_233, %c0_234] : memref<2x1x32xf32, #tpu.memory_space<vmem>>, vector<1x1x32xf32>
    %528 = vector.shape_cast %527 : vector<1x1x32xf32> to vector<1x32xf32>
    %cst_235 = arith.constant dense<0.000000e+00> : vector<8xf32>
    %529 = vector.multi_reduction <add>, %524, %cst_235 [1] : vector<8x32xf32> to vector<8xf32>
    %530 = vector.shape_cast %529 : vector<8xf32> to vector<8x1xf32>
    %cst_236 = arith.constant 3.200000e+01 : f32
    %531 = vector.broadcast %cst_236 : f32 to vector<8x1xf32>
    %532 = arith.divf %530, %531 : vector<8x1xf32>
    %533 = vector.broadcast %532 : vector<8x1xf32> to vector<8x32xf32>
    %534 = arith.subf %524, %533 : vector<8x32xf32>
    %535 = arith.mulf %534, %534 : vector<8x32xf32>
    %cst_237 = arith.constant dense<0.000000e+00> : vector<8xf32>
    %536 = vector.multi_reduction <add>, %535, %cst_237 [1] : vector<8x32xf32> to vector<8xf32>
    %537 = vector.shape_cast %536 : vector<8xf32> to vector<8x1xf32>
    %cst_238 = arith.constant 3.200000e+01 : f32
    %538 = vector.broadcast %cst_238 : f32 to vector<8x1xf32>
    %539 = arith.divf %537, %538 : vector<8x1xf32>
    %540 = vector.broadcast %532 : vector<8x1xf32> to vector<8x32xf32>
    %541 = arith.subf %524, %540 : vector<8x32xf32>
    %cst_239 = arith.constant 9.99999974E-6 : f32
    %542 = vector.broadcast %cst_239 : f32 to vector<8x1xf32>
    %543 = arith.addf %539, %542 : vector<8x1xf32>
    %544 = math.rsqrt %543 : vector<8x1xf32>
    %545 = vector.broadcast %544 : vector<8x1xf32> to vector<8x32xf32>
    %546 = arith.mulf %541, %545 : vector<8x32xf32>
    %547 = vector.broadcast %526 : vector<1x32xf32> to vector<8x32xf32>
    %548 = arith.mulf %546, %547 : vector<8x32xf32>
    %549 = vector.broadcast %528 : vector<1x32xf32> to vector<8x32xf32>
    %550 = arith.addf %548, %549 : vector<8x32xf32>
    %c1_240 = arith.constant 1 : index
    %c0_241 = arith.constant 0 : index
    %c0_242 = arith.constant 0 : index
    %551 = vector.load %arg21[%c1_240, %c0_241, %c0_242] : memref<2x32x64xf32, #tpu.memory_space<vmem>>, vector<1x32x64xf32>
    %552 = vector.shape_cast %551 : vector<1x32x64xf32> to vector<32x64xf32>
    %cst_243 = arith.constant dense<0.000000e+00> : vector<8x64xf32>
    %553 = tpu.matmul %550, %552, %cst_243 {dimension_numbers = #tpu.dot_dimension_numbers<[1], [0], [0], [1], [0, 0, 1, 1], [], []>} : vector<8x32xf32>, vector<32x64xf32>, vector<8x64xf32> -> vector<8x64xf32>
    %c1_244 = arith.constant 1 : index
    %c0_245 = arith.constant 0 : index
    %c0_246 = arith.constant 0 : index
    %554 = vector.load %arg22[%c1_244, %c0_245, %c0_246] : memref<2x1x64xf32, #tpu.memory_space<vmem>>, vector<1x1x64xf32>
    %555 = vector.shape_cast %554 : vector<1x1x64xf32> to vector<1x64xf32>
    %556 = vector.broadcast %555 : vector<1x64xf32> to vector<8x64xf32>
    %557 = arith.addf %553, %556 : vector<8x64xf32>
    %cst_247 = arith.constant 0.000000e+00 : f32
    %558 = vector.broadcast %cst_247 : f32 to vector<8x64xf32>
    %559 = arith.maximumf %557, %558 : vector<8x64xf32>
    %c1_248 = arith.constant 1 : index
    %c0_249 = arith.constant 0 : index
    %c0_250 = arith.constant 0 : index
    %560 = vector.load %arg23[%c1_248, %c0_249, %c0_250] : memref<2x64x32xf32, #tpu.memory_space<vmem>>, vector<1x64x32xf32>
    %561 = vector.shape_cast %560 : vector<1x64x32xf32> to vector<64x32xf32>
    %cst_251 = arith.constant dense<0.000000e+00> : vector<8x32xf32>
    %562 = tpu.matmul %559, %561, %cst_251 {dimension_numbers = #tpu.dot_dimension_numbers<[1], [0], [0], [1], [0, 0, 1, 1], [], []>} : vector<8x64xf32>, vector<64x32xf32>, vector<8x32xf32> -> vector<8x32xf32>
    %563 = arith.addf %524, %562 : vector<8x32xf32>
    %c1_252 = arith.constant 1 : index
    %c0_253 = arith.constant 0 : index
    %c0_254 = arith.constant 0 : index
    %564 = vector.load %arg24[%c1_252, %c0_253, %c0_254] : memref<2x1x32xf32, #tpu.memory_space<vmem>>, vector<1x1x32xf32>
    %565 = vector.shape_cast %564 : vector<1x1x32xf32> to vector<1x32xf32>
    %566 = vector.broadcast %565 : vector<1x32xf32> to vector<8x32xf32>
    %567 = arith.addf %563, %566 : vector<8x32xf32>
    %c0_255 = arith.constant 0 : index
    %c0_256 = arith.constant 0 : index
    %568 = vector.load %arg25[%c0_255, %c0_256] : memref<1x32xf32, #tpu.memory_space<vmem>>, vector<1x32xf32>
    %c0_257 = arith.constant 0 : index
    %c0_258 = arith.constant 0 : index
    %569 = vector.load %arg26[%c0_257, %c0_258] : memref<1x32xf32, #tpu.memory_space<vmem>>, vector<1x32xf32>
    %cst_259 = arith.constant dense<0.000000e+00> : vector<8xf32>
    %570 = vector.multi_reduction <add>, %567, %cst_259 [1] : vector<8x32xf32> to vector<8xf32>
    %571 = vector.shape_cast %570 : vector<8xf32> to vector<8x1xf32>
    %cst_260 = arith.constant 3.200000e+01 : f32
    %572 = vector.broadcast %cst_260 : f32 to vector<8x1xf32>
    %573 = arith.divf %571, %572 : vector<8x1xf32>
    %574 = vector.broadcast %573 : vector<8x1xf32> to vector<8x32xf32>
    %575 = arith.subf %567, %574 : vector<8x32xf32>
    %576 = arith.mulf %575, %575 : vector<8x32xf32>
    %cst_261 = arith.constant dense<0.000000e+00> : vector<8xf32>
    %577 = vector.multi_reduction <add>, %576, %cst_261 [1] : vector<8x32xf32> to vector<8xf32>
    %578 = vector.shape_cast %577 : vector<8xf32> to vector<8x1xf32>
    %cst_262 = arith.constant 3.200000e+01 : f32
    %579 = vector.broadcast %cst_262 : f32 to vector<8x1xf32>
    %580 = arith.divf %578, %579 : vector<8x1xf32>
    %581 = vector.broadcast %573 : vector<8x1xf32> to vector<8x32xf32>
    %582 = arith.subf %567, %581 : vector<8x32xf32>
    %cst_263 = arith.constant 9.99999974E-6 : f32
    %583 = vector.broadcast %cst_263 : f32 to vector<8x1xf32>
    %584 = arith.addf %580, %583 : vector<8x1xf32>
    %585 = math.rsqrt %584 : vector<8x1xf32>
    %586 = vector.broadcast %585 : vector<8x1xf32> to vector<8x32xf32>
    %587 = arith.mulf %582, %586 : vector<8x32xf32>
    %588 = vector.broadcast %568 : vector<1x32xf32> to vector<8x32xf32>
    %589 = arith.mulf %587, %588 : vector<8x32xf32>
    %590 = vector.broadcast %569 : vector<1x32xf32> to vector<8x32xf32>
    %591 = arith.addf %589, %590 : vector<8x32xf32>
    %c0_264 = arith.constant 0 : index
    %c0_265 = arith.constant 0 : index
    %592 = vector.load %arg27[%c0_264, %c0_265] : memref<32x128xf32, #tpu.memory_space<vmem>>, vector<32x128xf32>
    %cst_266 = arith.constant dense<0.000000e+00> : vector<8x128xf32>
    %593 = tpu.matmul %591, %592, %cst_266 {dimension_numbers = #tpu.dot_dimension_numbers<[1], [0], [0], [1], [0, 0, 1, 1], [], []>} : vector<8x32xf32>, vector<32x128xf32>, vector<8x128xf32> -> vector<8x128xf32>
    %c0_267 = arith.constant 0 : index
    %c0_268 = arith.constant 0 : index
    %594 = vector.load %arg28[%c0_267, %c0_268] : memref<1x128xf32, #tpu.memory_space<vmem>>, vector<1x128xf32>
    %595 = vector.broadcast %594 : vector<1x128xf32> to vector<8x128xf32>
    %596 = arith.addf %593, %595 : vector<8x128xf32>
    %c0_269 = arith.constant 0 : index
    %c0_270 = arith.constant 0 : index
    %c0_271 = arith.constant 0 : index
    %597 = vector.load %arg29[%c0_269, %c0_270, %c0_271] : memref<1x8x128xf32, #tpu.memory_space<vmem>>, vector<1x8x128xf32>
    %598 = vector.shape_cast %597 : vector<1x8x128xf32> to vector<8x128xf32>
    %599 = vector.shape_cast %596 : vector<8x128xf32> to vector<1x8x128xf32>
    tpu.vector_store %arg29[%c0_269, %c0_270, %c0_271], %599 {strides = array<i32>} : memref<1x8x128xf32, #tpu.memory_space<vmem>>, vector<1x8x128xf32>,
    return
  }
  func.func @transform_0(%arg0: i32) -> (i32, i32, i32) {
    %c0_i32 = arith.constant 0 : i32
    %c0_i32_0 = arith.constant 0 : i32
    %c0_i32_1 = arith.constant 0 : i32
    return %arg0, %c0_i32, %c0_i32_0 : i32, i32, i32
  }
  func.func @transform_1(%arg0: i32) -> (i32, i32, i32) {
    %c0_i32 = arith.constant 0 : i32
    %c0_i32_0 = arith.constant 0 : i32
    %c0_i32_1 = arith.constant 0 : i32
    return %arg0, %c0_i32, %c0_i32_0 : i32, i32, i32
  }
  func.func @transform_2(%arg0: i32) -> (i32, i32, i32) {
    %c0_i32 = arith.constant 0 : i32
    %c0_i32_0 = arith.constant 0 : i32
    %c0_i32_1 = arith.constant 0 : i32
    return %arg0, %c0_i32, %c0_i32_0 : i32, i32, i32
  }
  func.func @transform_3(%arg0: i32) -> (i32, i32, i32) {
    %c0_i32 = arith.constant 0 : i32
    %c0_i32_0 = arith.constant 0 : i32
    %c0_i32_1 = arith.constant 0 : i32
    return %arg0, %c0_i32, %c0_i32_0 : i32, i32, i32
  }
  func.func @transform_4(%arg0: i32) -> (i32, i32, i32) {
    %c0_i32 = arith.constant 0 : i32
    %c0_i32_0 = arith.constant 0 : i32
    %c0_i32_1 = arith.constant 0 : i32
    %c0_i32_2 = arith.constant 0 : i32
    return %c0_i32, %c0_i32_0, %c0_i32_1 : i32, i32, i32
  }
  func.func @transform_5(%arg0: i32) -> (i32, i32, i32) {
    %c0_i32 = arith.constant 0 : i32
    %c0_i32_0 = arith.constant 0 : i32
    %c0_i32_1 = arith.constant 0 : i32
    %c0_i32_2 = arith.constant 0 : i32
    return %c0_i32, %c0_i32_0, %c0_i32_1 : i32, i32, i32
  }
  func.func @transform_6(%arg0: i32) -> (i32, i32, i32) {
    %c0_i32 = arith.constant 0 : i32
    %c0_i32_0 = arith.constant 0 : i32
    %c0_i32_1 = arith.constant 0 : i32
    %c0_i32_2 = arith.constant 0 : i32
    return %c0_i32, %c0_i32_0, %c0_i32_1 : i32, i32, i32
  }
  func.func @transform_7(%arg0: i32) -> (i32, i32, i32) {
    %c0_i32 = arith.constant 0 : i32
    %c0_i32_0 = arith.constant 0 : i32
    %c0_i32_1 = arith.constant 0 : i32
    %c0_i32_2 = arith.constant 0 : i32
    return %c0_i32, %c0_i32_0, %c0_i32_1 : i32, i32, i32
  }
  func.func @transform_8(%arg0: i32) -> (i32, i32, i32) {
    %c0_i32 = arith.constant 0 : i32
    %c0_i32_0 = arith.constant 0 : i32
    %c0_i32_1 = arith.constant 0 : i32
    %c0_i32_2 = arith.constant 0 : i32
    return %c0_i32, %c0_i32_0, %c0_i32_1 : i32, i32, i32
  }
  func.func @transform_9(%arg0: i32) -> (i32, i32, i32) {
    %c0_i32 = arith.constant 0 : i32
    %c0_i32_0 = arith.constant 0 : i32
    %c0_i32_1 = arith.constant 0 : i32
    %c0_i32_2 = arith.constant 0 : i32
    return %c0_i32, %c0_i32_0, %c0_i32_1 : i32, i32, i32
  }
  func.func @transform_10(%arg0: i32) -> (i32, i32, i32) {
    %c0_i32 = arith.constant 0 : i32
    %c0_i32_0 = arith.constant 0 : i32
    %c0_i32_1 = arith.constant 0 : i32
    %c0_i32_2 = arith.constant 0 : i32
    return %c0_i32, %c0_i32_0, %c0_i32_1 : i32, i32, i32
  }
  func.func @transform_11(%arg0: i32) -> (i32, i32, i32) {
    %c0_i32 = arith.constant 0 : i32
    %c0_i32_0 = arith.constant 0 : i32
    %c0_i32_1 = arith.constant 0 : i32
    %c0_i32_2 = arith.constant 0 : i32
    return %c0_i32, %c0_i32_0, %c0_i32_1 : i32, i32, i32
  }
  func.func @transform_12(%arg0: i32) -> (i32, i32, i32) {
    %c0_i32 = arith.constant 0 : i32
    %c0_i32_0 = arith.constant 0 : i32
    %c0_i32_1 = arith.constant 0 : i32
    %c0_i32_2 = arith.constant 0 : i32
    return %c0_i32, %c0_i32_0, %c0_i32_1 : i32, i32, i32
  }
  func.func @transform_13(%arg0: i32) -> (i32, i32, i32) {
    %c0_i32 = arith.constant 0 : i32
    %c0_i32_0 = arith.constant 0 : i32
    %c0_i32_1 = arith.constant 0 : i32
    %c0_i32_2 = arith.constant 0 : i32
    return %c0_i32, %c0_i32_0, %c0_i32_1 : i32, i32, i32
  }
  func.func @transform_14(%arg0: i32) -> (i32, i32, i32) {
    %c0_i32 = arith.constant 0 : i32
    %c0_i32_0 = arith.constant 0 : i32
    %c0_i32_1 = arith.constant 0 : i32
    %c0_i32_2 = arith.constant 0 : i32
    return %c0_i32, %c0_i32_0, %c0_i32_1 : i32, i32, i32
  }
  func.func @transform_15(%arg0: i32) -> (i32, i32, i32) {
    %c0_i32 = arith.constant 0 : i32
    %c0_i32_0 = arith.constant 0 : i32
    %c0_i32_1 = arith.constant 0 : i32
    %c0_i32_2 = arith.constant 0 : i32
    return %c0_i32, %c0_i32_0, %c0_i32_1 : i32, i32, i32
  }
  func.func @transform_16(%arg0: i32) -> (i32, i32, i32) {
    %c0_i32 = arith.constant 0 : i32
    %c0_i32_0 = arith.constant 0 : i32
    %c0_i32_1 = arith.constant 0 : i32
    %c0_i32_2 = arith.constant 0 : i32
    return %c0_i32, %c0_i32_0, %c0_i32_1 : i32, i32, i32
  }
  func.func @transform_17(%arg0: i32) -> (i32, i32, i32) {
    %c0_i32 = arith.constant 0 : i32
    %c0_i32_0 = arith.constant 0 : i32
    %c0_i32_1 = arith.constant 0 : i32
    %c0_i32_2 = arith.constant 0 : i32
    return %c0_i32, %c0_i32_0, %c0_i32_1 : i32, i32, i32
  }
  func.func @transform_18(%arg0: i32) -> (i32, i32, i32) {
    %c0_i32 = arith.constant 0 : i32
    %c0_i32_0 = arith.constant 0 : i32
    %c0_i32_1 = arith.constant 0 : i32
    %c0_i32_2 = arith.constant 0 : i32
    return %c0_i32, %c0_i32_0, %c0_i32_1 : i32, i32, i32
  }
  func.func @transform_19(%arg0: i32) -> (i32, i32, i32) {
    %c0_i32 = arith.constant 0 : i32
    %c0_i32_0 = arith.constant 0 : i32
    %c0_i32_1 = arith.constant 0 : i32
    %c0_i32_2 = arith.constant 0 : i32
    return %c0_i32, %c0_i32_0, %c0_i32_1 : i32, i32, i32
  }
  func.func @transform_20(%arg0: i32) -> (i32, i32, i32) {
    %c0_i32 = arith.constant 0 : i32
    %c0_i32_0 = arith.constant 0 : i32
    %c0_i32_1 = arith.constant 0 : i32
    %c0_i32_2 = arith.constant 0 : i32
    return %c0_i32, %c0_i32_0, %c0_i32_1 : i32, i32, i32
  }
  func.func @transform_21(%arg0: i32) -> (i32, i32, i32) {
    %c0_i32 = arith.constant 0 : i32
    %c0_i32_0 = arith.constant 0 : i32
    %c0_i32_1 = arith.constant 0 : i32
    %c0_i32_2 = arith.constant 0 : i32
    return %c0_i32, %c0_i32_0, %c0_i32_1 : i32, i32, i32
  }
  func.func @transform_22(%arg0: i32) -> (i32, i32, i32) {
    %c0_i32 = arith.constant 0 : i32
    %c0_i32_0 = arith.constant 0 : i32
    %c0_i32_1 = arith.constant 0 : i32
    %c0_i32_2 = arith.constant 0 : i32
    return %c0_i32, %c0_i32_0, %c0_i32_1 : i32, i32, i32
  }
  func.func @transform_23(%arg0: i32) -> (i32, i32, i32) {
    %c0_i32 = arith.constant 0 : i32
    %c0_i32_0 = arith.constant 0 : i32
    %c0_i32_1 = arith.constant 0 : i32
    %c0_i32_2 = arith.constant 0 : i32
    return %c0_i32, %c0_i32_0, %c0_i32_1 : i32, i32, i32
  }
  func.func @transform_24(%arg0: i32) -> (i32, i32) {
    %c0_i32 = arith.constant 0 : i32
    %c0_i32_0 = arith.constant 0 : i32
    %c0_i32_1 = arith.constant 0 : i32
    return %c0_i32, %c0_i32_0 : i32, i32
  }
  func.func @transform_25(%arg0: i32) -> (i32, i32) {
    %c0_i32 = arith.constant 0 : i32
    %c0_i32_0 = arith.constant 0 : i32
    %c0_i32_1 = arith.constant 0 : i32
    return %c0_i32, %c0_i32_0 : i32, i32
  }
  func.func @transform_26(%arg0: i32) -> (i32, i32) {
    %c0_i32 = arith.constant 0 : i32
    %c0_i32_0 = arith.constant 0 : i32
    %c0_i32_1 = arith.constant 0 : i32
    return %c0_i32, %c0_i32_0 : i32, i32
  }
  func.func @transform_27(%arg0: i32) -> (i32, i32) {
    %c0_i32 = arith.constant 0 : i32
    %c0_i32_0 = arith.constant 0 : i32
    %c0_i32_1 = arith.constant 0 : i32
    return %c0_i32, %c0_i32_0 : i32, i32
  }
  func.func @transform_28(%arg0: i32) -> (i32, i32, i32) {
    %c0_i32 = arith.constant 0 : i32
    %c0_i32_0 = arith.constant 0 : i32
    %c0_i32_1 = arith.constant 0 : i32
    return %arg0, %c0_i32, %c0_i32_0 : i32, i32, i32
  }
}

</mosaic_0001>

<bundles_post_ra>
// kernel: decoder_forward.1
= control target key start
LH: loop header
LB: loop body
LE: loop exit
PB: predicated region body
PF: predicated region fallthrough
CT: control target
= control target key end

     0   :  { %s7513_s0 = inlined_call_operand.vmem [shape: f32[2,8,32], index: 0, kind: input, shape index: {}]   ;;  %s7514_s1 = inlined_call_operand.vmem [shape: f32[2,12,32], index: 1, kind: input, shape index: {}]   ;;  %s7515_s2 = inlined_call_operand.vmem [shape: f32[2,8,8], index: 2, kind: input, shape index: {}]   ;;  %s7516_s3 = inlined_call_operand.vmem [shape: f32[2,8,12], index: 3, kind: input, shape index: {}]   ;;  %s7517_s4 = inlined_call_operand.vmem [shape: f32[2,1,32], index: 4, kind: input, shape index: {}]   ;;  %s7518_s5 = inlined_call_operand.vmem [shape: f32[2,1,32], index: 5, kind: input, shape index: {}]   ;;  %s7519_s6 = inlined_call_operand.vmem [shape: f32[2,32,96], index: 6, kind: input, shape index: {}]   ;;  %s7520_s7 = inlined_call_operand.vmem [shape: f32[2,1,96], index: 7, kind: input, shape index: {}]   ;;  %s7521_s8 = inlined_call_operand.vmem [shape: f32[2,32,32], index: 8, kind: input, shape index: {}]   ;;  %s7522_s9 = inlined_call_operand.vmem [shape: f32[2,1,32], index: 9, kind: input, shape index: {}]   ;;  %s7523_s10 = inlined_call_operand.vmem [shape: f32[2,1,32], index: 10, kind: input, shape index: {}]   ;;  %s7524_s11 = inlined_call_operand.vmem [shape: f32[2,1,32], index: 11, kind: input, shape index: {}]   ;;  %s7525_s12 = inlined_call_operand.vmem [shape: f32[2,32,32], index: 12, kind: input, shape index: {}]   ;;  %s7526_s13 = inlined_call_operand.vmem [shape: f32[2,1,32], index: 13, kind: input, shape index: {}]   ;;  %s7527_s14 = inlined_call_operand.vmem [shape: f32[2,32,64], index: 14, kind: input, shape index: {}]   ;;  %s7528_s15 = inlined_call_operand.vmem [shape: f32[2,1,64], index: 15, kind: input, shape index: {}]   ;;  %s7529_s16 = inlined_call_operand.vmem [shape: f32[2,32,32], index: 16, kind: input, shape index: {}]   ;;  %s7530_s17 = inlined_call_operand.vmem [shape: f32[2,1,32], index: 17, kind: input, shape index: {}]   ;;  %s7531_s18 = inlined_call_operand.vmem [shape: f32[2,1,32], index: 18, kind: input, shape index: {}]   ;;  %s7532_s19 = inlined_call_operand.vmem [shape: f32[2,1,32], index: 19, kind: input, shape index: {}]   ;;  %s7533_s20 = inlined_call_operand.vmem [shape: f32[2,32,64], index: 20, kind: input, shape index: {}]   ;;  %s7534_s21 = inlined_call_operand.vmem [shape: f32[2,1,64], index: 21, kind: input, shape index: {}]   ;;  %s7535_s22 = inlined_call_operand.vmem [shape: f32[2,64,32], index: 22, kind: input, shape index: {}]   ;;  %s7536_s23 = inlined_call_operand.vmem [shape: f32[2,1,32], index: 23, kind: input, shape index: {}]   ;;  %s7537_s24 = inlined_call_operand.vmem [shape: f32[1,32], index: 24, kind: input, shape index: {}]   ;;  %s7538_s25 = inlined_call_operand.vmem [shape: f32[1,32], index: 25, kind: input, shape index: {}]   ;;  %s7539_s26 = inlined_call_operand.vmem [shape: f32[32,128], index: 26, kind: input, shape index: {}]   ;;  %s7540_s27 = inlined_call_operand.vmem [shape: f32[1,128], index: 27, kind: input, shape index: {}]   ;;  %s7541_s28 = inlined_call_operand.hbm [shape: f32[2,8,128], index: 28, kind: output, shape index: {}]  }
   0x1   :  { %7591 = sst [smem:[#allocation15_spill]] %s7513_s0 }
   0x2   :  { %7592 = sst [smem:[#allocation16_spill]] %s7514_s1 }
   0x3   :  { %7593 = sst [smem:[#allocation17_spill]] %s7515_s2 }
   0x4   :  { %7594 = sst [smem:[#allocation18_spill]] %s7516_s3 }
   0x5   :  { %7595 = sst [smem:[#allocation19_spill]] %s7517_s4 }
   0x6   :  { %7596 = sst [smem:[#allocation20_spill]] %s7518_s5 }
   0x7   :  { %7597 = sst [smem:[#allocation21_spill]] %s7519_s6 }
   0x8   :  { %7598 = sst [smem:[#allocation22_spill]] %s7520_s7 }
   0x9   :  { %7599 = sst [smem:[#allocation23_spill]] %s7521_s8 }
   0xa   :  { %7600 = sst [smem:[#allocation24_spill]] %s7522_s9 }
   0xb   :  { %7601 = sst [smem:[#allocation25_spill]] %s7523_s10 }
   0xc   :  { %7602 = sst [smem:[#allocation26_spill]] %s7524_s11 }
   0xd   :  { %7603 = sst [smem:[#allocation27_spill]] %s7525_s12 }
   0xe   :  { %7604 = sst [smem:[#allocation28_spill]] %s7526_s13 }
   0xf   :  { %7605 = sst [smem:[#allocation29_spill]] %s7527_s14 }
  0x10   :  { %7606 = sst [smem:[#allocation30_spill]] %s7528_s15 }
  0x11   :  { %7607 = sst [smem:[#allocation31_spill]] %s7529_s16 }
  0x12   :  { %7608 = sst [smem:[#allocation32_spill]] %s7530_s17 }
  0x13   :  { %7609 = sst [smem:[#allocation33_spill]] %s7537_s24 }
  0x14   :  { %7610 = sst [smem:[#allocation34_spill]] %s7538_s25 }
  0x15   :  { %7611 = sst [smem:[#allocation35_spill]] %s7539_s26 }
  0x16   :  { %7612 = sst [smem:[#allocation36_spill]] %s7540_s27 }
  0x17   :  { %7613 = sst [smem:[#allocation37_spill]] %s7541_s28 }
  0x18   :  { %33 = vsyncpa [#allocation3], 0 }
  0x19   :  { %35 = vsyncpa [#allocation3 + $0x1], 0  ;;  %s6630_s8 = smov 0   ;;  %s6632_s5 = smov 0  }
  0x1a   :  { %s6634_s9 = smov 0   ;;  %s6636_s30 = smov 0  }
  0x1b LB: > { %7614 = sst [smem:[#allocation5_spill]] %s6452_s8  ;;  %s6651_s3 = sadd.s32 4294967295, %s6464_s30   ;;  %s6464_s30 = sphi %s6636_s30, %s7685_s30   ;;  %s6460_s9 = sphi %s6634_s9, %s7688_s9   ;;  %s6456_s5 = sphi %s6632_s5, %s7687_s5   ;;  %s6452_s8 = sphi %s6630_s8, %s7686_s8  }
  0x1c   : > { %7615 = sst [smem:[#allocation6_spill]] %s6456_s5  ;;  %s5317_s6 = sadd.s32 4294967294, %s6464_s30  }
  0x1d   : > { %7616 = sst [smem:[#allocation7_spill]] %s6460_s9  ;;  %s6655_s10 = sadd.s32 1, %s6464_s30  }
  0x1e   : > { %7617 = sst [smem:[#allocation8_spill]] %s6464_s30  ;;  %s656_s0 = sadd.s32 1, %s6460_s9 }
  0x1f   : > { %7618 = sst [smem:[#allocation9_spill]] %s6651_s3  ;;  %s653_s11 = ssub.s32 %s6464_s30, %s6655_s10 }
  0x20   : > { %7619 = sst [smem:[#allocation10_spill]] %s6655_s10  ;;  %p666_p0 = scmp.ne.s32.totalorder %s6460_s9, %s6456_s5 }
  0x21   : > { %p654_p1 = scmp.eq.s32.totalorder %s653_s11, 0  ;;  %p667_p2 = scmp.eq.s32.totalorder %s6651_s3, 1 }
  0x22   : > { %p672_p3 = scmp.ne.s32.totalorder %s6456_s5, %s6452_s8  ;;  %p673_p4 = scmp.eq.s32.totalorder %s5317_s6, 1 }
  0x23   : > { %s6666_s29 = scalar_select %p654_p1, %s6460_s9, %s656_s0  }
  0x24   : > { %p6668_p5 = por %p667_p2, %p666_p0  ;;  %p6672_p6 = por %p673_p4, %p672_p3 }
  0x25   : > { %7620 = sst [smem:[#allocation11_spill]] %s6666_s29  ;;  %p5320_p7 = scmp.ge.s32.totalorder %s6464_s30, 1 }
  0x26   : > { %s7621_s2 = scalar_select %p6668_p5, 1, 0 }
  0x27   : > { %s7623_s7 = scalar_select %p6672_p6, 1, 0 }
  0x28   : > { %7622 = sst [smem:[#allocation12_spill]] %s7621_s2  ;;  %p792_p8 = scmp.lt.s32.totalorder %s6464_s30, 3 }
  0x29   : > { %7624 = sst [smem:[#allocation13_spill]] %s7623_s7 }
  0x2a   : > { %p793_p9 = pnand %p5320_p7, %p792_p8 }
  0x2c   : > { %796 = sbr.rel (%p793_p9) target bundleno = 11725 (0x2dcd), region = 132 }
  0x33   : > { %p878_p10 = scmp.lt.s32.totalorder %s6651_s3, 1  ;;  %vm902_vm0 = vcmask 261120   ;;  %s7625_s0 = sld [smem:[#allocation15_spill]]  ;;  %v6466_v10 = vmov 0.0|0.0   ;;  %vm6467_vm1 = vmmov 0   ;;  %v6468_v13 = vmov 0.0  }
  0x34   : > { %s7626_s10 = sld [smem:[#allocation21_spill]]  ;;  %6025 = vmatprep.subr.bf16.mxu0 %v6466_v10  ;;  %5660 = vmatprep.mubr.msk.f32.mxu0 %vm6467_vm1, %v6468_v13  ;;  %s7627_s29 = sld [smem:[#allocation19_spill]]  ;;  %vm1023_vm2 = vcmask 64512   ;;  %vm1701_vm3 = vcmask 130048   ;;  %vm1703_vm4 = vcmask 195584   ;;  %vm2076_vm6 = vcmask 97280  }
  0x35   : > { %s6680_s12 = scalar_select %p878_p10, %s6651_s3, 1  ;;  %5663 = vmatprep.subr.mxu1 %v6468_v13  ;;  %5665 = vmatprep.mubr.msk.f32.mxu1 %vm6467_vm1, %v6468_v13  ;;  %vm6891_vm5 = vmpackc.low %vm1023_vm2, %vm1023_vm2  ;;  %vm2096_vm7 = vcmask 1043456   ;;  %vm6483_vm8 = vmmov 1   ;;  %vm2911_vm10 = vcmask 523264  }
  0x36   : > { %s7628_s6 = sld [smem:[#allocation20_spill]]  ;;  %s7629_s30 = sld [smem:[#allocation22_spill]]  ;;  %vm6942_vm9 = vmpackc.low %vm2096_vm7, %vm6483_vm8 }
  0x37   : > { %s6683_s1 = sshll.u32 %s6680_s12, 3  ;;  %s7558_s8 = smov 64  }
  0x38   : > { %s7559_s9 = smov 96   ;;  %s7572_s7 = smov 88  }
  0x39   : > { %s881_s11 = scalar_lea.vmem %s7625_s0, %s6683_s1  ;;  %s7574_s4 = smov 120  }
  0x3a   : > { %v6689_v0 = vld [vmem:[%s881_s11] sm:$0xff]  ;;  %v932_v8 = vld [vmem:[%s7626_s10 + $0x8] sm:$0xff]  ;;  %v933_v9 = vld [vmem:[%s7626_s10 + $0x10] sm:$0xff]  ;;  %s7631_s11 = sld [smem:[#allocation17_spill]]  ;;  %s7561_s0 = smov 72  }
  0x3b   : > { %v903_v1 = vsel %vm902_vm0, %v6689_v0, 0.0  ;;  %v931_v7 = vld [vmem:[%s7626_s10] sm:$0xff]  ;;  %v934_v12 = vld [vmem:[%s7626_s10 + $0x18] sm:$0xff]  ;;  %s7633_s2 = sld [smem:[#allocation24_spill]]  ;;  %s7634_s14 = sld [smem:[#allocation29_spill]] }
  0x3c   : > { %904 = vadd.xlane.f32.xlu0 %v903_v1  ;;  %v6026_v11 = vpack.c.bf16 %v932_v8, %v931_v7  ;;  %v6029_v14 = vpack.c.bf16 %v934_v12, %v933_v9  ;;  %v5327_v19 = vld [vmem:[%s7627_s29] ss:$0 sm:$0xff]  ;;  %s7630_s28 = smov %s7629_s30  ;;  %s7635_s24 = sld [smem:[#allocation16_spill]] }
  0x3d   : > { %v5328_v21 = vld [vmem:[%s7628_s6] ss:$0 sm:$0xff]  ;;  %s7636_s27 = sld [smem:[#allocation27_spill]]  ;;  %s7637_s25 = sld [smem:[#allocation25_spill]] }
  0x3e   : > { %6027 = vmatpush3.bf16.msra.mxu0 %v6026_v11  ;;  %v5329_v24 = vld [vmem:[%s7629_s30] ss:$0 sm:$0xff]  ;;  %s7570_s30 = smov 112   ;;  %s7639_s15 = sld [smem:[#allocation30_spill]] }
  0x3f   : > { %6028 = vmatprep.subr.bf16.mxu0 %v6466_v10  ;;  %s7643_s13 = sld [smem:[#allocation28_spill]]  ;;  %s7654_s5 = smov 16  }
  0x40   : > { %s7655_s26 = smov 72   ;;  %s7656_s16 = sld [smem:[#allocation31_spill]] }
  0x41   : > { %s7658_s17 = sld [smem:[#allocation32_spill]] }
  0x42   : > { %6030 = vmatpush3.bf16.msra.mxu0 %v6029_v14 }
  0x43   : > { %5683 = vmatprep.subr.mxu0 %v6468_v13 }
  0xc9   : > { %v905_v2 = vpop.xlane.xlu0 %904 }
  0xca   : > { %v907_v3 = vmul.f32 0.03125, %v905_v2 }
  0xcc   : > { %v908_v4 = vsub.f32 %v6689_v0, %v907_v3 }
  0xce   : > { %v909_v5 = vmul.f32 %v908_v4, %v908_v4 }
  0xd0   : > { %v910_v6 = vsel %vm902_vm0, %v909_v5, 0.0 }
  0xd1   : > { %911 = vadd.xlane.f32.xlu0 %v910_v6 }
 0x15e   : > { %v912_v15 = vpop.xlane.xlu0 %911 }
 0x15f   : > { %v913_v16 = vmul.f32 0.03125, %v912_v15 }
 0x161   : > { %v914_v17 = vadd.f32 1e-05, %v913_v16 }
 0x163   : > { %6322 = vrsqrt.f32 %v914_v17 }
 0x16d   : > { %v6323_v18 = vpop.eup %6322 }
 0x16e   : > { %v916_v20 = vmul.f32 %v6323_v18, %v908_v4 }
 0x170   : > { %v923_v22 = vmul.f32 %v5327_v19, %v916_v20 }
 0x172   : > { %v930_v23 = vadd.f32 %v5328_v21, %v923_v22 }
 0x174   : > { %5661 = vmatmul.mubr.msk.f32.vlgmr.msra.gmra.mrb[0].mxu0 %vm902_vm0, %v930_v23 }
 0x175   : > { %5685 = vmatprep.mubr.msk.f32.mxu0 %vm6467_vm1, %v6468_v13 }
 0x247   : > { %v1011_v25 = vpop.f32.mrb[0].mxu0 }
 0x248   : > { %v6727_v26 = vadd.f32 %v5329_v24, %v1011_v25  ;;  %v5662_v27 = vpop.f32.mrb[1].mxu0 }
 0x24a   : > { %1111 = vrot.lane.b32.xlu0 %v6727_v26, %s7558_s8  ;;  %1021 = vrot.lane.b32.xlu1 %v6727_v26, %s7559_s9  ;;  %s6748_s8 = scalar_lea.vmem %s7631_s11, %s6683_s1  ;;  %s7565_s9 = smov 80  }
 0x24b   : > { %v898_v30 = vld [vmem:[%s6748_s8] sm:$0xff]  ;;  %s7563_s11 = smov 104  }
 0x24e   : > { %1189 = vrot.lane.b32.xlu0 %v6727_v26, %s7572_s7  ;;  %s7580_s7 = smov 16  }
 0x252   : > { %1187 = vrot.lane.b32.xlu0 %v6727_v26, %s7574_s4  ;;  %s7644_s4 = sld [smem:[#allocation18_spill]] }
 0x2bc   : > { %v1022_v28 = vpop.permute.xlu1 %1021  ;;  %v1112_v29 = vpop.permute.xlu0 %1111 }
 0x2bd   : > { %5664 = vmatpush3.xpose.msk.msra.mxu1 %vm1023_vm2, %v1022_v28 }
 0x2be   : > { %5668 = vmatprep.subr.mxu1 %v6468_v13 }
 0x2c0   : > { %5666 = vmatmul.mubr.msk.f32.vlgmr.msra.gmra.mrb[0].mxu1 %vm1023_vm2, %v6727_v26  ;;  %v1190_v42 = vpop.permute.xlu0 %1189 }
 0x2c1   : > { %5669 = vmatpush3.msra.mxu1 %v1112_v29  ;;  %5670 = vmatprep.mubr.msk.f32.mxu1 %vm6467_vm1, %v6468_v13 }
 0x2c2   : > { %5673 = vmatprep.subr.mxu1 %v6468_v13 }
 0x2c4   : > { %v1188_v43 = vpop.permute.xlu0 %1187 }
 0x393   : > { %v1094_v31 = vpop.f32.mrb[0].mxu1 }
 0x394   : > { %v1098_v32 = vmul.f32 0.35355338, %v1094_v31  ;;  %v5667_v33 = vpop.f32.mrb[1].mxu1 }
 0x396   : > { %v1099_v34 = vadd.f32 %v1098_v32, %v898_v30 }
 0x398   : > { %v1100_v35 = vsel %vm1023_vm2, %v1099_v34, -inf }
 0x399   : > { %1101 = vmax.xlane.f32.xlu1 %v1100_v35 }
 0x3aa   : > { %1356 = vrot.lane.b32.xlu1 %v6727_v26, %s7565_s9  ;;  %s7567_s9 = smov 40  }
 0x426   : > { %v1102_v36 = vpop.xlane.xlu1 %1101 }
 0x427   : > { %v1103_v37 = vsub.f32 %v1099_v34, %v1102_v36 }
 0x429   : > { %v1104_v38 = vmul.f32 1.442695, %v1103_v37 }
 0x42a   : > { %v1357_v39 = vpop.permute.xlu1 %1356 }
 0x42b   : > { %6324 = vpow2.f32 %v1104_v38  ;;  %5684 = vmatpush3.xpose.msk.msra.mxu0 %vm1023_vm2, %v1357_v39 }
 0x42c   : > { %5693 = vmatprep.subr.mxu0 %v6468_v13 }
 0x435   : > { %v6325_v40 = vpop.eup %6324 }
 0x436   : > { %v1106_v41 = vsel %vm1023_vm2, %v6325_v40, 0.0 }
 0x437   : > { %1107 = vadd.xlane.f32.xlu0 %v1106_v41 }
 0x44d   : > { %1354 = vrot.lane.b32.xlu0 %v6727_v26, %s7570_s30  ;;  %s7578_s30 = smov 24  }
 0x451   : > { %1523 = vrot.lane.b32.xlu0 %v6727_v26, %s7561_s0  ;;  %s7568_s0 = smov 48  }
 0x455   : > { %1521 = vrot.lane.b32.xlu0 %v6727_v26, %s7563_s11  ;;  %s7569_s11 = smov 56  }
 0x4c4   : > { %v1108_v44 = vpop.xlane.xlu0 %1107 }
 0x4c5   : > { %6326 = vrcp.f32 %v1108_v44 }
 0x4c8   : > { %v1355_v45 = vpop.permute.xlu0 %1354 }
 0x4c9   : > { %5686 = vmatmul.mubr.msk.f32.vlgmr.msra.gmra.mrb[2].mxu0 %vm1023_vm2, %v1355_v45 }
 0x4ca   : > { %5695 = vmatprep.mubr.msk.f32.mxu0 %vm6467_vm1, %v6468_v13 }
 0x4cc   : > { %v1524_v46 = vpop.permute.xlu0 %1523 }
 0x4cd   : > { %5694 = vmatpush3.xpose.msk.msra.mxu0 %vm1023_vm2, %v1524_v46 }
 0x4ce   : > { %6031 = vmatprep.subr.bf16.mxu0 %v6466_v10 }
 0x4cf   : > { %v6327_v47 = vpop.eup %6326 }
 0x4d0   : > { %v1110_v48 = vmul.f32 %v6327_v47, %v6325_v40  ;;  %v1522_v49 = vpop.permute.xlu0 %1521 }
 0x4d1   : > { %5696 = vmatmul.mubr.msk.f32.vlgmr.msra.gmra.mrb[4].mxu0 %vm1023_vm2, %v1522_v49 }
 0x4d2   : > { %5671 = vmatmul.mubr.msk.f32.vlgmr.msra.gmra.mrb[2].mxu1 %vm1023_vm2, %v1110_v48  ;;  %5711 = vmatprep.mubr.msk.f32.mxu0 %vm6467_vm1, %v6468_v13 }
 0x4d3   : > { %5674 = vmatpush3.xpose.msk.msra.mxu1 %vm1023_vm2, %v1190_v42  ;;  %5675 = vmatprep.mubr.msk.f32.mxu1 %vm6467_vm1, %v6468_v13 }
 0x4d4   : > { %5678 = vmatprep.subr.mxu1 %v6468_v13 }
 0x4d6   : > { %5676 = vmatmul.mubr.msk.f32.vlgmr.msra.gmra.mrb[4].mxu1 %vm1023_vm2, %v1188_v43 }
 0x4d7   : > { %5680 = vmatprep.mubr.msk.f32.mxu1 %vm6467_vm1, %v6468_v13 }
 0x59c   : > { %v1428_v50 = vpop.f32.mrb[2].mxu0 }
 0x59d   : > { %v1432_v51 = vmul.f32 0.35355338, %v1428_v50  ;;  %v5687_v52 = vpop.f32.mrb[3].mxu0 }
 0x59f   : > { %v1433_v53 = vadd.f32 %v1432_v51, %v898_v30  ;;  %v5343_v51 = vld [vmem:[%s7633_s2] ss:$0 sm:$0xff]  ;;  %s7662_s2 = smov 40  }
 0x5a1   : > { %v1434_v54 = vsel %vm1023_vm2, %v1433_v53, -inf }
 0x5a2   : > { %1435 = vmax.xlane.f32.xlu1 %v1434_v54 }
 0x5a4   : > { %v1595_v55 = vpop.f32.mrb[4].mxu0 }
 0x5a5   : > { %v6780_v56 = vpop.f32.mrb[2].mxu1  ;;  %v5697_v57 = vpop.f32.mrb[5].mxu0  ;;  %v1599_v60 = vmul.f32 0.35355338, %v1595_v55 }
 0x5a6   : > { %v5672_v58 = vpop.f32.mrb[3].mxu1  ;;  %v1898_v57 = vld [vmem:[%s7634_s14] sm:$0xff] }
 0x5a7   : > { %v1600_v2 = vadd.f32 %v1599_v60, %v898_v30  ;;  %v1899_v58 = vld [vmem:[%s7634_s14 + $0x8] sm:$0xff] }
 0x5a9   : > { %v1261_v59 = vpop.f32.mrb[4].mxu1  ;;  %v1601_v3 = vsel %vm1023_vm2, %v1600_v2, -inf }
 0x5aa   : > { %v1265_v61 = vmul.f32 0.35355338, %v1261_v59  ;;  %v5677_v62 = vpop.f32.mrb[5].mxu1  ;;  %v6043_v59 = vpack.c.bf16 %v1899_v58, %v1898_v57 }
 0x5ac   : > { %v1266_v63 = vadd.f32 %v1265_v61, %v898_v30 }
 0x5ae   : > { %v1267_v1 = vsel %vm1023_vm2, %v1266_v63, -inf }
 0x5af   : > { %1268 = vmax.xlane.f32.xlu0 %v1267_v1  ;;  %v1900_v1 = vld [vmem:[%s7634_s14 + $0x10] sm:$0xff] }
 0x5b3   : > { %1602 = vmax.xlane.f32.xlu0 %v1601_v3 }
 0x62f   : > { %v1436_v4 = vpop.xlane.xlu1 %1435 }
 0x630   : > { %v1437_v5 = vsub.f32 %v1433_v53, %v1436_v4 }
 0x632   : > { %v1438_v6 = vmul.f32 1.442695, %v1437_v5 }
 0x634   : > { %6328 = vpow2.f32 %v1438_v6  ;;  %v1814_v6 = vld [vmem:[%s7636_s27] sm:$0xff] }
 0x63c   : > { %v1269_v7 = vpop.xlane.xlu0 %1268 }
 0x63d   : > { %v1270_v8 = vsub.f32 %v1266_v63, %v1269_v7  ;;  %v1815_v7 = vld [vmem:[%s7636_s27 + $0x8] sm:$0xff] }
 0x63e   : > { %v6329_v9 = vpop.eup %6328 }
 0x63f   : > { %v1271_v11 = vmul.f32 1.442695, %v1270_v8  ;;  %v1440_v12 = vsel %vm1023_vm2, %v6329_v9, 0.0  ;;  %v6038_v8 = vpack.c.bf16 %v1815_v7, %v1814_v6 }
 0x640   : > { %1441 = vadd.xlane.f32.xlu0 %v1440_v12  ;;  %v1603_v14 = vpop.xlane.xlu0 %1602 }
 0x641   : > { %6330 = vpow2.f32 %v1271_v11  ;;  %v1604_v15 = vsub.f32 %v1600_v2, %v1603_v14  ;;  %v1901_v2 = vld [vmem:[%s7634_s14 + $0x18] sm:$0xff]  ;;  %s7660_s14 = smov 48  }
 0x642   : > { %v6047_v3 = vpack.c.bf16 %v1901_v2, %v1900_v1  ;;  %v1817_v11 = vld [vmem:[%s7636_s27 + $0x18] sm:$0xff] }
 0x643   : > { %v1605_v16 = vmul.f32 1.442695, %v1604_v15 }
 0x645   : > { %6332 = vpow2.f32 %v1605_v16 }
 0x64b   : > { %v6331_v17 = vpop.eup %6330 }
 0x64c   : > { %v1273_v18 = vsel %vm1023_vm2, %v6331_v17, 0.0 }
 0x64d   : > { %1274 = vadd.xlane.f32.xlu0 %v1273_v18  ;;  %v5345_v18 = vld [vmem:[%s7637_s25] ss:$0 sm:$0xff]  ;;  %s7665_s25 = sld [smem:[#allocation29_spill]] }
 0x64f   : > { %v6333_v19 = vpop.eup %6332 }
 0x650   : > { %v1607_v20 = vsel %vm1023_vm2, %v6333_v19, 0.0 }
 0x651   : > { %1608 = vadd.xlane.f32.xlu1 %v1607_v20 }
 0x662   : > { %1445 = vrot.lane.b32.xlu1 %v6727_v26, %s7568_s0  ;;  %s6923_s0 = scalar_lea.vmem %s7644_s4, %s6683_s1  ;;  %s7646_s1 = smov 88  }
 0x663   : > { %1278 = vrot.lane.b32.xlu0 %v6727_v26, %s7569_s11  ;;  %s7632_s11 = sld [smem:[#allocation23_spill]]  ;;  %s7653_s4 = smov 8  }
 0x664   : > { %7645 = sst [smem:[#allocation14_spill]] %s6923_s0 }
 0x666   : > { %1612 = vrot.lane.b32.xlu1 %v6727_v26, %s7567_s9  ;;  %s7582_s9 = smov 8  }
 0x669   : > { %v1015_v33 = vld [vmem:[%s7632_s11] sm:$0xff]  ;;  %v1016_v34 = vld [vmem:[%s7632_s11 + $0x8] sm:$0xff]  ;;  %v1017_v36 = vld [vmem:[%s7632_s11 + $0x10] sm:$0xff] }
 0x66a   : > { %v6032_v35 = vpack.c.bf16 %v1016_v34, %v1015_v33  ;;  %v1018_v37 = vld [vmem:[%s7632_s11 + $0x18] sm:$0xff]  ;;  %v5347_v34 = vld [vmem:[%s7643_s13] ss:$0 sm:$0xff]  ;;  %s7657_s13 = smov 24  }
 0x66b   : > { %v6035_v38 = vpack.c.bf16 %v1018_v37, %v1017_v36 }
 0x66c   : > { %6033 = vmatpush3.bf16.msra.mxu0 %v6032_v35 }
 0x66d   : > { %6034 = vmatprep.subr.bf16.mxu0 %v6466_v10 }
 0x670   : > { %6036 = vmatpush3.bf16.msra.mxu0 %v6035_v38 }
 0x671   : > { %6044 = vmatprep.subr.bf16.mxu0 %v6043_v59 }
 0x6cd   : > { %v1442_v21 = vpop.xlane.xlu0 %1441 }
 0x6da   : > { %v1275_v22 = vpop.xlane.xlu0 %1274 }
 0x6db   : > { %6334 = vrcp.f32 %v1275_v22 }
 0x6dc   : > { %6336 = vrcp.f32 %v1442_v21 }
 0x6de   : > { %v1609_v23 = vpop.xlane.xlu1 %1608  ;;  %v1279_v24 = vpop.permute.xlu0 %1278 }
 0x6df   : > { %5679 = vmatpush3.msra.mxu1 %v1279_v24  ;;  %6338 = vrcp.f32 %v1609_v23  ;;  %v5349_v23 = vld [vmem:[%s7639_s15] ss:$0 sm:$0xff]  ;;  %s7661_s15 = smov 64  }
 0x6e0   : > { %5688 = vmatprep.subr.mxu1 %v6468_v13 }
 0x6e2   : > { %v1446_v28 = vpop.permute.xlu1 %1445 }
 0x6e5   : > { %v6335_v25 = vpop.eup %6334 }
 0x6e6   : > { %v1277_v27 = vmul.f32 %v6335_v25, %v6331_v17  ;;  %v6337_v29 = vpop.eup %6336  ;;  %v1613_v31 = vpop.permute.xlu1 %1612 }
 0x6e7   : > { %v1444_v26 = vmul.f32 %v6337_v29, %v6329_v9  ;;  %v1816_v9 = vld [vmem:[%s7636_s27 + $0x10] sm:$0xff]  ;;  %s7664_s27 = sld [smem:[#allocation24_spill]] }
 0x6e8   : > { %5681 = vmatmul.mubr.msk.f32.vlgmr.msra.gmra.mrb[6].mxu1 %vm1023_vm2, %v1277_v27  ;;  %v6041_v12 = vpack.c.bf16 %v1817_v11, %v1816_v9 }
 0x6e9   : > { %5689 = vmatpush3.msra.mxu1 %v1446_v28  ;;  %5690 = vmatprep.mubr.msk.f32.mxu1 %vm6467_vm1, %v6468_v13  ;;  %v6339_v30 = vpop.eup %6338 }
 0x6ea   : > { %5698 = vmatprep.subr.mxu1 %v6468_v13  ;;  %v1611_v32 = vmul.f32 %v6339_v30, %v6333_v19 }
 0x6ec   : > { %5691 = vmatmul.mubr.msk.f32.vlgmr.msra.gmra.mrb[8].mxu1 %vm1023_vm2, %v1444_v26 }
 0x6ed   : > { %5699 = vmatpush3.msra.mxu1 %v1613_v31  ;;  %5700 = vmatprep.mubr.msk.f32.mxu1 %vm6467_vm1, %v6468_v13 }
 0x6ee   : > { %6037 = vmatprep.subr.bf16.mxu1 %v6466_v10 }
 0x6f0   : > { %5701 = vmatmul.mubr.msk.f32.vlgmr.msra.gmra.mrb[10].mxu1 %vm1023_vm2, %v1611_v32 }
 0x6f1   : > { %5722 = vmatprep.mubr.msk.f32.mxu1 %vm6467_vm1, %v6468_v13  ;;  %6039 = vmatpush3.bf16.msra.mxu1 %v6038_v8 }
 0x6f2   : > { %6040 = vmatprep.subr.bf16.mxu1 %v6466_v10 }
 0x6f5   : > { %6042 = vmatpush3.bf16.msra.mxu1 %v6041_v12 }
 0x6f6   : > { %6051 = vmatprep.subr.bf16.mxu1 %v6466_v10 }
 0x7bb   : > { %v1350_v39 = vpop.f32.mrb[6].mxu1 }
 0x7bc   : > { %1689 = vrot.lane.b32.xlu1 %v1350_v39, %s7582_s9  ;;  %v5682_v40 = vpop.f32.mrb[7].mxu1  ;;  %s7652_s9 = smov 104  }
 0x7bd   : > { %v6926_v40 = vld [vmem:[%s6923_s0] sm:$0xff] }
 0x7bf   : > { %v1517_v41 = vpop.f32.mrb[8].mxu1 }
 0x7c0   : > { %1693 = vrot.lane.b32.xlu0 %v1517_v41, %s7580_s7  ;;  %v5692_v42 = vpop.f32.mrb[9].mxu1  ;;  %s5486_s7 = sshll.u32 %s6680_s12, 4  ;;  %s7648_s12 = smov 96  }
 0x7c1   : > { %s886_s3 = scalar_lea.vmem %s7635_s24, %s5486_s7  ;;  %s7642_s7 = smov 120  }
 0x7c2   : > { %v6852_v4 = vld [vmem:[%s886_s3] sm:$0xff]  ;;  %v6855_v5 = vld [vmem:[%s886_s3 + $0x8] sm:$0xf]  ;;  %s7638_s3 = sld [smem:[#allocation26_spill]]  ;;  %s7651_s24 = smov 80  }
 0x7c3   : > { %v1684_v43 = vpop.f32.mrb[10].mxu1 }
 0x7c4   : > { %1697 = vrot.lane.b32.xlu1 %v1684_v43, %s7578_s30  ;;  %v5702_v44 = vpop.f32.mrb[11].mxu1  ;;  %s7647_s30 = smov 112  }
 0x7c8   : > { %v5346_v20 = vld [vmem:[%s7638_s3] ss:$0 sm:$0xff]  ;;  %s7674_s3 = sld [smem:[#allocation35_spill]] }
 0x82e   : > { %v1690_v45 = vpop.permute.xlu1 %1689 }
 0x82f   : > { %v1700_v47 = vsel %vm1023_vm2, %v6780_v56, %v1690_v45 }
 0x832   : > { %v1694_v46 = vpop.permute.xlu0 %1693 }
 0x833   : > { %v1702_v48 = vsel %vm1701_vm3, %v1700_v47, %v1694_v46 }
 0x836   : > { %v1698_v49 = vpop.permute.xlu1 %1697 }
 0x837   : > { %v1704_v50 = vsel %vm1703_vm4, %v1702_v48, %v1698_v49 }
 0x838   : > { %5712 = vmatmul.mubr.msk.f32.vlgmr.msra.gmra.mrb[6].mxu0 %vm902_vm0, %v1704_v50 }
 0x839   : > { %6046 = vmatpush3.bf16.msra.mxu0 %v6043_v59  ;;  %5733 = vmatprep.mubr.msk.f32.mxu0 %vm902_vm0, %v6852_v4 }
 0x83a   : > { %6048 = vmatprep.subr.bf16.mxu0 %v6047_v3 }
 0x83d   : > { %6050 = vmatpush3.bf16.msra.mxu0 %v6047_v3 }
 0x83e   : > { %6055 = vmatprep.subr.bf16.mxu0 %v6466_v10 }
 0x840   : > { %5734 = vmatmul.mubr.msk.f32.vlgmr.msra.gmra.mrb[8].mxu0 %vm902_vm0, %v6855_v5 }
 0x841   : > { %5747 = vmatprep.mubr.msk.f32.mxu0 %vm6467_vm1, %v6468_v13 }
 0x90b   : > { %v1780_v52 = vpop.f32.mrb[6].mxu0 }
 0x90c   : > { %v1781_v53 = vadd.f32 %v5343_v51, %v1780_v52  ;;  %v5713_v54 = vpop.f32.mrb[7].mxu0 }
 0x90e   : > { %v6830_v55 = vadd.f32 %v1781_v53, %v6689_v0 }
 0x910   : > { %v1787_v56 = vsel %vm902_vm0, %v6830_v55, 0.0 }
 0x911   : > { %1788 = vadd.xlane.f32.xlu0 %v1787_v56 }
 0x913   : > { %v5735_v24 = vpop.f32.mrb[8].mxu0 }
 0x914   : > { %v1987_v25 = vadd.f32 %v5735_v24, %v5349_v23  ;;  %v1981_v27 = vpop.f32.mrb[9].mxu0 }
 0x915   : > { %v1982_v28 = vadd.f32 %v5349_v23, %v1981_v27 }
 0x917   : > { %v6895_v26 = vpack.i.bf16 %v1987_v25, %v1982_v28  ;;  %v6052_v30 = vpack.c.bf16 %v1987_v25, %v1982_v28 }
 0x927   : > { %6253 = vrot.lane.b32.xlu0 %v6895_v26, %s7642_s7 }
 0x99e   : > { %v1789_v60 = vpop.xlane.xlu0 %1788 }
 0x99f   : > { %v1790_v61 = vmul.f32 0.03125, %v1789_v60 }
 0x9a1   : > { %v1791_v0 = vsub.f32 %v6830_v55, %v1790_v61 }
 0x9a2   : > { %v6254_v31 = vpop.permute.xlu0 %6253 }
 0x9a3   : > { %v1792_v62 = vmul.f32 %v1791_v0, %v1791_v0  ;;  %v6256_v32 = vunpack.i.h.bf16 %v6254_v31  ;;  %v6255_v33 = vunpack.i.l.bf16 %v6254_v31 }
 0x9a5   : > { %v1793_v63 = vsel %vm902_vm0, %v1792_v62, 0.0  ;;  %v6060_v36 = vpack.c.bf16 %v6256_v32, %v6255_v33 }
 0x9a6   : > { %1794 = vadd.xlane.f32.xlu1 %v1793_v63 }
 0xa33   : > { %v1795_v14 = vpop.xlane.xlu1 %1794 }
 0xa34   : > { %v1796_v15 = vmul.f32 0.03125, %v1795_v14 }
 0xa36   : > { %v1797_v16 = vadd.f32 1e-05, %v1796_v15 }
 0xa38   : > { %6340 = vrsqrt.f32 %v1797_v16 }
 0xa42   : > { %v6341_v17 = vpop.eup %6340 }
 0xa43   : > { %v1799_v19 = vmul.f32 %v6341_v17, %v1791_v0 }
 0xa45   : > { %v1806_v21 = vmul.f32 %v5345_v18, %v1799_v19 }
 0xa47   : > { %v1813_v22 = vadd.f32 %v5346_v20, %v1806_v21 }
 0xa49   : > { %5723 = vmatmul.mubr.msk.f32.vlgmr.msra.gmra.mrb[12].mxu1 %vm902_vm0, %v1813_v22 }
 0xa4a   : > { %5740 = vmatprep.mubr.msk.f32.mxu1 %vm6467_vm1, %v6468_v13  ;;  %6054 = vmatpush3.bf16.xpose.msk.msra.mxu1 %vm6891_vm5, %v6052_v30 }
 0xa4b   : > { %6059 = vmatprep.subr.bf16.mxu1 %v6466_v10 }
 0xb1c   : > { %v1894_v35 = vpop.f32.mrb[12].mxu1 }
 0xb1d   : > { %v6905_v37 = vadd.f32 %v5347_v34, %v1894_v35  ;;  %v5724_v38 = vpop.f32.mrb[13].mxu1 }
 0xb1f   : > { %2169 = vrot.lane.b32.xlu1 %v6905_v37, %s7642_s7  ;;  %5741 = vmatmul.mubr.msk.f32.vlgmr.msra.gmra.mrb[14].mxu1 %vm1023_vm2, %v6905_v37 }
 0xb20   : > { %6062 = vmatpush3.bf16.xpose.msk.msra.mxu1 %vm6891_vm5, %v6060_v36  ;;  %5754 = vmatprep.mubr.msk.f32.mxu1 %vm6467_vm1, %v6468_v13 }
 0xb21   : > { %6071 = vmatprep.subr.bf16.mxu1 %v6466_v10 }
 0xb91   : > { %v2170_v39 = vpop.permute.xlu1 %2169 }
 0xb92   : > { %5755 = vmatmul.mubr.msk.f32.vlgmr.msra.gmra.mrb[16].mxu1 %vm1023_vm2, %v2170_v39 }
 0xb93   : > { %5775 = vmatprep.mubr.msk.f32.mxu1 %vm6467_vm1, %v6468_v13 }
 0xbf2   : > { %v2070_v41 = vpop.f32.mrb[14].mxu1 }
 0xbf3   : > { %v2074_v42 = vmul.f32 0.35355338, %v2070_v41  ;;  %v5742_v43 = vpop.f32.mrb[15].mxu1 }
 0xbf5   : > { %v2075_v44 = vadd.f32 %v2074_v42, %v6926_v40 }
 0xbf7   : > { %v2077_v45 = vsel %vm2076_vm6, %v2075_v44, -inf }
 0xbf8   : > { %2078 = vmax.xlane.f32.xlu0 %v2077_v45 }
 0xc65   : > { %v2247_v46 = vpop.f32.mrb[16].mxu1 }
 0xc66   : > { %v2251_v47 = vmul.f32 0.35355338, %v2247_v46  ;;  %v5756_v48 = vpop.f32.mrb[17].mxu1 }
 0xc68   : > { %v2252_v49 = vadd.f32 %v2251_v47, %v6926_v40 }
 0xc6a   : > { %v2253_v50 = vsel %vm2076_vm6, %v2252_v49, -inf }
 0xc6b   : > { %2254 = vmax.xlane.f32.xlu1 %v2253_v50 }
 0xc7c   : > { %6263 = vrot.lane.b32.xlu1 %v6895_v26, %s7646_s1 }
 0xc80   : > { %6268 = vrot.lane.b32.xlu1 %v6895_v26, %s7647_s30 }
 0xc84   : > { %2344 = vrot.lane.b32.xlu1 %v6905_v37, %s7647_s30 }
 0xc85   : > { %v2079_v51 = vpop.xlane.xlu0 %2078 }
 0xc86   : > { %v2080_v52 = vsub.f32 %v2075_v44, %v2079_v51 }
 0xc88   : > { %v2081_v53 = vmul.f32 1.442695, %v2080_v52 }
 0xc8a   : > { %6342 = vpow2.f32 %v2081_v53 }
 0xc94   : > { %v6343_v54 = vpop.eup %6342 }
 0xc95   : > { %v2083_v56 = vsel %vm2076_vm6, %v6343_v54, 0.0 }
 0xc96   : > { %2084 = vadd.xlane.f32.xlu0 %v2083_v56 }
 0xcf8   : > { %v2255_v57 = vpop.xlane.xlu1 %2254 }
 0xcf9   : > { %v2256_v58 = vsub.f32 %v2252_v49, %v2255_v57 }
 0xcfb   : > { %v2257_v59 = vmul.f32 1.442695, %v2256_v58 }
 0xcfc   : > { %v6264_v63 = vpop.permute.xlu1 %6263 }
 0xcfd   : > { %6344 = vpow2.f32 %v2257_v59  ;;  %v6266_v8 = vunpack.i.h.bf16 %v6264_v63  ;;  %v6265_v9 = vunpack.i.l.bf16 %v6264_v63 }
 0xcff   : > { %v6064_v15 = vpack.c.bf16 %v6266_v8, %v6265_v9 }
 0xd00   : > { %v6269_v16 = vpop.permute.xlu1 %6268 }
 0xd01   : > { %v6271_v18 = vunpack.i.h.bf16 %v6269_v16  ;;  %v6270_v19 = vunpack.i.l.bf16 %v6269_v16 }
 0xd03   : > { %v6068_v20 = vpack.c.bf16 %v6271_v18, %v6270_v19 }
 0xd04   : > { %v2345_v21 = vpop.permute.xlu1 %2344 }
 0xd07   : > { %v6345_v60 = vpop.eup %6344 }
 0xd08   : > { %v2259_v61 = vsel %vm2076_vm6, %v6345_v60, 0.0 }
 0xd09   : > { %2260 = vadd.xlane.f32.xlu0 %v2259_v61 }
 0xd1f   : > { %6258 = vrot.lane.b32.xlu0 %v6895_v26, %s7648_s12 }
 0xd23   : > { %v2085_v0 = vpop.xlane.xlu0 %2084 }
 0xd24   : > { %6346 = vrcp.f32 %v2085_v0 }
 0xd2e   : > { %v6347_v7 = vpop.eup %6346 }
 0xd2f   : > { %v2087_v12 = vmul.f32 %v6347_v7, %v6343_v54 }
 0xd96   : > { %v2261_v62 = vpop.xlane.xlu0 %2260 }
 0xd97   : > { %6348 = vrcp.f32 %v2261_v62 }
 0xd9a   : > { %v6259_v1 = vpop.permute.xlu0 %6258 }
 0xd9b   : > { %v6261_v2 = vunpack.i.h.bf16 %v6259_v1  ;;  %v6260_v3 = vunpack.i.l.bf16 %v6259_v1 }
 0xd9d   : > { %v6056_v11 = vpack.c.bf16 %v6261_v2, %v6260_v3 }
 0xd9f   : > { %6058 = vmatpush3.bf16.msk.msra.mxu0 %vm6942_vm9, %v6056_v11  ;;  %v1991_v11 = vld [vmem:[%s7656_s16 + $0x8] sm:$0xff] }
 0xda0   : > { %6063 = vmatprep.subr.bf16.mxu0 %v6466_v10 }
 0xda1   : > { %v6349_v14 = vpop.eup %6348 }
 0xda2   : > { %5748 = vmatmul.mubr.msk.f32.vlgmr.msra.gmra.mrb[10].mxu0 %vm2076_vm6, %v2087_v12  ;;  %v2263_v17 = vmul.f32 %v6349_v14, %v6345_v60  ;;  %v1992_v12 = vld [vmem:[%s7656_s16 + $0x10] sm:$0xff] }
 0xda3   : > { %6066 = vmatpush3.bf16.msk.msra.mxu0 %vm6942_vm9, %v6064_v15  ;;  %5761 = vmatprep.mubr.msk.f32.mxu0 %vm6467_vm1, %v6468_v13  ;;  %v1993_v15 = vld [vmem:[%s7656_s16 + $0x18] sm:$0xff] }
 0xda4   : > { %6067 = vmatprep.subr.bf16.mxu0 %v6466_v10  ;;  %v6087_v16 = vpack.c.bf16 %v1993_v15, %v1992_v12 }
 0xda6   : > { %5762 = vmatmul.mubr.msk.f32.vlgmr.msra.gmra.mrb[12].mxu0 %vm2076_vm6, %v2263_v17 }
 0xda7   : > { %5768 = vmatprep.mubr.msk.f32.mxu0 %vm6467_vm1, %v6468_v13 }
 0xdac   : > { %6070 = vmatpush3.bf16.xpose.msk.msra.mxu0 %vm6891_vm5, %v6068_v20 }
 0xdad   : > { %6079 = vmatprep.subr.bf16.mxu0 %v6466_v10 }
 0xdb3   : > { %5769 = vmatmul.mubr.msk.f32.vlgmr.msra.gmra.mrb[14].mxu0 %vm1023_vm2, %v2345_v21 }
 0xdb4   : > { %5789 = vmatprep.mubr.msk.f32.mxu0 %vm6467_vm1, %v6468_v13 }
 0xe75   : > { %v6964_v22 = vpop.f32.mrb[10].mxu0 }
 0xe76   : > { %v5749_v23 = vpop.f32.mrb[11].mxu0 }
 0xe79   : > { %v2340_v24 = vpop.f32.mrb[12].mxu0 }
 0xe7a   : > { %v5763_v25 = vpop.f32.mrb[13].mxu0 }
 0xe86   : > { %v2422_v27 = vpop.f32.mrb[14].mxu0 }
 0xe87   : > { %v2426_v28 = vmul.f32 0.35355338, %v2422_v27  ;;  %v5770_v30 = vpop.f32.mrb[15].mxu0  ;;  %v5372_v27 = vld [vmem:[%s7658_s17] ss:$0 sm:$0xff]  ;;  %s7673_s17 = sld [smem:[#allocation32_spill]] }
 0xe89   : > { %v2427_v31 = vadd.f32 %v2426_v28, %v6926_v40 }
 0xe8b   : > { %v2428_v32 = vsel %vm2076_vm6, %v2427_v31, -inf }
 0xe8c   : > { %2429 = vmax.xlane.f32.xlu0 %v2428_v32 }
 0xea2   : > { %6273 = vrot.lane.b32.xlu0 %v6895_v26, %s7651_s24 }
 0xea6   : > { %2519 = vrot.lane.b32.xlu0 %v6905_v37, %s7652_s9 }
 0xf19   : > { %v2430_v33 = vpop.xlane.xlu0 %2429 }
 0xf1a   : > { %v2431_v34 = vsub.f32 %v2427_v31, %v2430_v33 }
 0xf1c   : > { %v2432_v35 = vmul.f32 1.442695, %v2431_v34 }
 0xf1d   : > { %v6274_v36 = vpop.permute.xlu0 %6273 }
 0xf1e   : > { %6350 = vpow2.f32 %v2432_v35  ;;  %v6276_v38 = vunpack.i.h.bf16 %v6274_v36  ;;  %v6275_v39 = vunpack.i.l.bf16 %v6274_v36 }
 0xf20   : > { %v6072_v41 = vpack.c.bf16 %v6276_v38, %v6275_v39  ;;  %v2818_v39 = vld [vmem:[%s7533_s20] sm:$0xff] }
 0xf21   : > { %v2520_v50 = vpop.permute.xlu0 %2519 }
 0xf22   : > { %6074 = vmatpush3.bf16.msk.msra.mxu1 %vm6942_vm9, %v6072_v41  ;;  %v2819_v41 = vld [vmem:[%s7533_s20 + $0x8] sm:$0xff] }
 0xf23   : > { %6075 = vmatprep.subr.bf16.mxu1 %v6466_v10 }
 0xf28   : > { %v6351_v42 = vpop.eup %6350 }
 0xf29   : > { %v2434_v43 = vsel %vm2076_vm6, %v6351_v42, 0.0 }
 0xf2a   : > { %2435 = vadd.xlane.f32.xlu1 %v2434_v43  ;;  %v2821_v43 = vld [vmem:[%s7533_s20 + $0x18] sm:$0xff] }
 0xf3b   : > { %6278 = vrot.lane.b32.xlu1 %v6895_v26, %s7652_s9 }
 0xfb7   : > { %v2436_v37 = vpop.xlane.xlu1 %2435 }
 0xfb8   : > { %6352 = vrcp.f32 %v2436_v37 }
 0xfbb   : > { %v6279_v44 = vpop.permute.xlu1 %6278 }
 0xfbc   : > { %v6281_v45 = vunpack.i.h.bf16 %v6279_v44  ;;  %v6280_v46 = vunpack.i.l.bf16 %v6279_v44  ;;  %v2903_v44 = vld [vmem:[%s7535_s22] sm:$0xff] }
 0xfbe   : > { %v6076_v49 = vpack.c.bf16 %v6281_v45, %v6280_v46  ;;  %v2904_v45 = vld [vmem:[%s7535_s22 + $0x8] sm:$0xff]  ;;  %v2905_v46 = vld [vmem:[%s7535_s22 + $0x10] sm:$0xff] }
 0xfc2   : > { %v6353_v47 = vpop.eup %6352 }
 0xfc3   : > { %v2438_v48 = vmul.f32 %v6353_v47, %v6351_v42  ;;  %v6090_v42 = vpack.c.bf16 %v2819_v41, %v2818_v39  ;;  %v6096_v47 = vpack.c.bf16 %v2904_v45, %v2903_v44  ;;  %v5389_v41 = vld [vmem:[%s7630_s28 + $0x1] ss:$0 sm:$0xff] }
 0xfc5   : > { %5776 = vmatmul.mubr.msk.f32.vlgmr.msra.gmra.mrb[18].mxu1 %vm2076_vm6, %v2438_v48  ;;  %v2906_v48 = vld [vmem:[%s7535_s22 + $0x18] sm:$0xff] }
 0xfc6   : > { %6078 = vmatpush3.bf16.xpose.msk.msra.mxu1 %vm6891_vm5, %v6076_v49  ;;  %5782 = vmatprep.mubr.msk.f32.mxu1 %vm6467_vm1, %v6468_v13  ;;  %v6099_v49 = vpack.c.bf16 %v2906_v48, %v2905_v46 }
 0xfc7   : > { %6089 = vmatprep.subr.bf16.mxu1 %v6466_v10 }
 0xfcd   : > { %5783 = vmatmul.mubr.msk.f32.vlgmr.msra.gmra.mrb[20].mxu1 %vm1023_vm2, %v2520_v50  ;;  %v2907_v50 = vld [vmem:[%s7535_s22 + $0x20] sm:$0xff] }
 0xfce   : > { %5811 = vmatprep.mubr.msk.f32.mxu1 %vm6467_vm1, %v6468_v13  ;;  %6091 = vmatpush3.bf16.msra.mxu1 %v6090_v42 }
 0xfcf   : > { %6092 = vmatprep.subr.bf16.mxu1 %v6466_v10 }
0x1098   : > { %v2515_v51 = vpop.f32.mrb[18].mxu1 }
0x1099   : > { %v5777_v52 = vpop.f32.mrb[19].mxu1 }
0x10a0   : > { %v2597_v53 = vpop.f32.mrb[20].mxu1 }
0x10a1   : > { %v2601_v54 = vmul.f32 0.35355338, %v2597_v53  ;;  %v5784_v56 = vpop.f32.mrb[21].mxu1 }
0x10a3   : > { %v2602_v57 = vadd.f32 %v2601_v54, %v6926_v40 }
0x10a5   : > { %v2603_v58 = vsel %vm2076_vm6, %v2602_v57, -inf }
0x10a6   : > { %2604 = vmax.xlane.f32.xlu1 %v2603_v58  ;;  %v5374_v58 = vld [vmem:[%s7531_s18] ss:$0 sm:$0xff] }
0x10b7   : > { %2695 = vrot.lane.b32.xlu1 %v2340_v24, %s7653_s4 }
0x10bb   : > { %2699 = vrot.lane.b32.xlu1 %v2515_v51, %s7654_s5  ;;  %v2908_v51 = vld [vmem:[%s7535_s22 + $0x28] sm:$0xff] }
0x10bc   : > { %v6102_v52 = vpack.c.bf16 %v2908_v51, %v2907_v50 }
0x1133   : > { %v2605_v59 = vpop.xlane.xlu1 %2604 }
0x1134   : > { %v2606_v60 = vsub.f32 %v2602_v57, %v2605_v59 }
0x1136   : > { %v2607_v61 = vmul.f32 1.442695, %v2606_v60  ;;  %v5375_v60 = vld [vmem:[%s7532_s19] ss:$0 sm:$0xff] }
0x1137   : > { %v2696_v19 = vpop.permute.xlu1 %2695 }
0x1138   : > { %6354 = vpow2.f32 %v2607_v61  ;;  %v2706_v21 = vsel %vm1023_vm2, %v6964_v22, %v2696_v19 }
0x113b   : > { %v2700_v20 = vpop.permute.xlu1 %2699 }
0x113c   : > { %v2707_v23 = vsel %vm1701_vm3, %v2706_v21, %v2700_v20 }
0x1142   : > { %v6355_v0 = vpop.eup %6354 }
0x1143   : > { %v2609_v62 = vsel %vm2076_vm6, %v6355_v0, 0.0 }
0x1144   : > { %2610 = vadd.xlane.f32.xlu0 %v2609_v62  ;;  %v2909_v62 = vld [vmem:[%s7535_s22 + $0x30] sm:$0xff] }
0x115a   : > { %6283 = vrot.lane.b32.xlu0 %v6895_v26, %s7655_s26  ;;  %v1990_v26 = vld [vmem:[%s7656_s16] sm:$0xff]  ;;  %s7667_s16 = sld [smem:[#allocation25_spill]] }
0x115b   : > { %v6084_v14 = vpack.c.bf16 %v1991_v11, %v1990_v26  ;;  %v5379_v11 = vld [vmem:[%s7536_s23] ss:$0 sm:$0xff] }
0x11d1   : > { %v2611_v63 = vpop.xlane.xlu0 %2610 }
0x11d2   : > { %6356 = vrcp.f32 %v2611_v63  ;;  %v2910_v63 = vld [vmem:[%s7535_s22 + $0x38] sm:$0xff] }
0x11d5   : > { %v6284_v1 = vpop.permute.xlu0 %6283 }
0x11d6   : > { %v6286_v2 = vunpack.i.h.bf16 %v6284_v1  ;;  %v6285_v3 = vunpack.i.l.bf16 %v6284_v1  ;;  %v6105_v1 = vpack.c.bf16 %v2910_v63, %v2909_v62 }
0x11d8   : > { %v6080_v7 = vpack.c.bf16 %v6286_v2, %v6285_v3  ;;  %v5376_v2 = vld [vmem:[%s7534_s21] ss:$0 sm:$0xff] }
0x11da   : > { %6082 = vmatpush3.bf16.msk.msra.mxu0 %vm6942_vm9, %v6080_v7 }
0x11db   : > { %6083 = vmatprep.subr.bf16.mxu0 %v6466_v10 }
0x11dc   : > { %v6357_v8 = vpop.eup %6356 }
0x11dd   : > { %v2613_v9 = vmul.f32 %v6357_v8, %v6355_v0 }
0x11df   : > { %5790 = vmatmul.mubr.msk.f32.vlgmr.msra.gmra.mrb[16].mxu0 %vm2076_vm6, %v2613_v9 }
0x11e0   : > { %5800 = vmatprep.mubr.msk.f32.mxu0 %vm6467_vm1, %v6468_v13  ;;  %6085 = vmatpush3.bf16.msra.mxu0 %v6084_v14 }
0x11e1   : > { %6086 = vmatprep.subr.bf16.mxu0 %v6466_v10 }
0x11e4   : > { %6088 = vmatpush3.bf16.msra.mxu0 %v6087_v16 }
0x11e5   : > { %6095 = vmatprep.subr.bf16.mxu0 %v6466_v10 }
0x12b2   : > { %v2690_v17 = vpop.f32.mrb[16].mxu0 }
0x12b3   : > { %2703 = vrot.lane.b32.xlu0 %v2690_v17, %s7657_s13  ;;  %v5791_v18 = vpop.f32.mrb[17].mxu0  ;;  %s7666_s13 = sld [smem:[#allocation27_spill]] }
0x1325   : > { %v2704_v24 = vpop.permute.xlu0 %2703 }
0x1326   : > { %v2708_v25 = vsel %vm1703_vm4, %v2707_v23, %v2704_v24  ;;  %v5384_v23 = vld [vmem:[%s7626_s10 + $0x20] sm:$0xff]  ;;  %v5385_v24 = vld [vmem:[%s7626_s10 + $0x28] sm:$0xff] }
0x1327   : > { %5801 = vmatmul.mubr.msk.f32.vlgmr.msra.gmra.mrb[18].mxu0 %vm902_vm0, %v2708_v25  ;;  %v6108_v25 = vpack.c.bf16 %v5385_v24, %v5384_v23 }
0x1328   : > { %5830 = vmatprep.mubr.msk.f32.mxu0 %vm6467_vm1, %v6468_v13  ;;  %6097 = vmatpush3.bf16.msra.mxu0 %v6096_v47 }
0x1329   : > { %6098 = vmatprep.subr.bf16.mxu0 %v6466_v10 }
0x132c   : > { %6100 = vmatpush3.bf16.msra.mxu0 %v6099_v49 }
0x132d   : > { %6101 = vmatprep.subr.bf16.mxu0 %v6466_v10 }
0x1330   : > { %6103 = vmatpush3.bf16.msra.mxu0 %v6102_v52 }
0x1331   : > { %6104 = vmatprep.subr.bf16.mxu0 %v6466_v10 }
0x1334   : > { %6106 = vmatpush3.bf16.msra.mxu0 %v6105_v1 }
0x1335   : > { %5854 = vmatprep.subr.mxu0 %v6468_v13 }
0x13fa   : > { %v2784_v28 = vpop.f32.mrb[18].mxu0 }
0x13fb   : > { %v2785_v30 = vadd.f32 %v5372_v27, %v2784_v28  ;;  %v5802_v31 = vpop.f32.mrb[19].mxu0  ;;  %v5386_v27 = vld [vmem:[%s7626_s10 + $0x30] sm:$0xff]  ;;  %v5387_v28 = vld [vmem:[%s7626_s10 + $0x38] sm:$0xff] }
0x13fd   : > { %v2788_v32 = vadd.f32 %v2785_v30, %v6830_v55  ;;  %v2820_v55 = vld [vmem:[%s7533_s20 + $0x10] sm:$0xff]  ;;  %v6111_v30 = vpack.c.bf16 %v5387_v28, %v5386_v27 }
0x13fe   : > { %v6093_v37 = vpack.c.bf16 %v2821_v43, %v2820_v55 }
0x13ff   : > { %v2791_v22 = vsel %vm902_vm0, %v2788_v32, 0.0 }
0x1400   : > { %2792 = vadd.xlane.f32.xlu1 %v2791_v22  ;;  %6094 = vmatpush3.bf16.msra.mxu1 %v6093_v37 }
0x1401   : > { %6107 = vmatprep.subr.bf16.mxu1 %v6466_v10 }
0x148d   : > { %v2793_v33 = vpop.xlane.xlu1 %2792 }
0x148e   : > { %v2794_v34 = vmul.f32 0.03125, %v2793_v33 }
0x1490   : > { %v2795_v35 = vsub.f32 %v2788_v32, %v2794_v34  ;;  %v5382_v34 = vld [vmem:[%s7627_s29 + $0x1] ss:$0 sm:$0xff] }
0x1492   : > { %v2796_v36 = vmul.f32 %v2795_v35, %v2795_v35 }
0x1494   : > { %v2797_v38 = vsel %vm902_vm0, %v2796_v36, 0.0  ;;  %v5383_v36 = vld [vmem:[%s7628_s6 + $0x1] ss:$0 sm:$0xff] }
0x1495   : > { %2798 = vadd.xlane.f32.xlu0 %v2797_v38 }
0x1522   : > { %v2799_v53 = vpop.xlane.xlu0 %2798 }
0x1523   : > { %v2800_v54 = vmul.f32 0.03125, %v2799_v53 }
0x1525   : > { %v2801_v56 = vadd.f32 1e-05, %v2800_v54 }
0x1527   : > { %6358 = vrsqrt.f32 %v2801_v56 }
0x1531   : > { %v6359_v57 = vpop.eup %6358 }
0x1532   : > { %v2803_v59 = vmul.f32 %v6359_v57, %v2795_v35  ;;  %v6400_v57 = vld [vmem:[%s6748_s8] sm:$0xff]  ;;  %s7659_s8 = smov 56  }
0x1534   : > { %v2810_v61 = vmul.f32 %v5374_v58, %v2803_v59 }
0x1536   : > { %v2817_v0 = vadd.f32 %v5375_v60, %v2810_v61 }
0x1538   : > { %5812 = vmatmul.mubr.msk.f32.vlgmr.msra.gmra.mrb[22].mxu1 %vm902_vm0, %v2817_v0 }
0x1539   : > { %5841 = vmatprep.mubr.msk.f32.mxu1 %vm6467_vm1, %v6468_v13  ;;  %6109 = vmatpush3.bf16.msra.mxu1 %v6108_v25 }
0x153a   : > { %6110 = vmatprep.subr.bf16.mxu1 %v6466_v10 }
0x153d   : > { %6112 = vmatpush3.bf16.msra.mxu1 %v6111_v30 }
0x153e   : > { %5844 = vmatprep.subr.mxu1 %v6468_v13 }
0x160b   : > { %v2898_v3 = vpop.f32.mrb[22].mxu1 }
0x160c   : > { %v2899_v7 = vadd.f32 %v5376_v2, %v2898_v3  ;;  %v5813_v8 = vpop.f32.mrb[23].mxu1 }
0x160e   : > { %v2902_v9 = vmax.f32 %v2899_v7, 0.0 }
0x1610   : > { %5831 = vmatmul.mubr.msk.f32.vlgmr.msra.gmra.mrb[20].mxu0 %vm2911_vm10, %v2902_v9 }
0x1611   : > { %5856 = vmatprep.mubr.msk.f32.mxu0 %vm6467_vm1, %v6468_v13 }
0x16e3   : > { %v2981_v26 = vpop.f32.mrb[20].mxu0 }
0x16e4   : > { %v2985_v12 = vadd.f32 %v2981_v26, %v2788_v32  ;;  %v5832_v14 = vpop.f32.mrb[21].mxu0 }
0x16e6   : > { %v7088_v15 = vadd.f32 %v5379_v11, %v2985_v12 }
0x16e8   : > { %v2998_v16 = vsel %vm902_vm0, %v7088_v15, 0.0 }
0x16e9   : > { %2999 = vadd.xlane.f32.xlu0 %v2998_v16 }
0x1776   : > { %v3000_v17 = vpop.xlane.xlu0 %2999 }
0x1777   : > { %v3001_v18 = vmul.f32 0.03125, %v3000_v17 }
0x1779   : > { %v3002_v19 = vsub.f32 %v7088_v15, %v3001_v18 }
0x177b   : > { %v3003_v20 = vmul.f32 %v3002_v19, %v3002_v19 }
0x177d   : > { %v3004_v21 = vsel %vm902_vm0, %v3003_v20, 0.0 }
0x177e   : > { %3005 = vadd.xlane.f32.xlu0 %v3004_v21 }
0x180b   : > { %v3006_v31 = vpop.xlane.xlu0 %3005 }
0x180c   : > { %v3007_v32 = vmul.f32 0.03125, %v3006_v31 }
0x180e   : > { %v3008_v22 = vadd.f32 1e-05, %v3007_v32 }
0x1810   : > { %6360 = vrsqrt.f32 %v3008_v22 }
0x181a   : > { %v6361_v33 = vpop.eup %6360 }
0x181b   : > { %v3010_v35 = vmul.f32 %v6361_v33, %v3002_v19 }
0x181d   : > { %v3017_v38 = vmul.f32 %v5382_v34, %v3010_v35 }
0x181f   : > { %v3024_v39 = vadd.f32 %v5383_v36, %v3017_v38 }
0x1821   : > { %5842 = vmatmul.mubr.msk.f32.vlgmr.msra.gmra.mrb[24].mxu1 %vm902_vm0, %v3024_v39 }
0x1822   : > { %5846 = vmatprep.mubr.msk.f32.mxu1 %vm6467_vm1, %v6468_v13 }
0x18f4   : > { %v3107_v42 = vpop.f32.mrb[24].mxu1 }
0x18f5   : > { %v7120_v55 = vadd.f32 %v5389_v41, %v3107_v42  ;;  %v5843_v43 = vpop.f32.mrb[25].mxu1 }
0x18f7   : > { %3286 = vrot.lane.b32.xlu0 %v7120_v55, %s7646_s1  ;;  %3119 = vrot.lane.b32.xlu1 %v7120_v55, %s7648_s12 }
0x18fb   : > { %3620 = vrot.lane.b32.xlu0 %v7120_v55, %s7655_s26  ;;  %3284 = vrot.lane.b32.xlu1 %v7120_v55, %s7642_s7 }
0x18ff   : > { %3453 = vrot.lane.b32.xlu1 %v7120_v55, %s7651_s24 }
0x1903   : > { %3451 = vrot.lane.b32.xlu1 %v7120_v55, %s7647_s30 }
0x1907   : > { %3618 = vrot.lane.b32.xlu1 %v7120_v55, %s7652_s9 }
0x1969   : > { %v3287_v37 = vpop.permute.xlu0 %3286  ;;  %v3120_v44 = vpop.permute.xlu1 %3119 }
0x196a   : > { %5845 = vmatpush3.xpose.msk.msra.mxu1 %vm1023_vm2, %v3120_v44  ;;  %5855 = vmatpush3.xpose.msk.msra.mxu0 %vm1023_vm2, %v3287_v37 }
0x196b   : > { %5864 = vmatprep.subr.mxu0 %v6468_v13  ;;  %5849 = vmatprep.subr.mxu1 %v6468_v13 }
0x196d   : > { %5847 = vmatmul.mubr.msk.f32.vlgmr.msra.gmra.mrb[26].mxu1 %vm1023_vm2, %v7120_v55  ;;  %v3285_v45 = vpop.permute.xlu1 %3284  ;;  %v3621_v48 = vpop.permute.xlu0 %3620 }
0x196e   : > { %5857 = vmatmul.mubr.msk.f32.vlgmr.msra.gmra.mrb[22].mxu0 %vm1023_vm2, %v3285_v45  ;;  %5851 = vmatprep.mubr.msk.f32.mxu1 %vm6467_vm1, %v6468_v13 }
0x196f   : > { %5866 = vmatprep.mubr.msk.f32.mxu0 %vm6467_vm1, %v6468_v13 }
0x1971   : > { %v3454_v46 = vpop.permute.xlu1 %3453 }
0x1972   : > { %5865 = vmatpush3.xpose.msk.msra.mxu0 %vm1023_vm2, %v3454_v46 }
0x1973   : > { %5874 = vmatprep.subr.mxu0 %v6468_v13 }
0x1975   : > { %v3452_v47 = vpop.permute.xlu1 %3451 }
0x1976   : > { %5867 = vmatmul.mubr.msk.f32.vlgmr.msra.gmra.mrb[24].mxu0 %vm1023_vm2, %v3452_v47 }
0x1977   : > { %5875 = vmatpush3.xpose.msk.msra.mxu0 %vm1023_vm2, %v3621_v48  ;;  %5876 = vmatprep.mubr.msk.f32.mxu0 %vm6467_vm1, %v6468_v13 }
0x1978   : > { %6113 = vmatprep.subr.bf16.mxu0 %v6466_v10 }
0x1979   : > { %v3619_v49 = vpop.permute.xlu1 %3618 }
0x197a   : > { %5877 = vmatmul.mubr.msk.f32.vlgmr.msra.gmra.mrb[26].mxu0 %vm1023_vm2, %v3619_v49 }
0x197b   : > { %5892 = vmatprep.mubr.msk.f32.mxu0 %vm6467_vm1, %v6468_v13 }
0x1a40   : > { %v3191_v50 = vpop.f32.mrb[26].mxu1 }
0x1a41   : > { %v3195_v51 = vmul.f32 0.35355338, %v3191_v50  ;;  %v5848_v52 = vpop.f32.mrb[27].mxu1  ;;  %v3358_v53 = vpop.f32.mrb[22].mxu0 }
0x1a42   : > { %v3362_v54 = vmul.f32 0.35355338, %v3358_v53  ;;  %v5858_v56 = vpop.f32.mrb[23].mxu0  ;;  %v5392_v52 = vld [vmem:[%s7632_s11 + $0x28] sm:$0xff]  ;;  %v5393_v53 = vld [vmem:[%s7632_s11 + $0x30] sm:$0xff] }
0x1a43   : > { %v3196_v58 = vadd.f32 %v6400_v57, %v3195_v51  ;;  %v5391_v51 = vld [vmem:[%s7632_s11 + $0x20] sm:$0xff]  ;;  %v5394_v56 = vld [vmem:[%s7632_s11 + $0x38] sm:$0xff] }
0x1a44   : > { %v3363_v59 = vadd.f32 %v6400_v57, %v3362_v54  ;;  %v6114_v54 = vpack.c.bf16 %v5392_v52, %v5391_v51 }
0x1a45   : > { %v3197_v60 = vsel %vm1023_vm2, %v3196_v58, -inf }
0x1a46   : > { %3198 = vmax.xlane.f32.xlu0 %v3197_v60  ;;  %v3364_v61 = vsel %vm1023_vm2, %v3363_v59, -inf  ;;  %6115 = vmatpush3.bf16.msra.mxu0 %v6114_v54 }
0x1a47   : > { %3365 = vmax.xlane.f32.xlu1 %v3364_v61  ;;  %6116 = vmatprep.subr.bf16.mxu0 %v6466_v10 }
0x1a49   : > { %v3525_v0 = vpop.f32.mrb[24].mxu0 }
0x1a4a   : > { %v3529_v62 = vmul.f32 0.35355338, %v3525_v0  ;;  %v5868_v63 = vpop.f32.mrb[25].mxu0 }
0x1a4c   : > { %v3530_v1 = vadd.f32 %v6400_v57, %v3529_v62 }
0x1a4d   : > { %v3692_v2 = vpop.f32.mrb[26].mxu0 }
0x1a4e   : > { %v3696_v3 = vmul.f32 0.35355338, %v3692_v2  ;;  %v5878_v7 = vpop.f32.mrb[27].mxu0  ;;  %v3531_v8 = vsel %vm1023_vm2, %v3530_v1, -inf }
0x1a4f   : > { %3532 = vmax.xlane.f32.xlu0 %v3531_v8 }
0x1a50   : > { %v3697_v9 = vadd.f32 %v6400_v57, %v3696_v3  ;;  %v6117_v57 = vpack.c.bf16 %v5394_v56, %v5393_v53 }
0x1a52   : > { %v3698_v26 = vsel %vm1023_vm2, %v3697_v9, -inf  ;;  %6118 = vmatpush3.bf16.msra.mxu0 %v6117_v57 }
0x1a53   : > { %3699 = vmax.xlane.f32.xlu0 %v3698_v26 }
0x1ad3   : > { %v3199_v11 = vpop.xlane.xlu0 %3198 }
0x1ad4   : > { %v3200_v12 = vsub.f32 %v3196_v58, %v3199_v11  ;;  %v3366_v14 = vpop.xlane.xlu1 %3365  ;;  %v5408_v11 = vld [vmem:[%s7664_s27 + $0x1] ss:$0 sm:$0xff]  ;;  %s7676_s27 = sld [smem:[#allocation9_spill]] }
0x1ad5   : > { %v3367_v16 = vsub.f32 %v3363_v59, %v3366_v14 }
0x1ad6   : > { %v3201_v17 = vmul.f32 1.442695, %v3200_v12 }
0x1ad7   : > { %v3368_v18 = vmul.f32 1.442695, %v3367_v16 }
0x1ad8   : > { %6362 = vpow2.f32 %v3201_v17 }
0x1ad9   : > { %6364 = vpow2.f32 %v3368_v18 }
0x1adc   : > { %v3533_v19 = vpop.xlane.xlu0 %3532 }
0x1add   : > { %v3534_v20 = vsub.f32 %v3530_v1, %v3533_v19  ;;  %v5421_v19 = vld [vmem:[%s7665_s25 + $0x20] sm:$0xff] }
0x1adf   : > { %v3535_v21 = vmul.f32 1.442695, %v3534_v20 }
0x1ae0   : > { %v3700_v31 = vpop.xlane.xlu0 %3699 }
0x1ae1   : > { %6366 = vpow2.f32 %v3535_v21  ;;  %v3701_v32 = vsub.f32 %v3697_v9, %v3700_v31  ;;  %v5414_v31 = vld [vmem:[%s7666_s13 + $0x20] sm:$0xff] }
0x1ae2   : > { %v6363_v23 = vpop.eup %6362 }
0x1ae3   : > { %v6365_v24 = vpop.eup %6364  ;;  %v3203_v25 = vsel %vm1023_vm2, %v6363_v23, 0.0  ;;  %v3702_v22 = vmul.f32 1.442695, %v3701_v32  ;;  %v5415_v32 = vld [vmem:[%s7666_s13 + $0x28] sm:$0xff] }
0x1ae4   : > { %3204 = vadd.xlane.f32.xlu0 %v3203_v25  ;;  %v3370_v27 = vsel %vm1023_vm2, %v6365_v24, 0.0 }
0x1ae5   : > { %3371 = vadd.xlane.f32.xlu1 %v3370_v27  ;;  %6368 = vpow2.f32 %v3702_v22  ;;  %v5423_v27 = vld [vmem:[%s7665_s25 + $0x30] sm:$0xff]  ;;  %v6120_v22 = vpack.c.bf16 %v5415_v32, %v5414_v31 }
0x1aeb   : > { %v6367_v28 = vpop.eup %6366 }
0x1aec   : > { %v3537_v30 = vsel %vm1023_vm2, %v6367_v28, 0.0 }
0x1aed   : > { %3538 = vadd.xlane.f32.xlu0 %v3537_v30 }
0x1aef   : > { %v6369_v33 = vpop.eup %6368 }
0x1af0   : > { %v3704_v34 = vsel %vm1023_vm2, %v6369_v33, 0.0 }
0x1af6   : > { %3375 = vrot.lane.b32.xlu1 %v7120_v55, %s7659_s8  ;;  %s7675_s8 = sld [smem:[#allocation6_spill]] }
0x1afa   : > { %3542 = vrot.lane.b32.xlu1 %v7120_v55, %s7660_s14  ;;  %s7663_s14 = smov 24  }
0x1b03   : > { %3208 = vrot.lane.b32.xlu0 %v7120_v55, %s7661_s15  ;;  %s7669_s15 = sld [smem:[#allocation30_spill]] }
0x1b1e   : > { %3705 = vadd.xlane.f32.xlu1 %v3704_v34 }
0x1b2f   : > { %3709 = vrot.lane.b32.xlu1 %v7120_v55, %s7662_s2 }
0x1b71   : > { %v3205_v35 = vpop.xlane.xlu0 %3204 }
0x1b72   : > { %6370 = vrcp.f32 %v3205_v35  ;;  %v3372_v36 = vpop.xlane.xlu1 %3371 }
0x1b73   : > { %6372 = vrcp.f32 %v3372_v36 }
0x1b76   : > { %v3376_v42 = vpop.permute.xlu1 %3375 }
0x1b7a   : > { %v3539_v38 = vpop.xlane.xlu0 %3538  ;;  %v3543_v44 = vpop.permute.xlu1 %3542 }
0x1b7b   : > { %6374 = vrcp.f32 %v3539_v38 }
0x1b7c   : > { %v6371_v39 = vpop.eup %6370 }
0x1b7d   : > { %v3207_v41 = vmul.f32 %v6371_v39, %v6363_v23  ;;  %v6373_v37 = vpop.eup %6372 }
0x1b7e   : > { %v3209_v43 = vpop.permute.xlu0 %3208  ;;  %v3374_v55 = vmul.f32 %v6373_v37, %v6365_v24 }
0x1b7f   : > { %5850 = vmatpush3.msra.mxu1 %v3209_v43 }
0x1b80   : > { %5852 = vmatmul.mubr.msk.f32.vlgmr.msra.gmra.mrb[28].mxu1 %vm1023_vm2, %v3207_v41  ;;  %5859 = vmatprep.subr.mxu1 %v6468_v13  ;;  %v5412_v41 = vld [vmem:[%s7667_s16 + $0x1] ss:$0 sm:$0xff]  ;;  %s7670_s16 = sld [smem:[#allocation28_spill]] }
0x1b81   : > { %5860 = vmatpush3.msra.mxu1 %v3376_v42  ;;  %5861 = vmatprep.mubr.msk.f32.mxu1 %vm6467_vm1, %v6468_v13 }
0x1b82   : > { %5869 = vmatprep.subr.mxu1 %v6468_v13 }
0x1b84   : > { %5862 = vmatmul.mubr.msk.f32.vlgmr.msra.gmra.mrb[30].mxu1 %vm1023_vm2, %v3374_v55 }
0x1b85   : > { %v6375_v45 = vpop.eup %6374  ;;  %5870 = vmatpush3.msra.mxu1 %v3543_v44  ;;  %5871 = vmatprep.mubr.msk.f32.mxu1 %vm6467_vm1, %v6468_v13  ;;  %v5426_v44 = vld [vmem:[%s7669_s15 + $0x1] ss:$0 sm:$0xff] }
0x1b86   : > { %v3541_v46 = vmul.f32 %v6375_v45, %v6367_v28  ;;  %5879 = vmatprep.subr.mxu1 %v6468_v13  ;;  %v5424_v28 = vld [vmem:[%s7665_s25 + $0x38] sm:$0xff]  ;;  %v5419_v54 = vld [vmem:[%s7670_s16 + $0x1] ss:$0 sm:$0xff] }
0x1b87   : > { %v6129_v30 = vpack.c.bf16 %v5424_v28, %v5423_v27 }
0x1b88   : > { %5872 = vmatmul.mubr.msk.f32.vlgmr.msra.gmra.mrb[32].mxu1 %vm1023_vm2, %v3541_v46 }
0x1b89   : > { %5881 = vmatprep.mubr.msk.f32.mxu1 %vm6467_vm1, %v6468_v13 }
0x1bab   : > { %v3706_v47 = vpop.xlane.xlu1 %3705 }
0x1bac   : > { %6376 = vrcp.f32 %v3706_v47 }
0x1baf   : > { %v3710_v48 = vpop.permute.xlu1 %3709 }
0x1bb0   : > { %5880 = vmatpush3.msra.mxu1 %v3710_v48 }
0x1bb1   : > { %6119 = vmatprep.subr.bf16.mxu1 %v6466_v10 }
0x1bb6   : > { %v6377_v49 = vpop.eup %6376 }
0x1bb7   : > { %v3708_v50 = vmul.f32 %v6377_v49, %v6369_v33  ;;  %v5416_v33 = vld [vmem:[%s7666_s13 + $0x30] sm:$0xff] }
0x1bb9   : > { %5882 = vmatmul.mubr.msk.f32.vlgmr.msra.gmra.mrb[34].mxu1 %vm1023_vm2, %v3708_v50 }
0x1bba   : > { %5903 = vmatprep.mubr.msk.f32.mxu1 %vm6467_vm1, %v6468_v13  ;;  %6121 = vmatpush3.bf16.msra.mxu1 %v6120_v22 }
0x1bbb   : > { %6122 = vmatprep.subr.bf16.mxu1 %v6466_v10 }
0x1c53   : > { %v3280_v58 = vpop.f32.mrb[28].mxu1 }
0x1c54   : > { %v5853_v59 = vpop.f32.mrb[29].mxu1 }
0x1c57   : > { %v3447_v60 = vpop.f32.mrb[30].mxu1 }
0x1c58   : > { %3786 = vrot.lane.b32.xlu0 %v3447_v60, %s7653_s4  ;;  %v5863_v61 = vpop.f32.mrb[31].mxu1 }
0x1c5b   : > { %v3614_v0 = vpop.f32.mrb[32].mxu1 }
0x1c5c   : > { %3790 = vrot.lane.b32.xlu1 %v3614_v0, %s7654_s5  ;;  %v5873_v62 = vpop.f32.mrb[33].mxu1 }
0x1c8c   : > { %v3781_v63 = vpop.f32.mrb[34].mxu1 }
0x1c8d   : > { %3794 = vrot.lane.b32.xlu0 %v3781_v63, %s7663_s14  ;;  %v5883_v1 = vpop.f32.mrb[35].mxu1 }
0x1cca   : > { %v3787_v2 = vpop.permute.xlu0 %3786 }
0x1ccb   : > { %v3797_v7 = vsel %vm1023_vm2, %v3280_v58, %v3787_v2 }
0x1cce   : > { %v3791_v3 = vpop.permute.xlu1 %3790 }
0x1ccf   : > { %v3798_v8 = vsel %vm1701_vm3, %v3797_v7, %v3791_v3 }
0x1cff   : > { %v3795_v9 = vpop.permute.xlu0 %3794 }
0x1d00   : > { %v3799_v26 = vsel %vm1703_vm4, %v3798_v8, %v3795_v9 }
0x1d01   : > { %5893 = vmatmul.mubr.msk.f32.vlgmr.msra.gmra.mrb[28].mxu0 %vm902_vm0, %v3799_v26 }
0x1d02   : > { %5914 = vmatprep.mubr.msk.f32.mxu0 %vm902_vm0, %v6852_v4  ;;  %v5422_v4 = vld [vmem:[%s7665_s25 + $0x28] sm:$0xff]  ;;  %s7668_s25 = sld [smem:[#allocation26_spill]] }
0x1d03   : > { %v6125_v20 = vpack.c.bf16 %v5422_v4, %v5421_v19 }
0x1d05   : > { %6126 = vmatprep.subr.bf16.mxu0 %v6125_v20 }
0x1d06   : > { %6128 = vmatpush3.bf16.msra.mxu0 %v6125_v20 }
0x1d07   : > { %6130 = vmatprep.subr.bf16.mxu0 %v6129_v30 }
0x1d08   : > { %v5413_v43 = vld [vmem:[%s7668_s25 + $0x1] ss:$0 sm:$0xff]  ;;  %s7680_s25 = sld [smem:[#allocation36_spill]] }
0x1d0a   : > { %6132 = vmatpush3.bf16.msra.mxu0 %v6129_v30 }
0x1d0b   : > { %6137 = vmatprep.subr.bf16.mxu0 %v6466_v10 }
0x1d0d   : > { %5915 = vmatmul.mubr.msk.f32.vlgmr.msra.gmra.mrb[30].mxu0 %vm902_vm0, %v6855_v5  ;;  %v5417_v5 = vld [vmem:[%s7666_s13 + $0x38] sm:$0xff] }
0x1d0e   : > { %5928 = vmatprep.mubr.msk.f32.mxu0 %vm6467_vm1, %v6468_v13  ;;  %v6123_v34 = vpack.c.bf16 %v5417_v5, %v5416_v33 }
0x1d10   : > { %6124 = vmatpush3.bf16.msra.mxu1 %v6123_v34 }
0x1d11   : > { %6133 = vmatprep.subr.bf16.mxu1 %v6466_v10 }
0x1dd4   : > { %v3875_v12 = vpop.f32.mrb[28].mxu0 }
0x1dd5   : > { %v3876_v14 = vadd.f32 %v5408_v11, %v3875_v12  ;;  %v5894_v16 = vpop.f32.mrb[29].mxu0 }
0x1dd7   : > { %v7216_v17 = vadd.f32 %v3876_v14, %v7088_v15 }
0x1dd9   : > { %v3884_v18 = vsel %vm902_vm0, %v7216_v17, 0.0 }
0x1dda   : > { %3885 = vadd.xlane.f32.xlu1 %v3884_v18 }
0x1de0   : > { %v5916_v45 = vpop.f32.mrb[30].mxu0 }
0x1de1   : > { %v4082_v46 = vadd.f32 %v5916_v45, %v5426_v44  ;;  %v4076_v47 = vpop.f32.mrb[31].mxu0 }
0x1de2   : > { %v4077_v48 = vadd.f32 %v5426_v44, %v4076_v47 }
0x1de4   : > { %v7265_v49 = vpack.i.bf16 %v4082_v46, %v4077_v48  ;;  %v6134_v50 = vpack.c.bf16 %v4082_v46, %v4077_v48 }
0x1e67   : > { %v3886_v21 = vpop.xlane.xlu1 %3885 }
0x1e68   : > { %v3887_v23 = vmul.f32 0.03125, %v3886_v21 }
0x1e6a   : > { %v3888_v15 = vsub.f32 %v7216_v17, %v3887_v23 }
0x1e6c   : > { %v3889_v24 = vmul.f32 %v3888_v15, %v3888_v15 }
0x1e6e   : > { %v3890_v25 = vsel %vm902_vm0, %v3889_v24, 0.0 }
0x1e6f   : > { %3891 = vadd.xlane.f32.xlu0 %v3890_v25 }
0x1e85   : > { %6288 = vrot.lane.b32.xlu0 %v7265_v49, %s7642_s7 }
0x1efc   : > { %v3892_v35 = vpop.xlane.xlu0 %3891 }
0x1efd   : > { %v3893_v36 = vmul.f32 0.03125, %v3892_v35 }
0x1eff   : > { %v3894_v38 = vadd.f32 1e-05, %v3893_v36 }
0x1f00   : > { %v6289_v51 = vpop.permute.xlu0 %6288 }
0x1f01   : > { %6378 = vrsqrt.f32 %v3894_v38  ;;  %v6291_v52 = vunpack.i.h.bf16 %v6289_v51  ;;  %v6290_v53 = vunpack.i.l.bf16 %v6289_v51 }
0x1f03   : > { %v6142_v57 = vpack.c.bf16 %v6291_v52, %v6290_v53 }
0x1f0b   : > { %v6379_v39 = vpop.eup %6378 }
0x1f0c   : > { %v3896_v42 = vmul.f32 %v6379_v39, %v3888_v15 }
0x1f0e   : > { %v3903_v37 = vmul.f32 %v5412_v41, %v3896_v42 }
0x1f10   : > { %v3910_v55 = vadd.f32 %v5413_v43, %v3903_v37 }
0x1f12   : > { %5904 = vmatmul.mubr.msk.f32.vlgmr.msra.gmra.mrb[36].mxu1 %vm902_vm0, %v3910_v55 }
0x1f13   : > { %5921 = vmatprep.mubr.msk.f32.mxu1 %vm6467_vm1, %v6468_v13  ;;  %6136 = vmatpush3.bf16.xpose.msk.msra.mxu1 %vm6891_vm5, %v6134_v50 }
0x1f14   : > { %6141 = vmatprep.subr.bf16.mxu1 %v6466_v10 }
0x1fe5   : > { %v3993_v56 = vpop.f32.mrb[36].mxu1 }
0x1fe6   : > { %v7275_v58 = vadd.f32 %v5419_v54, %v3993_v56  ;;  %v5905_v59 = vpop.f32.mrb[37].mxu1 }
0x1fe8   : > { %4264 = vrot.lane.b32.xlu1 %v7275_v58, %s7642_s7  ;;  %5922 = vmatmul.mubr.msk.f32.vlgmr.msra.gmra.mrb[38].mxu1 %vm1023_vm2, %v7275_v58  ;;  %s7671_s7 = sld [smem:[#allocation14_spill]] }
0x1fe9   : > { %6144 = vmatpush3.bf16.xpose.msk.msra.mxu1 %vm6891_vm5, %v6142_v57  ;;  %5935 = vmatprep.mubr.msk.f32.mxu1 %vm6467_vm1, %v6468_v13 }
0x1fea   : > { %6153 = vmatprep.subr.bf16.mxu1 %v6466_v10 }
0x1fee   : > { %v6401_v47 = vld [vmem:[%s7671_s7] sm:$0xff]  ;;  %s7681_s7 = sld [smem:[#allocation37_spill]] }
0x205a   : > { %v4265_v60 = vpop.permute.xlu1 %4264 }
0x205b   : > { %5936 = vmatmul.mubr.msk.f32.vlgmr.msra.gmra.mrb[40].mxu1 %vm1023_vm2, %v4265_v60 }
0x205c   : > { %5956 = vmatprep.mubr.msk.f32.mxu1 %vm6467_vm1, %v6468_v13 }
0x20bb   : > { %v4167_v61 = vpop.f32.mrb[38].mxu1 }
0x20bc   : > { %v4171_v0 = vmul.f32 0.35355338, %v4167_v61  ;;  %v5923_v62 = vpop.f32.mrb[39].mxu1 }
0x20be   : > { %v4172_v63 = vadd.f32 %v4171_v0, %v6926_v40 }
0x20c0   : > { %v4173_v1 = vsel %vm2076_vm6, %v4172_v63, -inf }
0x20c1   : > { %4174 = vmax.xlane.f32.xlu1 %v4173_v1 }
0x20d2   : > { %6293 = vrot.lane.b32.xlu1 %v7265_v49, %s7648_s12 }
0x20d6   : > { %6303 = vrot.lane.b32.xlu1 %v7265_v49, %s7647_s30 }
0x20da   : > { %4439 = vrot.lane.b32.xlu1 %v7275_v58, %s7647_s30  ;;  %s7678_s30 = sld [smem:[#allocation34_spill]] }
0x212e   : > { %v4342_v2 = vpop.f32.mrb[40].mxu1 }
0x212f   : > { %v4346_v3 = vmul.f32 0.35355338, %v4342_v2  ;;  %v5937_v7 = vpop.f32.mrb[41].mxu1 }
0x2131   : > { %v4347_v8 = vadd.f32 %v4346_v3, %v6926_v40 }
0x2133   : > { %v4348_v9 = vsel %vm2076_vm6, %v4347_v8, -inf }
0x2134   : > { %4349 = vmax.xlane.f32.xlu0 %v4348_v9 }
0x214e   : > { %v4175_v26 = vpop.xlane.xlu1 %4174 }
0x214f   : > { %v4176_v11 = vsub.f32 %v4172_v63, %v4175_v26 }
0x2151   : > { %v4177_v12 = vmul.f32 1.442695, %v4176_v11 }
0x2152   : > { %v6294_v14 = vpop.permute.xlu1 %6293 }
0x2153   : > { %6380 = vpow2.f32 %v4177_v12  ;;  %v6296_v16 = vunpack.i.h.bf16 %v6294_v14  ;;  %v6295_v18 = vunpack.i.l.bf16 %v6294_v14 }
0x2155   : > { %v6138_v19 = vpack.c.bf16 %v6296_v16, %v6295_v18 }
0x2156   : > { %v6304_v5 = vpop.permute.xlu1 %6303 }
0x2157   : > { %6140 = vmatpush3.bf16.msk.msra.mxu0 %vm6942_vm9, %v6138_v19  ;;  %v6306_v35 = vunpack.i.h.bf16 %v6304_v5  ;;  %v6305_v36 = vunpack.i.l.bf16 %v6304_v5 }
0x2158   : > { %6145 = vmatprep.subr.bf16.mxu0 %v6466_v10 }
0x2159   : > { %v6150_v39 = vpack.c.bf16 %v6306_v35, %v6305_v36 }
0x215a   : > { %v4440_v41 = vpop.permute.xlu1 %4439 }
0x215d   : > { %v6381_v4 = vpop.eup %6380 }
0x215e   : > { %v4179_v20 = vsel %vm2076_vm6, %v6381_v4, 0.0 }
0x215f   : > { %4180 = vadd.xlane.f32.xlu0 %v4179_v20 }
0x21c1   : > { %v4350_v40 = vpop.xlane.xlu0 %4349 }
0x21c2   : > { %v4351_v21 = vsub.f32 %v4347_v8, %v4350_v40 }
0x21c4   : > { %v4352_v23 = vmul.f32 1.442695, %v4351_v21 }
0x21c6   : > { %6382 = vpow2.f32 %v4352_v23 }
0x21d0   : > { %v6383_v15 = vpop.eup %6382 }
0x21d1   : > { %v4354_v24 = vsel %vm2076_vm6, %v6383_v15, 0.0 }
0x21d2   : > { %4355 = vadd.xlane.f32.xlu0 %v4354_v24 }
0x21e8   : > { %6298 = vrot.lane.b32.xlu0 %v7265_v49, %s7646_s1  ;;  %s7672_s1 = sld [smem:[#allocation31_spill]] }
0x21ec   : > { %v4181_v25 = vpop.xlane.xlu0 %4180 }
0x21ed   : > { %6384 = vrcp.f32 %v4181_v25 }
0x21ee   : > { %v5429_v6 = vld [vmem:[%s7672_s1 + $0x20] sm:$0xff] }
0x21f7   : > { %v6385_v27 = vpop.eup %6384 }
0x21f8   : > { %v4183_v28 = vmul.f32 %v6385_v27, %v6381_v4  ;;  %v5430_v27 = vld [vmem:[%s7672_s1 + $0x28] sm:$0xff] }
0x21fa   : > { %5929 = vmatmul.mubr.msk.f32.vlgmr.msra.gmra.mrb[32].mxu0 %vm2076_vm6, %v4183_v28  ;;  %v5431_v28 = vld [vmem:[%s7672_s1 + $0x30] sm:$0xff] }
0x21fb   : > { %5942 = vmatprep.mubr.msk.f32.mxu0 %vm6467_vm1, %v6468_v13 }
0x225f   : > { %v4356_v30 = vpop.xlane.xlu0 %4355 }
0x2260   : > { %6386 = vrcp.f32 %v4356_v30  ;;  %v6166_v30 = vpack.c.bf16 %v5430_v27, %v5429_v6 }
0x2263   : > { %v6299_v31 = vpop.permute.xlu0 %6298 }
0x2264   : > { %v6301_v32 = vunpack.i.h.bf16 %v6299_v31  ;;  %v6300_v22 = vunpack.i.l.bf16 %v6299_v31  ;;  %v5432_v31 = vld [vmem:[%s7672_s1 + $0x38] sm:$0xff] }
0x2266   : > { %v6146_v33 = vpack.c.bf16 %v6301_v32, %v6300_v22  ;;  %v6169_v32 = vpack.c.bf16 %v5432_v31, %v5431_v28 }
0x2268   : > { %6148 = vmatpush3.bf16.msk.msra.mxu0 %vm6942_vm9, %v6146_v33 }
0x2269   : > { %6149 = vmatprep.subr.bf16.mxu0 %v6466_v10 }
0x226a   : > { %v6387_v34 = vpop.eup %6386 }
0x226b   : > { %v4358_v38 = vmul.f32 %v6387_v34, %v6383_v15 }
0x226d   : > { %5943 = vmatmul.mubr.msk.f32.vlgmr.msra.gmra.mrb[34].mxu0 %vm2076_vm6, %v4358_v38 }
0x226e   : > { %5949 = vmatprep.mubr.msk.f32.mxu0 %vm6467_vm1, %v6468_v13 }
0x2271   : > { %6152 = vmatpush3.bf16.xpose.msk.msra.mxu0 %vm6891_vm5, %v6150_v39 }
0x2272   : > { %6161 = vmatprep.subr.bf16.mxu0 %v6466_v10 }
0x2278   : > { %5950 = vmatmul.mubr.msk.f32.vlgmr.msra.gmra.mrb[36].mxu0 %vm1023_vm2, %v4440_v41  ;;  %v5454_v41 = vld [vmem:[%s7673_s17 + $0x1] ss:$0 sm:$0xff]  ;;  %s5483_s17 = sshll.u32 %s7676_s27, 7  ;;  %s6484_s27 = smov [#allocation2]  }
0x2279   : > { %5970 = vmatprep.mubr.msk.f32.mxu0 %vm6467_vm1, %v6468_v13  ;;  %s6406_s1 = sshll.u32 %s6484_s27, 4  ;;  %s6407_s1 = int_to_ptr.vmem [resolvable:$false] %s6406_s1 }
0x22cd   : > { %v7321_v42 = vpop.f32.mrb[32].mxu0 }
0x22ce   : > { %v5930_v43 = vpop.f32.mrb[33].mxu0 }
0x2340   : > { %v4435_v37 = vpop.f32.mrb[34].mxu0 }
0x2341   : > { %v5944_v55 = vpop.f32.mrb[35].mxu0 }
0x234b   : > { %v4517_v44 = vpop.f32.mrb[36].mxu0 }
0x234c   : > { %v4521_v45 = vmul.f32 0.35355338, %v4517_v44  ;;  %v5951_v46 = vpop.f32.mrb[37].mxu0 }
0x234e   : > { %v4522_v48 = vadd.f32 %v6401_v47, %v4521_v45 }
0x2350   : > { %v4523_v50 = vsel %vm2076_vm6, %v4522_v48, -inf }
0x2351   : > { %4524 = vmax.xlane.f32.xlu1 %v4523_v50 }
0x2362   : > { %6313 = vrot.lane.b32.xlu1 %v7265_v49, %s7652_s9 }
0x2366   : > { %4614 = vrot.lane.b32.xlu1 %v7275_v58, %s7652_s9 }
0x23de   : > { %v4525_v51 = vpop.xlane.xlu1 %4524 }
0x23df   : > { %v4526_v52 = vsub.f32 %v4522_v48, %v4525_v51  ;;  %v5460_v51 = vld [vmem:[%s7533_s20 + $0x20] sm:$0xff] }
0x23e1   : > { %v4527_v53 = vmul.f32 1.442695, %v4526_v52  ;;  %v5461_v52 = vld [vmem:[%s7533_s20 + $0x28] sm:$0xff] }
0x23e2   : > { %v6314_v62 = vpop.permute.xlu1 %6313 }
0x23e3   : > { %6388 = vpow2.f32 %v4527_v53  ;;  %v6316_v63 = vunpack.i.h.bf16 %v6314_v62  ;;  %v6315_v1 = vunpack.i.l.bf16 %v6314_v62  ;;  %v6172_v53 = vpack.c.bf16 %v5461_v52, %v5460_v51 }
0x23e5   : > { %v6158_v3 = vpack.c.bf16 %v6316_v63, %v6315_v1  ;;  %v5472_v63 = vld [vmem:[%s7535_s22 + $0x68] sm:$0xff] }
0x23e6   : > { %v4615_v7 = vpop.permute.xlu1 %4614 }
0x23ed   : > { %v6389_v54 = vpop.eup %6388 }
0x23ee   : > { %v4529_v56 = vsel %vm2076_vm6, %v6389_v54, 0.0 }
0x23ef   : > { %4530 = vadd.xlane.f32.xlu0 %v4529_v56 }
0x2405   : > { %6308 = vrot.lane.b32.xlu0 %v7265_v49, %s7651_s24  ;;  %s875_s24 = sand.u32 1, %s7675_s8  }
0x2406   : > { %s5321_s9 = sshll.u32 %s875_s24, 3  ;;  %s5209_s8 = scalar_lea.sflag [#allocation3], %s875_s24 }
0x247c   : > { %v4531_v57 = vpop.xlane.xlu0 %4530 }
0x247d   : > { %6390 = vrcp.f32 %v4531_v57  ;;  %v5467_v57 = vld [vmem:[%s7535_s22 + $0x40] sm:$0xff] }
0x2480   : > { %v6309_v59 = vpop.permute.xlu0 %6308 }
0x2481   : > { %v6311_v60 = vunpack.i.h.bf16 %v6309_v59  ;;  %v6310_v61 = vunpack.i.l.bf16 %v6309_v59  ;;  %v5468_v59 = vld [vmem:[%s7535_s22 + $0x48] sm:$0xff] }
0x2483   : > { %v6154_v0 = vpack.c.bf16 %v6311_v60, %v6310_v61  ;;  %v5469_v60 = vld [vmem:[%s7535_s22 + $0x50] sm:$0xff]  ;;  %v6178_v61 = vpack.c.bf16 %v5468_v59, %v5467_v57 }
0x2485   : > { %6156 = vmatpush3.bf16.msk.msra.mxu1 %vm6942_vm9, %v6154_v0  ;;  %v5470_v0 = vld [vmem:[%s7535_s22 + $0x58] sm:$0xff] }
0x2486   : > { %6157 = vmatprep.subr.bf16.mxu1 %v6466_v10  ;;  %v6181_v62 = vpack.c.bf16 %v5470_v0, %v5469_v60 }
0x2487   : > { %v6391_v58 = vpop.eup %6390 }
0x2488   : > { %v4533_v2 = vmul.f32 %v6391_v58, %v6389_v54  ;;  %v5463_v54 = vld [vmem:[%s7533_s20 + $0x38] sm:$0xff]  ;;  %v5471_v58 = vld [vmem:[%s7535_s22 + $0x60] sm:$0xff] }
0x2489   : > { %v6184_v1 = vpack.c.bf16 %v5472_v63, %v5471_v58 }
0x248a   : > { %5957 = vmatmul.mubr.msk.f32.vlgmr.msra.gmra.mrb[42].mxu1 %vm2076_vm6, %v4533_v2 }
0x248b   : > { %5963 = vmatprep.mubr.msk.f32.mxu1 %vm6467_vm1, %v6468_v13 }
0x248e   : > { %6160 = vmatpush3.bf16.xpose.msk.msra.mxu1 %vm6891_vm5, %v6158_v3 }
0x248f   : > { %6171 = vmatprep.subr.bf16.mxu1 %v6466_v10 }
0x2495   : > { %5964 = vmatmul.mubr.msk.f32.vlgmr.msra.gmra.mrb[44].mxu1 %vm1023_vm2, %v4615_v7 }
0x2496   : > { %5992 = vmatprep.mubr.msk.f32.mxu1 %vm6467_vm1, %v6468_v13  ;;  %6173 = vmatpush3.bf16.msra.mxu1 %v6172_v53 }
0x2497   : > { %6174 = vmatprep.subr.bf16.mxu1 %v6466_v10 }
0x255d   : > { %v4610_v8 = vpop.f32.mrb[42].mxu1 }
0x255e   : > { %v5958_v9 = vpop.f32.mrb[43].mxu1 }
0x255f   : > { %v5458_v9 = vld [vmem:[%s7531_s18 + $0x1] ss:$0 sm:$0xff] }
0x2568   : > { %v4692_v26 = vpop.f32.mrb[44].mxu1 }
0x2569   : > { %v4696_v11 = vmul.f32 0.35355338, %v4692_v26  ;;  %v5965_v12 = vpop.f32.mrb[45].mxu1 }
0x256b   : > { %v4697_v14 = vadd.f32 %v6401_v47, %v4696_v11  ;;  %v5459_v11 = vld [vmem:[%s7532_s19 + $0x1] ss:$0 sm:$0xff] }
0x256d   : > { %v4698_v16 = vsel %vm2076_vm6, %v4697_v14, -inf }
0x256e   : > { %4699 = vmax.xlane.f32.xlu0 %v4698_v16  ;;  %v5473_v16 = vld [vmem:[%s7535_s22 + $0x70] sm:$0xff] }
0x2584   : > { %6318 = vrot.lane.b32.xlu0 %v7265_v49, %s7655_s26  ;;  %s7677_s26 = sld [smem:[#allocation33_spill]] }
0x2588   : > { %4794 = vrot.lane.b32.xlu0 %v4610_v8, %s7654_s5 }
0x25fb   : > { %v4700_v29 = vpop.xlane.xlu0 %4699 }
0x25fc   : > { %v4701_v18 = vsub.f32 %v4697_v14, %v4700_v29  ;;  %v5474_v29 = vld [vmem:[%s7535_s22 + $0x78] sm:$0xff] }
0x25fe   : > { %v4702_v19 = vmul.f32 1.442695, %v4701_v18  ;;  %v6187_v18 = vpack.c.bf16 %v5474_v29, %v5473_v16 }
0x25ff   : > { %v6319_v4 = vpop.permute.xlu0 %6318 }
0x2600   : > { %6392 = vpow2.f32 %v4702_v19  ;;  %v6321_v20 = vunpack.i.h.bf16 %v6319_v4  ;;  %v6320_v40 = vunpack.i.l.bf16 %v6319_v4  ;;  %v5465_v19 = vld [vmem:[%s7534_s21 + $0x1] ss:$0 sm:$0xff] }
0x2602   : > { %v6162_v21 = vpack.c.bf16 %v6321_v20, %v6320_v40 }
0x2603   : > { %v4795_v35 = vpop.permute.xlu0 %4794 }
0x2604   : > { %6164 = vmatpush3.bf16.msk.msra.mxu0 %vm6942_vm9, %v6162_v21 }
0x2605   : > { %6165 = vmatprep.subr.bf16.mxu0 %v6466_v10 }
0x260a   : > { %v6393_v23 = vpop.eup %6392 }
0x260b   : > { %v4704_v15 = vsel %vm2076_vm6, %v6393_v23, 0.0 }
0x260c   : > { %4705 = vadd.xlane.f32.xlu1 %v4704_v15 }
0x261d   : > { %4790 = vrot.lane.b32.xlu1 %v4435_v37, %s7653_s4 }
0x2699   : > { %v4706_v49 = vpop.xlane.xlu1 %4705 }
0x269a   : > { %6394 = vrcp.f32 %v4706_v49 }
0x269d   : > { %v4791_v5 = vpop.permute.xlu1 %4790 }
0x269e   : > { %v4801_v34 = vsel %vm1023_vm2, %v7321_v42, %v4791_v5  ;;  %v5125_v5 = vld [vmem:[%s7674_s3 + $0x10] sm:$0xff] }
0x269f   : > { %v4802_v36 = vsel %vm1701_vm3, %v4801_v34, %v4795_v35  ;;  %v5126_v34 = vld [vmem:[%s7674_s3 + $0x18] sm:$0xff] }
0x26a0   : > { %v6193_v35 = vpack.c.bf16 %v5126_v34, %v5125_v5 }
0x26a4   : > { %v6395_v24 = vpop.eup %6394 }
0x26a5   : > { %v4708_v25 = vmul.f32 %v6395_v24, %v6393_v23  ;;  %v5477_v23 = vld [vmem:[%s7536_s23 + $0x1] ss:$0 sm:$0xff] }
0x26a7   : > { %5971 = vmatmul.mubr.msk.f32.vlgmr.msra.gmra.mrb[38].mxu0 %vm2076_vm6, %v4708_v25 }
0x26a8   : > { %5981 = vmatprep.mubr.msk.f32.mxu0 %vm6467_vm1, %v6468_v13  ;;  %6167 = vmatpush3.bf16.msra.mxu0 %v6166_v30 }
0x26a9   : > { %6168 = vmatprep.subr.bf16.mxu0 %v6466_v10 }
0x26ac   : > { %6170 = vmatpush3.bf16.msra.mxu0 %v6169_v32  ;;  %v5123_v32 = vld [vmem:[%s7674_s3] sm:$0xff] }
0x26ad   : > { %6177 = vmatprep.subr.bf16.mxu0 %v6466_v10 }
0x277a   : > { %v4785_v22 = vpop.f32.mrb[38].mxu0 }
0x277b   : > { %4798 = vrot.lane.b32.xlu1 %v4785_v22, %s7663_s14  ;;  %v5972_v33 = vpop.f32.mrb[39].mxu0  ;;  %v5124_v22 = vld [vmem:[%s7674_s3 + $0x8] sm:$0xff]  ;;  %s877_s14 = scalar_lea.vmem [#allocation2], %s5321_s9 }
0x277c   : > { %v6190_v33 = vpack.c.bf16 %v5124_v22, %v5123_v32  ;;  %s5222_s15 = sshll.u32 %s877_s14, 4  ;;  %s7473_s15 = int_to_ptr.vmem [resolvable:$true] %s5222_s15 }
0x277d   : > { %s6402_s5 = scalar_lea.vmem %s7473_s15, 128  ;;  %p6409_p0 = scmp.lt.s32.totalorder %s7473_s15, %s6407_s1 }
0x277e   : > { %p6403_p11 = scmp.ne.s32.totalorder %s7473_s15, %s6402_s5 }
0x2780   : > { %p6404_p12 = pnand %p6403_p11, %p6668_p5 }
0x2782   : > { %p6405_p13 = pneg %p6404_p12 }
0x27ed   : > { %v4799_v38 = vpop.permute.xlu1 %4798 }
0x27ee   : > { %v4803_v39 = vsel %vm1703_vm4, %v4802_v36, %v4799_v38 }
0x27ef   : > { %5982 = vmatmul.mubr.msk.f32.vlgmr.msra.gmra.mrb[40].mxu0 %vm902_vm0, %v4803_v39 }
0x27f0   : > { %6011 = vmatprep.mubr.msk.f32.mxu0 %vm6467_vm1, %v6468_v13  ;;  %6179 = vmatpush3.bf16.msra.mxu0 %v6178_v61 }
0x27f1   : > { %6180 = vmatprep.subr.bf16.mxu0 %v6466_v10 }
0x27f4   : > { %6182 = vmatpush3.bf16.msra.mxu0 %v6181_v62 }
0x27f5   : > { %6183 = vmatprep.subr.bf16.mxu0 %v6466_v10 }
0x27f8   : > { %6185 = vmatpush3.bf16.msra.mxu0 %v6184_v1 }
0x27f9   : > { %6186 = vmatprep.subr.bf16.mxu0 %v6466_v10 }
0x27fc   : > { %6188 = vmatpush3.bf16.msra.mxu0 %v6187_v18 }
0x28c2   : > { %v4879_v43 = vpop.f32.mrb[40].mxu0 }
0x28c3   : > { %v4880_v37 = vadd.f32 %v5454_v41, %v4879_v43  ;;  %v5983_v55 = vpop.f32.mrb[41].mxu0 }
0x28c5   : > { %v4883_v42 = vadd.f32 %v4880_v37, %v7216_v17  ;;  %v5462_v17 = vld [vmem:[%s7533_s20 + $0x30] sm:$0xff]  ;;  %v5479_v37 = vld [vmem:[%s7678_s30] ss:$0 sm:$0xff]  ;;  %s6408_s30 = scalar_lea.vmem %s6407_s1, 256 }
0x28c6   : > { %v6175_v56 = vpack.c.bf16 %v5463_v54, %v5462_v17  ;;  %p6410_p1 = scmp.lt.s32.totalorder %s6408_s30, %s6402_s5 }
0x28c7   : > { %v4888_v44 = vsel %vm902_vm0, %v4883_v42, 0.0 }
0x28c8   : > { %4889 = vadd.xlane.f32.xlu0 %v4888_v44  ;;  %6176 = vmatpush3.bf16.msra.mxu1 %v6175_v56  ;;  %v5480_v44 = vld [vmem:[%s7680_s25] ss:$0 sm:$0xff]  ;;  %p6411_p2 = por %p6410_p1, %p6409_p0 }
0x28c9   : > { %6189 = vmatprep.subr.bf16.mxu1 %v6466_v10 }
0x28ca   : > { %p6412_p3 = pnand %p6411_p2, %p6405_p13 }
0x2955   : > { %v4890_v45 = vpop.xlane.xlu0 %4889 }
0x2956   : > { %v4891_v46 = vmul.f32 0.03125, %v4890_v45 }
0x2958   : > { %v4892_v47 = vsub.f32 %v4883_v42, %v4891_v46 }
0x295a   : > { %v4893_v48 = vmul.f32 %v4892_v47, %v4892_v47 }
0x295c   : > { %v4894_v50 = vsel %vm902_vm0, %v4893_v48, 0.0 }
0x295d   : > { %4895 = vadd.xlane.f32.xlu1 %v4894_v50 }
0x29ea   : > { %v4896_v2 = vpop.xlane.xlu1 %4895 }
0x29eb   : > { %v4897_v3 = vmul.f32 0.03125, %v4896_v2 }
0x29ed   : > { %v4898_v7 = vadd.f32 1e-05, %v4897_v3 }
0x29ef   : > { %6396 = vrsqrt.f32 %v4898_v7 }
0x29f9   : > { %v6397_v8 = vpop.eup %6396 }
0x29fa   : > { %v4900_v26 = vmul.f32 %v6397_v8, %v4892_v47 }
0x29fc   : > { %v4907_v12 = vmul.f32 %v5458_v9, %v4900_v26 }
0x29fe   : > { %v4914_v14 = vadd.f32 %v5459_v11, %v4907_v12 }
0x2a00   : > { %5993 = vmatmul.mubr.msk.f32.vlgmr.msra.gmra.mrb[46].mxu1 %vm902_vm0, %v4914_v14 }
0x2a01   : > { %6022 = vmatprep.mubr.msk.f32.mxu1 %vm6467_vm1, %v6468_v13  ;;  %6191 = vmatpush3.bf16.msra.mxu1 %v6190_v33 }
0x2a02   : > { %6192 = vmatprep.subr.bf16.mxu1 %v6466_v10  ;;  %v5478_v10 = vld [vmem:[%s7677_s26] ss:$0 sm:$0xff]  ;;  %s7471_s26 = scalar_lea.hbm %s7681_s7, %s5483_s17 }
0x2a05   : > { %6194 = vmatpush3.bf16.msra.mxu1 %v6193_v35 }
0x2ad3   : > { %v4997_v4 = vpop.f32.mrb[46].mxu1 }
0x2ad4   : > { %v4998_v20 = vadd.f32 %v5465_v19, %v4997_v4  ;;  %v5994_v40 = vpop.f32.mrb[47].mxu1 }
0x2ad6   : > { %v5001_v21 = vmax.f32 %v4998_v20, 0.0 }
0x2ad8   : > { %6012 = vmatmul.mubr.msk.f32.vlgmr.msra.gmra.mrb[42].mxu0 %vm2911_vm10, %v5001_v21 }
0x2bab   : > { %v5080_v13 = vpop.f32.mrb[42].mxu0 }
0x2bac   : > { %v5084_v15 = vadd.f32 %v5080_v13, %v4883_v42  ;;  %v6013_v49 = vpop.f32.mrb[43].mxu0 }
0x2bae   : > { %v5093_v24 = vadd.f32 %v5477_v23, %v5084_v15 }
0x2bb0   : > { %v5096_v25 = vsel %vm902_vm0, %v5093_v24, 0.0 }
0x2bb1   : > { %5097 = vadd.xlane.f32.xlu0 %v5096_v25 }
0x2c3e   : > { %v5098_v6 = vpop.xlane.xlu0 %5097 }
0x2c3f   : > { %v5099_v27 = vmul.f32 0.03125, %v5098_v6 }
0x2c41   : > { %v5100_v28 = vsub.f32 %v5093_v24, %v5099_v27 }
0x2c43   : > { %v5101_v30 = vmul.f32 %v5100_v28, %v5100_v28 }
0x2c45   : > { %v5102_v31 = vsel %vm902_vm0, %v5101_v30, 0.0 }
0x2c46   : > { %5103 = vadd.xlane.f32.xlu0 %v5102_v31 }
0x2cd3   : > { %v5104_v36 = vpop.xlane.xlu0 %5103 }
0x2cd4   : > { %v5105_v38 = vmul.f32 0.03125, %v5104_v36 }
0x2cd6   : > { %v5106_v39 = vadd.f32 1e-05, %v5105_v38 }
0x2cd8   : > { %6398 = vrsqrt.f32 %v5106_v39 }
0x2ce2   : > { %v6399_v41 = vpop.eup %6398 }
0x2ce3   : > { %v5108_v43 = vmul.f32 %v6399_v41, %v5100_v28 }
0x2ce5   : > { %v5115_v55 = vmul.f32 %v5478_v10, %v5108_v43 }
0x2ce7   : > { %v5122_v42 = vadd.f32 %v5479_v37, %v5115_v55 }
0x2ce9   : > { %6023 = vmatmul.mubr.msk.f32.vlgmr.msra.gmra.mrb[48].mxu1 %vm902_vm0, %v5122_v42 }
0x2dbc   : > { %v5203_v45 = vpop.f32.mrb[48].mxu1 }
0x2dbd   : > { %v5204_v46 = vadd.f32 %v5480_v44, %v5203_v45  ;;  %v6024_v47 = vpop.f32.mrb[49].mxu1 }
0x2dbf   : > { %5207 = vst [vmem:[%s877_s14] sm:$0xff] %v5204_v46 }
0x2dc0   : > { %6415 = shalt.err (!%p6412_p3)
}
0x2dc1   : > { %s6416_s24 = scalar_lea.hbm %s7471_s26, 128  ;;  %s6420_s0 = scalar_lea.hbm %s7681_s7, 256 }
0x2dc2   : > { %p6417_p4 = scmp.ne.s32.totalorder %s7471_s26, %s6416_s24  ;;  %p6421_p9 = scmp.lt.u32.totalorder %s7471_s26, %s7681_s7 }
0x2dc3   : > { %p6422_p10 = scmp.lt.u32.totalorder %s6420_s0, %s6416_s24  ;;  %p6424_p12 = scmp.lt.u32.totalorder %s6416_s24, %s7471_s26 }
0x2dc4   : > { %p6418_p7 = pnand %p6417_p4, %p6668_p5 }
0x2dc5   : > { %p6423_p11 = por %p6422_p10, %p6421_p9 }
0x2dc6   : > { %p6419_p8 = pneg %p6418_p7 }
0x2dc7   : > { %p6425_p13 = por %p6424_p12, %p6423_p11 }
0x2dc9   : > { %p6426_p0 = pnand %p6425_p13, %p6419_p8 }
0x2dcb   : > { %6429 = shalt.err (!%p6426_p0)
}
0x2dcc   : > { %6195 = dma.vmem_to_hbm [thread:$0]  (%p6668_p5), %s7473_s15, 128, %s7471_s26, %s5209_s8  }
0x2dcd PF: > { %s7682_s14 = sld [smem:[#allocation8_spill]]  ;;  %s7683_s2 = sld [smem:[#allocation5_spill]] }
0x2dd3   : > { %p6201_p1 = scmp.ge.s32.totalorder %s7682_s14, 2  ;;  %s5234_s5 = sand.u32 1, %s7683_s2  }
0x2dd4   : > { %s5235_s27 = scalar_lea.sflag [#allocation3], %s5234_s5 }
0x2dd5   : > { %p6198_p2 = pnand %p6201_p1, %p6672_p6 }
0x2dd7   : > { %6447 = dma.done.wait (!%p6198_p2), %s5235_s27, 128  }
0x2dd8   : > { %6449 = vsyncadd (!%p6198_p2), %s5235_s27, 4294967168  ;;  %s7685_s30 = sld [smem:[#allocation10_spill]]  ;;  %s7686_s8 = sld [smem:[#allocation6_spill]] }
0x2dd9   : > { %s7687_s5 = sld [smem:[#allocation7_spill]]  ;;  %s7688_s9 = sld [smem:[#allocation11_spill]] }
0x2dde   : > { %p38_p3 = scmp.ge.s32.totalorder %s7685_s30, 4  }
0x2de0   :  { %40 = sbr.rel (!%p38_p3) target bundleno = 27 (0x1b), region = 196 }
0x2de7   :  { %5240 = vsyncpa [#allocation3], 1 }
0x2de8   :  { %5242 = vsyncpa [#allocation3 + $0x1], 1 }

</bundles_post_ra>
